<compile_context>
chip_gen: v5e
topology: v5e:2x2
jax: 0.10.0
libtpu: 0.0.40
codegen_flags: <defaults>
</compile_context>

<pallas_src>
import functools

import jax
import jax.numpy as jnp
from jax.experimental import pallas as pl
from jax.experimental.pallas import tpu as pltpu

# ---------------- config (small, consistent with the module) ----------------
BATCH = 2
SEQ = 16
HIDDEN = 128
INTERMEDIATE = 256
NUM_HEADS = 4
HEAD_DIM = HIDDEN // NUM_HEADS
NUM_LAYERS = 2
LAYER_NORM_EPS = 1e-6
ATTN_SCALE = HEAD_DIM ** -0.5


def _gelu_tanh(x):
    # matches torch.nn.functional.gelu(x, approximate='tanh')
    return 0.5 * x * (1.0 + jnp.tanh(0.7978845608028654 * (x + 0.044715 * x * x * x)))


def _layer_norm(x, w, b, eps):
    mu = jnp.mean(x, axis=-1, keepdims=True)
    var = jnp.mean((x - mu) * (x - mu), axis=-1, keepdims=True)
    return (x - mu) * jax.lax.rsqrt(var + eps) * w + b


def _split_heads(t, batch, seq, num_heads, head_dim):
    """(B*S, H*Dh) f32 -> (B*H, S, Dh) bf16 via simple per-dim reshape steps."""
    t = t.reshape(batch * seq, num_heads, head_dim)    # split lane dim D -> (H, Dh)
    t = t.reshape(batch, seq, num_heads, head_dim)     # split leading B*S -> (B, S)
    t = jnp.transpose(t, (0, 2, 1, 3))                 # (B, H, S, Dh), minor dim fixed
    t = t.reshape(batch * num_heads, seq, head_dim)    # merge leading dims
    return t.astype(jnp.bfloat16)


def _merge_heads(c, batch, seq, num_heads, head_dim):
    """(B*H, S, Dh) f32 -> (B*S, D) f32."""
    c = c.reshape(batch, num_heads, seq, head_dim)
    c = jnp.transpose(c, (0, 2, 1, 3))                 # (B, S, H, Dh)
    c = c.reshape(batch * seq, num_heads, head_dim)
    return c.reshape(batch * seq, num_heads * head_dim)


# ---------------------------- Pallas kernel ---------------------------------
def encoder_stack_kernel(
    x_ref,        # (B*S, D)  f32   input embeddings, raw HBM ref (memory_space=ANY)
    vec_ref,      # (8, D)    f32   [ln1w, ln1b, ln2w, ln2b, o_b, fc2_b, pad, pad]
    qkvb_ref,     # (1, 3D)   f32   fused [q*scale | k | v] bias
    fc1b_ref,     # (1, I)    f32
    qkvw_ref,     # (D, 3D)   bf16  fused [q*scale | k | v] weight
    ow_ref,       # (D, D)    bf16
    fc1w_ref,     # (D, I)    bf16
    fc2w_ref,     # (I, D)    bf16
    o_ref,        # (B*S, D)  f32   hidden state, VMEM-resident across layers
    seed_sem,     # DMA semaphore scratch (for the one-time seed copy)
    *, batch, seq, num_heads, head_dim,
):
    layer = pl.program_id(0)
    d = num_heads * head_dim

    # Layer 0: one-time DMA of the input embeddings into the resident hidden
    # state.  x is NOT a pipelined input (memory_space=ANY), so it occupies no
    # double-buffered VMEM block on later layers.
    @pl.when(layer == 0)
    def _seed():
        cp = pltpu.make_async_copy(x_ref, o_ref, seed_sem)
        cp.start()
        cp.wait()

    x = o_ref[...]                          # (B*S, D) hidden state (f32)

    sv = vec_ref[...]                       # (8, D) packed small params
    ln1_w, ln1_b = sv[0:1], sv[1:2]
    ln2_w, ln2_b = sv[2:3], sv[3:4]
    o_b, fc2_b = sv[4:5], sv[5:6]

    # ---- LayerNorm 1 + fused QKV projection (bf16 MXU, f32 accumulate) ----
    h = _layer_norm(x, ln1_w, ln1_b, LAYER_NORM_EPS)
    qkv = jnp.dot(h.astype(jnp.bfloat16), qkvw_ref[...],
                  preferred_element_type=jnp.float32) + qkvb_ref[...]   # (B*S, 3D)

    qh = _split_heads(qkv[:, 0 * d:1 * d], batch, seq, num_heads, head_dim)  # (B*H,S,Dh) bf16
    kh = _split_heads(qkv[:, 1 * d:2 * d], batch, seq, num_heads, head_dim)
    vh = _split_heads(qkv[:, 2 * d:3 * d], batch, seq, num_heads, head_dim)

    # ---- Multi-head self-attention, batched over merged (B*H) ----
    # ATTN_SCALE already folded into q weight/bias; softmax in f32.
    s = jnp.einsum('nqd,nkd->nqk', qh, kh, preferred_element_type=jnp.float32)
    s = s - jnp.max(s, axis=-1, keepdims=True)
    p = jnp.exp(s)
    p = p * pl.reciprocal(jnp.sum(p, axis=-1, keepdims=True), approx=True)
    # dropout p=0.0 in eval -> no-op
    c = jnp.einsum('nqk,nkd->nqd', p.astype(jnp.bfloat16), vh,
                   preferred_element_type=jnp.float32)                  # (B*H, S, Dh) f32
    ctx = _merge_heads(c, batch, seq, num_heads, head_dim)              # (B*S, D) f32

    x1 = x + jnp.dot(ctx.astype(jnp.bfloat16), ow_ref[...],
                     preferred_element_type=jnp.float32) + o_b

    # ---- LayerNorm 2 + MLP (fc1 -> gelu(tanh) -> fc2) ----
    h2 = _layer_norm(x1, ln2_w, ln2_b, LAYER_NORM_EPS)
    m = jnp.dot(h2.astype(jnp.bfloat16), fc1w_ref[...],
                preferred_element_type=jnp.float32) + fc1b_ref[...]
    m = _gelu_tanh(m)
    m = jnp.dot(m.astype(jnp.bfloat16), fc2w_ref[...],
                preferred_element_type=jnp.float32) + fc2_b

    o_ref[...] = x1 + m


# ------------------------------- wrapper -------------------------------------
@jax.jit
def siglip_encoder(x, qkvw, ow, fc1w, fc2w, vecs, qkvb, fc1b):
    """x: (B, S, D) f32. Stacked per-layer weights (leading layer axis, bf16)."""
    B, S, D = x.shape
    L = qkvw.shape[0]
    I = fc1w.shape[2]

    kernel = functools.partial(
        encoder_stack_kernel,
        batch=B, seq=S, num_heads=NUM_HEADS, head_dim=D // NUM_HEADS,
    )

    x2 = x.reshape(B * S, D)   # collapse batch into the matmul M dimension

    out = pl.pallas_call(
        kernel,
        out_shape=jax.ShapeDtypeStruct((B * S, D), jnp.float32),
        grid_spec=pltpu.PrefetchScalarGridSpec(
            num_scalar_prefetch=0,
            grid=(L,),
            in_specs=[
                pl.BlockSpec(memory_space=pl.ANY),                       # x (HBM, copied once)
                pl.BlockSpec((None, 8, D), lambda l: (l, 0, 0)),         # packed LN/bias slab
                pl.BlockSpec((None, 1, 3 * D), lambda l: (l, 0, 0)),     # fused qkv bias
                pl.BlockSpec((None, 1, I), lambda l: (l, 0, 0)),         # fc1 bias
                pl.BlockSpec((None, D, 3 * D), lambda l: (l, 0, 0)),     # fused qkv W (bf16)
                pl.BlockSpec((None, D, D), lambda l: (l, 0, 0)),         # out-proj W (bf16)
                pl.BlockSpec((None, D, I), lambda l: (l, 0, 0)),         # fc1 W (bf16)
                pl.BlockSpec((None, I, D), lambda l: (l, 0, 0)),         # fc2 W (bf16)
            ],
            out_specs=pl.BlockSpec((B * S, D), lambda l: (0, 0)),        # VMEM-resident
            scratch_shapes=[pltpu.SemaphoreType.DMA(())],
        ),
        compiler_params=pltpu.CompilerParams(
            dimension_semantics=("arbitrary",),   # layers are sequential
        ),
    )(x2, vecs, qkvb, fc1b, qkvw, ow, fc1w, fc2w)

    return out.reshape(B, S, D)


# ----------------- pure-JAX references (f32 and bf16-matched) ----------------
def siglip_encoder_ref(x, all_params):
    """Full-precision f32 reference matching the PyTorch module in eval mode."""
    B, S, D = x.shape
    h = x
    for (ln1w, ln1b, qw, qb, kw, kb, vw, vb, ow, ob,
         ln2w, ln2b, fc1w, fc1b, fc2w, fc2b) in all_params:
        res = h
        y = _layer_norm(h, ln1w, ln1b, LAYER_NORM_EPS)
        q = y @ qw + qb
        k = y @ kw + kb
        v = y @ vw + vb
        q = q.reshape(B, S, NUM_HEADS, HEAD_DIM).transpose(0, 2, 1, 3)
        k = k.reshape(B, S, NUM_HEADS, HEAD_DIM).transpose(0, 2, 1, 3)
        v = v.reshape(B, S, NUM_HEADS, HEAD_DIM).transpose(0, 2, 1, 3)
        attn = jnp.einsum('bhqd,bhkd->bhqk', q, k) * ATTN_SCALE
        attn = jax.nn.softmax(attn, axis=-1)
        ctx = jnp.einsum('bhqk,bhkd->bhqd', attn, v)
        ctx = ctx.transpose(0, 2, 1, 3).reshape(B, S, D)
        h = res + ctx @ ow + ob
        res = h
        y = _layer_norm(h, ln2w, ln2b, LAYER_NORM_EPS)
        y = _gelu_tanh(y @ fc1w + fc1b)
        h = res + y @ fc2w + fc2b
    return h


def siglip_encoder_packed_ref(x, qkvw, ow, fc1w, fc2w, vecs, qkvb, fc1b):
    """Reference that mirrors the kernel's bf16-operand / f32-accumulate math."""
    B, S, D = x.shape
    h = x.reshape(B * S, D)
    L = qkvw.shape[0]
    for l in range(L):
        sv = vecs[l]
        ln1w, ln1b, ln2w, ln2b, ob, fc2b = sv[0], sv[1], sv[2], sv[3], sv[4], sv[5]
        y = _layer_norm(h, ln1w, ln1b, LAYER_NORM_EPS)
        qkv = jnp.dot(y.astype(jnp.bfloat16), qkvw[l],
                      preferred_element_type=jnp.float32) + qkvb[l]
        q, k, v = qkv[:, :D], qkv[:, D:2 * D], qkv[:, 2 * D:]
        qh = q.astype(jnp.bfloat16).reshape(B, S, NUM_HEADS, HEAD_DIM).transpose(0, 2, 1, 3)
        kh = k.astype(jnp.bfloat16).reshape(B, S, NUM_HEADS, HEAD_DIM).transpose(0, 2, 1, 3)
        vh = v.astype(jnp.bfloat16).reshape(B, S, NUM_HEADS, HEAD_DIM).transpose(0, 2, 1, 3)
        s = jnp.einsum('bhqd,bhkd->bhqk', qh, kh, preferred_element_type=jnp.float32)
        s = s - jnp.max(s, axis=-1, keepdims=True)
        p = jnp.exp(s)
        p = p / jnp.sum(p, axis=-1, keepdims=True)
        c = jnp.einsum('bhqk,bhkd->bhqd', p.astype(jnp.bfloat16), vh,
                       preferred_element_type=jnp.float32)
        ctx = c.transpose(0, 2, 1, 3).reshape(B * S, D)
        h = h + jnp.dot(ctx.astype(jnp.bfloat16), ow[l],
                        preferred_element_type=jnp.float32) + ob
        y = _layer_norm(h, ln2w, ln2b, LAYER_NORM_EPS)
        m = jnp.dot(y.astype(jnp.bfloat16), fc1w[l],
                    preferred_element_type=jnp.float32) + fc1b[l]
        m = _gelu_tanh(m)
        m = jnp.dot(m.astype(jnp.bfloat16), fc2w[l],
                    preferred_element_type=jnp.float32) + fc2b
        h = h + m
    return h.reshape(B, S, D)


# ------------------------- deterministic params -------------------------------
def init_params(key):
    all_params = []
    for _ in range(NUM_LAYERS):
        keys = jax.random.split(key, 9)
        key = keys[0]
        ln1w = jnp.ones((HIDDEN,), jnp.float32)
        ln1b = jnp.zeros((HIDDEN,), jnp.float32)
        qw = jax.random.normal(keys[1], (HIDDEN, HIDDEN), jnp.float32) * 0.02
        kw = jax.random.normal(keys[2], (HIDDEN, HIDDEN), jnp.float32) * 0.02
        vw = jax.random.normal(keys[3], (HIDDEN, HIDDEN), jnp.float32) * 0.02
        ow = jax.random.normal(keys[4], (HIDDEN, HIDDEN), jnp.float32) * 0.02
        qb = jax.random.normal(keys[5], (HIDDEN,), jnp.float32) * 0.01
        kb = jax.random.normal(keys[6], (HIDDEN,), jnp.float32) * 0.01
        vb = jax.random.normal(keys[7], (HIDDEN,), jnp.float32) * 0.01
        ob = jnp.zeros((HIDDEN,), jnp.float32)
        ln2w = jnp.ones((HIDDEN,), jnp.float32)
        ln2b = jnp.zeros((HIDDEN,), jnp.float32)
        keys2 = jax.random.split(key, 3)
        key = keys2[0]
        fc1w = jax.random.normal(keys2[1], (HIDDEN, INTERMEDIATE), jnp.float32) * 0.02
        fc1b = jnp.zeros((INTERMEDIATE,), jnp.float32)
        fc2w = jax.random.normal(keys2[2], (INTERMEDIATE, HIDDEN), jnp.float32) * 0.02
        fc2b = jnp.zeros((HIDDEN,), jnp.float32)
        all_params.append((ln1w, ln1b, qw, qb, kw, kb, vw, vb, ow, ob,
                           ln2w, ln2b, fc1w, fc1b, fc2w, fc2b))
    return all_params


def pack_params(all_params):
    """Stack per-layer params for the fused kernel.

    Weights -> bf16 with ATTN_SCALE folded into the q slice; small vectors kept
    f32 and sublane-aligned (8 rows); QKV bias fused into one (1, 3D) row.
    """
    qkvw_l, ow_l, fc1w_l, fc2w_l, vec_l, qkvb_l, fc1b_l = [], [], [], [], [], [], []
    pad = jnp.zeros((HIDDEN,), jnp.float32)
    for (ln1w, ln1b, qw, qb, kw, kb, vw, vb, ow, ob,
         ln2w, ln2b, fc1w, fc1b, fc2w, fc2b) in all_params:
        qw_s = qw * ATTN_SCALE
        qb_s = qb * ATTN_SCALE
        qkvw_l.append(jnp.concatenate([qw_s, kw, vw], axis=1).astype(jnp.bfloat16))  # (D, 3D)
        ow_l.append(ow.astype(jnp.bfloat16))
        fc1w_l.append(fc1w.astype(jnp.bfloat16))
        fc2w_l.append(fc2w.astype(jnp.bfloat16))
        vec_l.append(jnp.stack([ln1w, ln1b, ln2w, ln2b, ob, fc2b, pad, pad], axis=0))  # (8, D)
        qkvb_l.append(jnp.concatenate([qb_s, kb, vb]).reshape(1, 3 * HIDDEN))          # (1, 3D)
        fc1b_l.append(fc1b.reshape(1, INTERMEDIATE))                                   # (1, I)
    return (jnp.stack(qkvw_l), jnp.stack(ow_l), jnp.stack(fc1w_l), jnp.stack(fc2w_l),
            jnp.stack(vec_l), jnp.stack(qkvb_l), jnp.stack(fc1b_l))


if __name__ == "__main__":
    root = jax.random.PRNGKey(0)
    k_x, k_p = jax.random.split(root)
    inputs_embeds = jax.random.normal(k_x, (BATCH, SEQ, HIDDEN), jnp.float32)
    params = init_params(k_p)
    qkvw, ow, fc1w, fc2w, vecs, qkvb, fc1b = pack_params(params)

    out = siglip_encoder(inputs_embeds, qkvw, ow, fc1w, fc2w, vecs, qkvb, fc1b)
    out = jax.block_until_ready(out)
    assert out.shape == (BATCH, SEQ, HIDDEN)

    # Tight check against a pure-JAX reference using the SAME packed bf16 weights
    # (remaining deltas: approx reciprocal in softmax, accumulation order).
    ref_bf16 = siglip_encoder_packed_ref(inputs_embeds, qkvw, ow, fc1w, fc2w,
                                         vecs, qkvb, fc1b)
    assert jnp.allclose(out, ref_bf16, atol=2e-3, rtol=2e-3), "mismatch vs bf16 reference"

    # Looser check against the full f32 reference (bf16 matmul operands introduce
    # ~0.2-0.4% relative error per projection).
    ref_f32 = siglip_encoder_ref(inputs_embeds, params)
    assert jnp.allclose(out, ref_f32, atol=1e-2, rtol=1e-2), "mismatch vs f32 reference"

    print("KERNEL_OK")
</pallas_src>

<mosaic_0001>
module attributes {stable_mosaic.version = 11 : i64} {
  func.func @encoder_stack_kernel(%arg0: i32, %arg1: memref<32x128xf32, #tpu.memory_space<any>>, %arg2: memref<1x8x128xf32, #tpu.memory_space<vmem>>, %arg3: memref<1x1x384xf32, #tpu.memory_space<vmem>>, %arg4: memref<1x1x256xf32, #tpu.memory_space<vmem>>, %arg5: memref<1x128x384xbf16, #tpu.memory_space<vmem>>, %arg6: memref<1x128x128xbf16, #tpu.memory_space<vmem>>, %arg7: memref<1x128x256xbf16, #tpu.memory_space<vmem>>, %arg8: memref<1x256x128xbf16, #tpu.memory_space<vmem>>, %arg9: memref<32x128xf32, #tpu.memory_space<vmem>>, %arg10: memref<!tpu.dma_semaphore, #tpu.memory_space<semaphore_mem>>) attributes {dimension_semantics = [#tpu.dimension_semantics<arbitrary>], iteration_bounds = array<i64: 2>, scalar_prefetch = 0 : i64, scratch_operands = 1 : i64, tpu.core_type = #tpu.core_type<tc>, window_params = [{}, {transform_indices = @transform_1, window_bounds = array<i64: 1, 8, 128>}, {transform_indices = @transform_2, window_bounds = array<i64: 1, 1, 384>}, {transform_indices = @transform_3, window_bounds = array<i64: 1, 1, 256>}, {transform_indices = @transform_4, window_bounds = array<i64: 1, 128, 384>}, {transform_indices = @transform_5, window_bounds = array<i64: 1, 128, 128>}, {transform_indices = @transform_6, window_bounds = array<i64: 1, 128, 256>}, {transform_indices = @transform_7, window_bounds = array<i64: 1, 256, 128>}, {pipeline_mode = #tpu.pipeline_mode<synchronous>, transform_indices = @transform_8, window_bounds = array<i64: 32, 128>}]} {
    %c0_i32 = arith.constant 0 : i32
    %0 = arith.cmpi eq, %arg0, %c0_i32 : i32
    %1 = arith.extui %0 : i1 to i32
    %c0_i32_0 = arith.constant 0 : i32
    %2 = arith.cmpi ne, %1, %c0_i32_0 : i32
    scf.if %2 {
      tpu.enqueue_dma source(%arg1 : memref<32x128xf32, #tpu.memory_space<any>>) target(%arg9 : memref<32x128xf32, #tpu.memory_space<vmem>>) target_semaphore(%arg10 : memref<!tpu.dma_semaphore, #tpu.memory_space<semaphore_mem>>)
      tpu.wait_dma2 semaphore(%arg10 : memref<!tpu.dma_semaphore, #tpu.memory_space<semaphore_mem>>) src(%arg1 : memref<32x128xf32, #tpu.memory_space<any>>) dst(%arg9 : memref<32x128xf32, #tpu.memory_space<vmem>>)
    } else {
    }
    %c0 = arith.constant 0 : index
    %c0_1 = arith.constant 0 : index
    %3 = vector.load %arg9[%c0, %c0_1] : memref<32x128xf32, #tpu.memory_space<vmem>>, vector<32x128xf32>
    %c0_2 = arith.constant 0 : index
    %c0_3 = arith.constant 0 : index
    %c0_4 = arith.constant 0 : index
    %4 = vector.load %arg2[%c0_2, %c0_3, %c0_4] : memref<1x8x128xf32, #tpu.memory_space<vmem>>, vector<1x8x128xf32>
    %5 = vector.shape_cast %4 : vector<1x8x128xf32> to vector<8x128xf32>
    %6 = vector.extract_strided_slice %5 {offsets = [0, 0], sizes = [1, 128], strides = [1, 1]} : vector<8x128xf32> to vector<1x128xf32>
    %7 = vector.extract_strided_slice %5 {offsets = [1, 0], sizes = [1, 128], strides = [1, 1]} : vector<8x128xf32> to vector<1x128xf32>
    %8 = vector.extract_strided_slice %5 {offsets = [2, 0], sizes = [1, 128], strides = [1, 1]} : vector<8x128xf32> to vector<1x128xf32>
    %9 = vector.extract_strided_slice %5 {offsets = [3, 0], sizes = [1, 128], strides = [1, 1]} : vector<8x128xf32> to vector<1x128xf32>
    %10 = vector.extract_strided_slice %5 {offsets = [4, 0], sizes = [1, 128], strides = [1, 1]} : vector<8x128xf32> to vector<1x128xf32>
    %11 = vector.extract_strided_slice %5 {offsets = [5, 0], sizes = [1, 128], strides = [1, 1]} : vector<8x128xf32> to vector<1x128xf32>
    %cst = arith.constant dense<0.000000e+00> : vector<32xf32>
    %12 = vector.multi_reduction <add>, %3, %cst [1] : vector<32x128xf32> to vector<32xf32>
    %13 = vector.shape_cast %12 : vector<32xf32> to vector<32x1xf32>
    %cst_5 = arith.constant 1.280000e+02 : f32
    %14 = vector.broadcast %cst_5 : f32 to vector<32x1xf32>
    %15 = arith.divf %13, %14 : vector<32x1xf32>
    %16 = vector.broadcast %15 : vector<32x1xf32> to vector<32x128xf32>
    %17 = arith.subf %3, %16 : vector<32x128xf32>
    %18 = vector.broadcast %15 : vector<32x1xf32> to vector<32x128xf32>
    %19 = arith.subf %3, %18 : vector<32x128xf32>
    %20 = arith.mulf %17, %19 : vector<32x128xf32>
    %cst_6 = arith.constant dense<0.000000e+00> : vector<32xf32>
    %21 = vector.multi_reduction <add>, %20, %cst_6 [1] : vector<32x128xf32> to vector<32xf32>
    %22 = vector.shape_cast %21 : vector<32xf32> to vector<32x1xf32>
    %cst_7 = arith.constant 1.280000e+02 : f32
    %23 = vector.broadcast %cst_7 : f32 to vector<32x1xf32>
    %24 = arith.divf %22, %23 : vector<32x1xf32>
    %25 = vector.broadcast %15 : vector<32x1xf32> to vector<32x128xf32>
    %26 = arith.subf %3, %25 : vector<32x128xf32>
    %cst_8 = arith.constant 9.99999997E-7 : f32
    %27 = vector.broadcast %cst_8 : f32 to vector<32x1xf32>
    %28 = arith.addf %24, %27 : vector<32x1xf32>
    %29 = math.rsqrt %28 : vector<32x1xf32>
    %30 = vector.broadcast %29 : vector<32x1xf32> to vector<32x128xf32>
    %31 = arith.mulf %26, %30 : vector<32x128xf32>
    %32 = vector.broadcast %6 : vector<1x128xf32> to vector<32x128xf32>
    %33 = arith.mulf %31, %32 : vector<32x128xf32>
    %34 = vector.broadcast %7 : vector<1x128xf32> to vector<32x128xf32>
    %35 = arith.addf %33, %34 : vector<32x128xf32>
    %36 = arith.truncf %35 : vector<32x128xf32> to vector<32x128xbf16>
    %c0_9 = arith.constant 0 : index
    %c0_10 = arith.constant 0 : index
    %c0_11 = arith.constant 0 : index
    %37 = vector.load %arg5[%c0_9, %c0_10, %c0_11] : memref<1x128x384xbf16, #tpu.memory_space<vmem>>, vector<1x128x384xbf16>
    %38 = vector.shape_cast %37 : vector<1x128x384xbf16> to vector<128x384xbf16>
    %cst_12 = arith.constant dense<0.000000e+00> : vector<32x384xf32>
    %39 = tpu.matmul %36, %38, %cst_12 {dimension_numbers = #tpu.dot_dimension_numbers<[1], [0], [0], [1], [0, 0, 1, 1], [], []>} : vector<32x128xbf16>, vector<128x384xbf16>, vector<32x384xf32> -> vector<32x384xf32>
    %c0_13 = arith.constant 0 : index
    %c0_14 = arith.constant 0 : index
    %c0_15 = arith.constant 0 : index
    %40 = vector.load %arg3[%c0_13, %c0_14, %c0_15] : memref<1x1x384xf32, #tpu.memory_space<vmem>>, vector<1x1x384xf32>
    %41 = vector.shape_cast %40 : vector<1x1x384xf32> to vector<1x384xf32>
    %42 = vector.broadcast %41 : vector<1x384xf32> to vector<32x384xf32>
    %43 = arith.addf %39, %42 : vector<32x384xf32>
    %44 = vector.extract_strided_slice %43 {offsets = [0, 0], sizes = [32, 128], strides = [1, 1]} : vector<32x384xf32> to vector<32x128xf32>
    %45 = vector.shape_cast %44 : vector<32x128xf32> to vector<32x4x32xf32>
    %46 = vector.shape_cast %45 : vector<32x4x32xf32> to vector<2x16x4x32xf32>
    %47 = tpu.transpose %46, [0, 2, 1, 3] : vector<2x16x4x32xf32> -> vector<2x4x16x32xf32>
    %48 = vector.shape_cast %47 : vector<2x4x16x32xf32> to vector<8x16x32xf32>
    %49 = arith.truncf %48 : vector<8x16x32xf32> to vector<8x16x32xbf16>
    %50 = vector.extract_strided_slice %43 {offsets = [0, 128], sizes = [32, 128], strides = [1, 1]} : vector<32x384xf32> to vector<32x128xf32>
    %51 = vector.shape_cast %50 : vector<32x128xf32> to vector<32x4x32xf32>
    %52 = vector.shape_cast %51 : vector<32x4x32xf32> to vector<2x16x4x32xf32>
    %53 = tpu.transpose %52, [0, 2, 1, 3] : vector<2x16x4x32xf32> -> vector<2x4x16x32xf32>
    %54 = vector.shape_cast %53 : vector<2x4x16x32xf32> to vector<8x16x32xf32>
    %55 = arith.truncf %54 : vector<8x16x32xf32> to vector<8x16x32xbf16>
    %56 = vector.extract_strided_slice %43 {offsets = [0, 256], sizes = [32, 128], strides = [1, 1]} : vector<32x384xf32> to vector<32x128xf32>
    %57 = vector.shape_cast %56 : vector<32x128xf32> to vector<32x4x32xf32>
    %58 = vector.shape_cast %57 : vector<32x4x32xf32> to vector<2x16x4x32xf32>
    %59 = tpu.transpose %58, [0, 2, 1, 3] : vector<2x16x4x32xf32> -> vector<2x4x16x32xf32>
    %60 = vector.shape_cast %59 : vector<2x4x16x32xf32> to vector<8x16x32xf32>
    %61 = arith.truncf %60 : vector<8x16x32xf32> to vector<8x16x32xbf16>
    "tpu.trace_start"() <{level = 10 : i32, message = "nqd,nkd->nqk"}> : () -> ()
    %cst_16 = arith.constant dense<0.000000e+00> : vector<8x16x16xf32>
    %62 = tpu.matmul %49, %55, %cst_16 {dimension_numbers = #tpu.dot_dimension_numbers<[2], [2], [1], [1], [0, 0, 0, 1, 1, 1], [0], [0]>} : vector<8x16x32xbf16>, vector<8x16x32xbf16>, vector<8x16x16xf32> -> vector<8x16x16xf32>
    "tpu.trace_stop"() : () -> ()
    %cst_17 = arith.constant dense<0xFF800000> : vector<8x16xf32>
    %63 = vector.multi_reduction <maximumf>, %62, %cst_17 [2] : vector<8x16x16xf32> to vector<8x16xf32>
    %64 = vector.shape_cast %63 : vector<8x16xf32> to vector<8x16x1xf32>
    %65 = vector.broadcast %64 : vector<8x16x1xf32> to vector<8x16x16xf32>
    %66 = arith.subf %62, %65 : vector<8x16x16xf32>
    %67 = math.exp %66 : vector<8x16x16xf32>
    %cst_18 = arith.constant dense<0.000000e+00> : vector<8x16xf32>
    %68 = vector.multi_reduction <add>, %67, %cst_18 [2] : vector<8x16x16xf32> to vector<8x16xf32>
    %69 = vector.shape_cast %68 : vector<8x16xf32> to vector<8x16x1xf32>
    %70 = tpu.reciprocal %69 {approx = true} : vector<8x16x1xf32> -> vector<8x16x1xf32>
    %71 = vector.broadcast %70 : vector<8x16x1xf32> to vector<8x16x16xf32>
    %72 = arith.mulf %67, %71 : vector<8x16x16xf32>
    %73 = arith.truncf %72 : vector<8x16x16xf32> to vector<8x16x16xbf16>
    "tpu.trace_start"() <{level = 10 : i32, message = "nqk,nkd->nqd"}> : () -> ()
    %cst_19 = arith.constant dense<0.000000e+00> : vector<8x16x32xf32>
    %74 = tpu.matmul %73, %61, %cst_19 {dimension_numbers = #tpu.dot_dimension_numbers<[2], [1], [1], [2], [0, 0, 0, 1, 1, 2], [0], [0]>} : vector<8x16x16xbf16>, vector<8x16x32xbf16>, vector<8x16x32xf32> -> vector<8x16x32xf32>
    "tpu.trace_stop"() : () -> ()
    %75 = vector.shape_cast %74 : vector<8x16x32xf32> to vector<2x4x16x32xf32>
    %76 = tpu.transpose %75, [0, 2, 1, 3] : vector<2x4x16x32xf32> -> vector<2x16x4x32xf32>
    %77 = vector.shape_cast %76 : vector<2x16x4x32xf32> to vector<32x4x32xf32>
    %78 = vector.shape_cast %77 : vector<32x4x32xf32> to vector<32x128xf32>
    %79 = arith.truncf %78 : vector<32x128xf32> to vector<32x128xbf16>
    %c0_20 = arith.constant 0 : index
    %c0_21 = arith.constant 0 : index
    %c0_22 = arith.constant 0 : index
    %80 = vector.load %arg6[%c0_20, %c0_21, %c0_22] : memref<1x128x128xbf16, #tpu.memory_space<vmem>>, vector<1x128x128xbf16>
    %81 = vector.shape_cast %80 : vector<1x128x128xbf16> to vector<128x128xbf16>
    %cst_23 = arith.constant dense<0.000000e+00> : vector<32x128xf32>
    %82 = tpu.matmul %79, %81, %cst_23 {dimension_numbers = #tpu.dot_dimension_numbers<[1], [0], [0], [1], [0, 0, 1, 1], [], []>} : vector<32x128xbf16>, vector<128x128xbf16>, vector<32x128xf32> -> vector<32x128xf32>
    %83 = arith.addf %3, %82 : vector<32x128xf32>
    %84 = vector.broadcast %10 : vector<1x128xf32> to vector<32x128xf32>
    %85 = arith.addf %83, %84 : vector<32x128xf32>
    %cst_24 = arith.constant dense<0.000000e+00> : vector<32xf32>
    %86 = vector.multi_reduction <add>, %85, %cst_24 [1] : vector<32x128xf32> to vector<32xf32>
    %87 = vector.shape_cast %86 : vector<32xf32> to vector<32x1xf32>
    %cst_25 = arith.constant 1.280000e+02 : f32
    %88 = vector.broadcast %cst_25 : f32 to vector<32x1xf32>
    %89 = arith.divf %87, %88 : vector<32x1xf32>
    %90 = vector.broadcast %89 : vector<32x1xf32> to vector<32x128xf32>
    %91 = arith.subf %85, %90 : vector<32x128xf32>
    %92 = vector.broadcast %89 : vector<32x1xf32> to vector<32x128xf32>
    %93 = arith.subf %85, %92 : vector<32x128xf32>
    %94 = arith.mulf %91, %93 : vector<32x128xf32>
    %cst_26 = arith.constant dense<0.000000e+00> : vector<32xf32>
    %95 = vector.multi_reduction <add>, %94, %cst_26 [1] : vector<32x128xf32> to vector<32xf32>
    %96 = vector.shape_cast %95 : vector<32xf32> to vector<32x1xf32>
    %cst_27 = arith.constant 1.280000e+02 : f32
    %97 = vector.broadcast %cst_27 : f32 to vector<32x1xf32>
    %98 = arith.divf %96, %97 : vector<32x1xf32>
    %99 = vector.broadcast %89 : vector<32x1xf32> to vector<32x128xf32>
    %100 = arith.subf %85, %99 : vector<32x128xf32>
    %cst_28 = arith.constant 9.99999997E-7 : f32
    %101 = vector.broadcast %cst_28 : f32 to vector<32x1xf32>
    %102 = arith.addf %98, %101 : vector<32x1xf32>
    %103 = math.rsqrt %102 : vector<32x1xf32>
    %104 = vector.broadcast %103 : vector<32x1xf32> to vector<32x128xf32>
    %105 = arith.mulf %100, %104 : vector<32x128xf32>
    %106 = vector.broadcast %8 : vector<1x128xf32> to vector<32x128xf32>
    %107 = arith.mulf %105, %106 : vector<32x128xf32>
    %108 = vector.broadcast %9 : vector<1x128xf32> to vector<32x128xf32>
    %109 = arith.addf %107, %108 : vector<32x128xf32>
    %110 = arith.truncf %109 : vector<32x128xf32> to vector<32x128xbf16>
    %c0_29 = arith.constant 0 : index
    %c0_30 = arith.constant 0 : index
    %c0_31 = arith.constant 0 : index
    %111 = vector.load %arg7[%c0_29, %c0_30, %c0_31] : memref<1x128x256xbf16, #tpu.memory_space<vmem>>, vector<1x128x256xbf16>
    %112 = vector.shape_cast %111 : vector<1x128x256xbf16> to vector<128x256xbf16>
    %cst_32 = arith.constant dense<0.000000e+00> : vector<32x256xf32>
    %113 = tpu.matmul %110, %112, %cst_32 {dimension_numbers = #tpu.dot_dimension_numbers<[1], [0], [0], [1], [0, 0, 1, 1], [], []>} : vector<32x128xbf16>, vector<128x256xbf16>, vector<32x256xf32> -> vector<32x256xf32>
    %c0_33 = arith.constant 0 : index
    %c0_34 = arith.constant 0 : index
    %c0_35 = arith.constant 0 : index
    %114 = vector.load %arg4[%c0_33, %c0_34, %c0_35] : memref<1x1x256xf32, #tpu.memory_space<vmem>>, vector<1x1x256xf32>
    %115 = vector.shape_cast %114 : vector<1x1x256xf32> to vector<1x256xf32>
    %116 = vector.broadcast %115 : vector<1x256xf32> to vector<32x256xf32>
    %117 = arith.addf %113, %116 : vector<32x256xf32>
    %cst_36 = arith.constant 5.000000e-01 : f32
    %118 = vector.broadcast %cst_36 : f32 to vector<32x256xf32>
    %119 = arith.mulf %118, %117 : vector<32x256xf32>
    %cst_37 = arith.constant 4.471500e-02 : f32
    %120 = vector.broadcast %cst_37 : f32 to vector<32x256xf32>
    %121 = arith.mulf %120, %117 : vector<32x256xf32>
    %122 = arith.mulf %121, %117 : vector<32x256xf32>
    %123 = arith.mulf %122, %117 : vector<32x256xf32>
    %124 = arith.addf %117, %123 : vector<32x256xf32>
    %cst_38 = arith.constant 0.797884583 : f32
    %125 = vector.broadcast %cst_38 : f32 to vector<32x256xf32>
    %126 = arith.mulf %125, %124 : vector<32x256xf32>
    %127 = math.tanh %126 : vector<32x256xf32>
    %cst_39 = arith.constant 1.000000e+00 : f32
    %128 = vector.broadcast %cst_39 : f32 to vector<32x256xf32>
    %129 = arith.addf %128, %127 : vector<32x256xf32>
    %130 = arith.mulf %119, %129 : vector<32x256xf32>
    %131 = arith.truncf %130 : vector<32x256xf32> to vector<32x256xbf16>
    %c0_40 = arith.constant 0 : index
    %c0_41 = arith.constant 0 : index
    %c0_42 = arith.constant 0 : index
    %132 = vector.load %arg8[%c0_40, %c0_41, %c0_42] : memref<1x256x128xbf16, #tpu.memory_space<vmem>>, vector<1x256x128xbf16>
    %133 = vector.shape_cast %132 : vector<1x256x128xbf16> to vector<256x128xbf16>
    %cst_43 = arith.constant dense<0.000000e+00> : vector<32x128xf32>
    %134 = tpu.matmul %131, %133, %cst_43 {dimension_numbers = #tpu.dot_dimension_numbers<[1], [0], [0], [1], [0, 0, 1, 1], [], []>} : vector<32x256xbf16>, vector<256x128xbf16>, vector<32x128xf32> -> vector<32x128xf32>
    %135 = vector.broadcast %11 : vector<1x128xf32> to vector<32x128xf32>
    %136 = arith.addf %134, %135 : vector<32x128xf32>
    %137 = arith.addf %85, %136 : vector<32x128xf32>
    %c0_44 = arith.constant 0 : index
    %c0_45 = arith.constant 0 : index
    %138 = vector.load %arg9[%c0_44, %c0_45] : memref<32x128xf32, #tpu.memory_space<vmem>>, vector<32x128xf32>
    tpu.vector_store %arg9[%c0_44, %c0_45], %137 {strides = array<i32>} : memref<32x128xf32, #tpu.memory_space<vmem>>, vector<32x128xf32>,
    return
  }
  func.func @transform_1(%arg0: i32) -> (i32, i32, i32) {
    %c0_i32 = arith.constant 0 : i32
    %c0_i32_0 = arith.constant 0 : i32
    %c0_i32_1 = arith.constant 0 : i32
    return %arg0, %c0_i32, %c0_i32_0 : i32, i32, i32
  }
  func.func @transform_2(%arg0: i32) -> (i32, i32, i32) {
    %c0_i32 = arith.constant 0 : i32
    %c0_i32_0 = arith.constant 0 : i32
    %c0_i32_1 = arith.constant 0 : i32
    return %arg0, %c0_i32, %c0_i32_0 : i32, i32, i32
  }
  func.func @transform_3(%arg0: i32) -> (i32, i32, i32) {
    %c0_i32 = arith.constant 0 : i32
    %c0_i32_0 = arith.constant 0 : i32
    %c0_i32_1 = arith.constant 0 : i32
    return %arg0, %c0_i32, %c0_i32_0 : i32, i32, i32
  }
  func.func @transform_4(%arg0: i32) -> (i32, i32, i32) {
    %c0_i32 = arith.constant 0 : i32
    %c0_i32_0 = arith.constant 0 : i32
    %c0_i32_1 = arith.constant 0 : i32
    return %arg0, %c0_i32, %c0_i32_0 : i32, i32, i32
  }
  func.func @transform_5(%arg0: i32) -> (i32, i32, i32) {
    %c0_i32 = arith.constant 0 : i32
    %c0_i32_0 = arith.constant 0 : i32
    %c0_i32_1 = arith.constant 0 : i32
    return %arg0, %c0_i32, %c0_i32_0 : i32, i32, i32
  }
  func.func @transform_6(%arg0: i32) -> (i32, i32, i32) {
    %c0_i32 = arith.constant 0 : i32
    %c0_i32_0 = arith.constant 0 : i32
    %c0_i32_1 = arith.constant 0 : i32
    return %arg0, %c0_i32, %c0_i32_0 : i32, i32, i32
  }
  func.func @transform_7(%arg0: i32) -> (i32, i32, i32) {
    %c0_i32 = arith.constant 0 : i32
    %c0_i32_0 = arith.constant 0 : i32
    %c0_i32_1 = arith.constant 0 : i32
    return %arg0, %c0_i32, %c0_i32_0 : i32, i32, i32
  }
  func.func @transform_8(%arg0: i32) -> (i32, i32) {
    %c0_i32 = arith.constant 0 : i32
    %c0_i32_0 = arith.constant 0 : i32
    %c0_i32_1 = arith.constant 0 : i32
    return %c0_i32, %c0_i32_0 : i32, i32
  }
}

</mosaic_0001>

<bundles_post_ra>
// kernel: siglip_encoder.1
= control target key start
LH: loop header
LB: loop body
LE: loop exit
PB: predicated region body
PF: predicated region fallthrough
CT: control target
= control target key end

     0   :  { %s7224_s0 = inlined_call_operand.hbm [shape: f32[32,128], index: 0, kind: input, shape index: {}]   ;;  %s7225_s1 = inlined_call_operand.hbm [shape: f32[2,8,128], index: 1, kind: input, shape index: {}]   ;;  %s7226_s2 = inlined_call_operand.vmem [shape: f32[2,1,384], index: 2, kind: input, shape index: {}]   ;;  %s7227_s3 = inlined_call_operand.hbm [shape: f32[2,1,256], index: 3, kind: input, shape index: {}]   ;;  %s7228_s4 = inlined_call_operand.hbm [shape: bf16[2,128,384], index: 4, kind: input, shape index: {}]   ;;  %s7229_s5 = inlined_call_operand.hbm [shape: bf16[2,128,128], index: 5, kind: input, shape index: {}]   ;;  %s7230_s6 = inlined_call_operand.hbm [shape: bf16[2,128,256], index: 6, kind: input, shape index: {}]   ;;  %s7231_s7 = inlined_call_operand.hbm [shape: bf16[2,256,128], index: 7, kind: input, shape index: {}]   ;;  %s7232_s8 = inlined_call_operand.hbm [shape: f32[32,128], index: 8, kind: output, shape index: {}]  }
   0x1   :  { %7256 = sst [smem:[#allocation40_spill]] %s7226_s2 }
   0x2   :  { %7257 = sst [smem:[#allocation41_spill]] %s7227_s3 }
   0x3   :  { %7258 = sst [smem:[#allocation42_spill]] %s7229_s5 }
   0x4   :  { %7259 = sst [smem:[#allocation43_spill]] %s7232_s8 }
   0x5   :  { %13 = vsyncpa [#allocation4], 0 }
   0x6   :  { %15 = vsyncpa [#allocation4 + $0x1], 0 }
   0x7   :  { %16 = vsyncpa [#allocation7], 0 }
   0x8   :  { %18 = vsyncpa [#allocation7 + $0x1], 0 }
   0x9   :  { %19 = vsyncpa [#allocation10], 0 }
   0xa   :  { %21 = vsyncpa [#allocation10 + $0x1], 0 }
   0xb   :  { %22 = vsyncpa [#allocation13], 0 }
   0xc   :  { %24 = vsyncpa [#allocation13 + $0x1], 0 }
   0xd   :  { %25 = vsyncpa [#allocation5], 0  ;;  %s5303_s27 = smov 0   ;;  %s5305_s28 = smov 0  }
   0xe   :  { %s5307_s29 = smov 0   ;;  %s5309_s30 = smov 0  }
   0xf LB: > { %7260 = sst [smem:[#allocation25_spill]] %s5237_s29  ;;  %s5322_s9 = sadd.s32 4294967295, %s5241_s30   ;;  %s5241_s30 = sphi %s5309_s30, %s7319_s30   ;;  %s5237_s29 = sphi %s5307_s29, %s7321_s29   ;;  %s5233_s28 = sphi %s5305_s28, %s7323_s28   ;;  %s5229_s27 = sphi %s5303_s27, %s7322_s27  }
  0x10   : > { %s5325_s10 = sadd.s32 1, %s5241_s30   ;;  %s38_s12 = sadd.s32 1, %s5237_s29 }
  0x11   : > { %7261 = sst [smem:[#allocation26_spill]] %s5325_s10  ;;  %s35_s11 = ssub.s32 %s5241_s30, %s5325_s10 }
  0x12   : > { %p36_p0 = scmp.eq.s32.totalorder %s35_s11, 0  ;;  %p45_p1 = scmp.ne.s32.totalorder %s5237_s29, %s5233_s28 }
  0x13   : > { %p46_p2 = scmp.eq.s32.totalorder %s5241_s30, 0  ;;  %p51_p3 = scmp.ne.s32.totalorder %s5233_s28, %s5229_s27 }
  0x14   : > { %s5335_s13 = scalar_select %p36_p0, %s5237_s29, %s38_s12  }
  0x15   : > { %p47_p4 = por %p46_p2, %p45_p1  ;;  %p52_p5 = scmp.eq.s32.totalorder %s5322_s9, 0 }
  0x16   : > { %7262 = sst [smem:[#allocation27_spill]] %s5335_s13  ;;  %p4677_p6 = scmp.lt.s32.totalorder %s5241_s30, 2 }
  0x17   : > { %p5341_p7 = por %p52_p5, %p51_p3  ;;  %s5346_s15 = sand.u32 1, %s5237_s29  }
  0x18   : > { %p5348_p8 = pnand %p4677_p6, %p47_p4  ;;  %s7233_s17 = sand.u32 1, %s5241_s30  }
  0x19   : > { %s4272_s18 = sshll.u32 %s5346_s15, 1  ;;  %s4273_s19 = sshll.u32 %s5241_s30, 1 }
  0x1a   : > { %s282_s20 = scalar_lea.vmem [#allocation6], %s4272_s18  ;;  %s7265_s3 = sld [smem:[#allocation41_spill]] }
  0x1b   : > { %s290_s21 = sshll.u32 %s282_s20, 4  ;;  %p4284_p9 = scmp.ge.s32.totalorder %s5241_s30, 1  ;;  %s291_s21 = int_to_ptr.vmem [resolvable:$true] %s290_s21 }
  0x1c   : > { %s5361_s26 = scalar_lea.sflag [#allocation7], %s7233_s17  ;;  %p5365_p11 = pneg %p5348_p8 }
  0x20   : > { %s286_s24 = scalar_lea.hbm %s7265_s3, %s4273_s19  ;;  %s4958_s20 = scalar_lea.hbm %s7265_s3, 4 }
  0x21   : > { %s288_s25 = sshll.u32 %s286_s24, 4  ;;  %s289_s25 = int_to_ptr.hbm [resolvable:$true] %s288_s25 }
  0x22   : > { %s4951_s27 = sshra.s32 %s289_s25, 4  ;;  %s4952_s27 = int_to_ptr.hbm [resolvable:$true] %s4951_s27 }
  0x23   : > { %s4953_s11 = scalar_lea.hbm %s4952_s27, 2  ;;  %p4959_p0 = scmp.lt.s32.totalorder %s4952_s27, %s7265_s3 }
  0x24   : > { %p4954_p10 = scmp.ne.s32.totalorder %s4952_s27, %s4953_s11  ;;  %p4960_p1 = scmp.lt.s32.totalorder %s4958_s20, %s4953_s11 }
  0x26   : > { %p4956_p12 = pnand %p5365_p11, %p4954_p10  ;;  %p4961_p2 = por %p4960_p1, %p4959_p0 }
  0x28   : > { %p4957_p13 = pneg %p4956_p12 }
  0x2a   : > { %p4962_p3 = pnand %p4961_p2, %p4957_p13 }
  0x2c   : > { %4965 = shalt.err (!%p4962_p3)
}
  0x2d   : > { %4664 = dma.hbm_to_vmem [thread:$0]  (!%p5348_p8), %s289_s25, 32, %s291_s21, %s5361_s26  }
  0x2e   : > { %p383_p4 = scmp.lt.s32.totalorder %s5241_s30, 3  ;;  %s4275_s24 = sshll.u32 %s5346_s15, 6 }
  0x2f   : > { %s4568_s18 = sshll.u32 %s5241_s30, 6  ;;  %s7268_s5 = sld [smem:[#allocation42_spill]] }
  0x30   : > { %p5385_p6 = pnand %p4284_p9, %p383_p4  ;;  %s323_s23 = scalar_lea.vmem [#allocation9], %s4275_s24 }
  0x31   : > { %s331_s17 = sshll.u32 %s323_s23, 4  ;;  %s7269_s3 = sand.u32 1, %s5241_s30   ;;  %s332_s17 = int_to_ptr.vmem [resolvable:$true] %s331_s17 }
  0x32   : > { %s5394_s21 = scalar_lea.sflag [#allocation10], %s7269_s3 }
  0x35   : > { %s328_s20 = scalar_lea.hbm %s7268_s5, %s4568_s18  ;;  %s4988_s11 = scalar_lea.hbm %s7268_s5, 128 }
  0x36   : > { %s329_s22 = sshll.u32 %s328_s20, 4  ;;  %s330_s22 = int_to_ptr.hbm [resolvable:$true] %s329_s22 }
  0x37   : > { %s4981_s25 = sshra.s32 %s330_s22, 4  ;;  %s4982_s25 = int_to_ptr.hbm [resolvable:$true] %s4981_s25 }
  0x38   : > { %s4983_s13 = scalar_lea.hbm %s4982_s25, 64  ;;  %p4989_p13 = scmp.lt.s32.totalorder %s4982_s25, %s7268_s5 }
  0x39   : > { %p4984_p10 = scmp.ne.s32.totalorder %s4982_s25, %s4983_s13  ;;  %p4990_p0 = scmp.lt.s32.totalorder %s4988_s11, %s4983_s13 }
  0x3b   : > { %p4986_p9 = pnand %p4984_p10, %p5365_p11  ;;  %p4991_p1 = por %p4990_p0, %p4989_p13 }
  0x3d   : > { %p4987_p12 = pneg %p4986_p9 }
  0x3f   : > { %p4992_p2 = pnand %p4991_p1, %p4987_p12 }
  0x41   : > { %4995 = shalt.err (!%p4992_p2)
}
  0x42   : > { %s7237_s3 = smov 64   ;;  %s5244_s24 = smov 4  }
  0x43   : > { %4670 = dma.hbm_to_vmem [thread:$0]  (!%p5348_p8), %s330_s22, 1024, %s332_s17, %s5394_s21, %s7237_s3, %s7237_s3, %s5244_s24  }
  0x44   : > { %s4270_s29 = sshll.u32 %s5346_s15, 3  ;;  %s4271_s10 = sshll.u32 %s5241_s30, 3 }
  0x45   : > { %s260_s23 = scalar_lea.hbm %s7225_s1, %s4271_s10  ;;  %s256_s25 = scalar_lea.vmem [#allocation3], %s4270_s29 }
  0x46   : > { %s264_s11 = sshll.u32 %s256_s25, 4  ;;  %s262_s18 = sshll.u32 %s260_s23, 4  ;;  %s265_s11 = int_to_ptr.vmem [resolvable:$true] %s264_s11  ;;  %s263_s18 = int_to_ptr.hbm [resolvable:$true] %s262_s18 }
  0x47   : > { %s4635_s19 = smul.u32 192, %s5346_s15  ;;  %s253_s5 = scalar_lea.sflag [#allocation4], %s5346_s15 }
  0x48   : > { %s5011_s8 = sshra.s32 %s263_s18, 4  ;;  %s5018_s3 = scalar_lea.hbm %s7225_s1, 16  ;;  %s5012_s8 = int_to_ptr.hbm [resolvable:$true] %s5011_s8 }
  0x49   : > { %s5013_s2 = scalar_lea.hbm %s5012_s8, 8  ;;  %p5019_p9 = scmp.lt.s32.totalorder %s5012_s8, %s7225_s1 }
  0x4a   : > { %p5014_p3 = scmp.ne.s32.totalorder %s5012_s8, %s5013_s2  ;;  %p5020_p12 = scmp.lt.s32.totalorder %s5018_s3, %s5013_s2 }
  0x4c   : > { %p5016_p4 = pnand %p5014_p3, %p5365_p11  ;;  %p5021_p13 = por %p5020_p12, %p5019_p9 }
  0x4e   : > { %p5017_p10 = pneg %p5016_p4 }
  0x50   : > { %p5022_p0 = pnand %p5021_p13, %p5017_p10 }
  0x52   : > { %5025 = shalt.err (!%p5022_p0)
}
  0x53   : > { %4661 = dma.hbm_to_vmem [thread:$0]  (!%p5348_p8), %s263_s18, 128, %s265_s11, %s253_s5  }
  0x54   : > { %s4636_s29 = smul.u32 192, %s5241_s30  ;;  %s301_s20 = scalar_lea.vmem [#allocation8], %s4635_s19 }
  0x55   : > { %s309_s23 = sshll.u32 %s301_s20, 4  ;;  %s4278_s2 = sshll.u32 %s5346_s15, 7  ;;  %s310_s23 = int_to_ptr.vmem [resolvable:$true] %s309_s23 }
  0x56   : > { %s306_s22 = scalar_lea.hbm %s7228_s4, %s4636_s29  ;;  %s5048_s11 = scalar_lea.hbm %s7228_s4, 384 }
  0x57   : > { %s307_s13 = sshll.u32 %s306_s22, 4  ;;  %s308_s13 = int_to_ptr.hbm [resolvable:$true] %s307_s13 }
  0x58   : > { %s5041_s8 = sshra.s32 %s308_s13, 4  ;;  %s5042_s8 = int_to_ptr.hbm [resolvable:$true] %s5041_s8 }
  0x59   : > { %s5043_s3 = scalar_lea.hbm %s5042_s8, 192  ;;  %p5049_p4 = scmp.lt.s32.totalorder %s5042_s8, %s7228_s4 }
  0x5a   : > { %p5044_p1 = scmp.ne.s32.totalorder %s5042_s8, %s5043_s3  ;;  %p5050_p10 = scmp.lt.s32.totalorder %s5048_s11, %s5043_s3 }
  0x5c   : > { %p5046_p2 = pnand %p5044_p1, %p5365_p11  ;;  %p5051_p9 = por %p5050_p10, %p5049_p4 }
  0x5e   : > { %p5047_p3 = pneg %p5046_p2 }
  0x60   : > { %p5052_p12 = pnand %p5051_p9, %p5047_p3 }
  0x62   : > { %5055 = shalt.err (!%p5052_p12)
}
  0x63   : > { %s5245_s29 = smov 192   ;;  %s5246_s20 = smov 12  }
  0x64   : > { %4667 = dma.hbm_to_vmem [thread:$0]  (!%p5348_p8), %s308_s13, 3072, %s310_s23, %s5361_s26, %s5245_s29, %s5245_s29, %s5246_s20  }
  0x65   : > { %s4569_s25 = sshll.u32 %s5241_s30, 7  ;;  %s345_s8 = scalar_lea.vmem [#allocation11], %s4278_s2 }
  0x66   : > { %s350_s10 = scalar_lea.hbm %s7230_s6, %s4569_s25  ;;  %s353_s3 = sshll.u32 %s345_s8, 4  ;;  %s354_s3 = int_to_ptr.vmem [resolvable:$true] %s353_s3 }
  0x67   : > { %s351_s5 = sshll.u32 %s350_s10, 4  ;;  %s5078_s30 = scalar_lea.hbm %s7230_s6, 256  ;;  %s352_s5 = int_to_ptr.hbm [resolvable:$true] %s351_s5 }
  0x68   : > { %s5071_s11 = sshra.s32 %s352_s5, 4  ;;  %s5072_s11 = int_to_ptr.hbm [resolvable:$true] %s5071_s11 }
  0x69   : > { %s5073_s18 = scalar_lea.hbm %s5072_s11, 128  ;;  %p5079_p2 = scmp.lt.s32.totalorder %s5072_s11, %s7230_s6 }
  0x6a   : > { %p5074_p13 = scmp.ne.s32.totalorder %s5072_s11, %s5073_s18  ;;  %p5080_p3 = scmp.lt.s32.totalorder %s5078_s30, %s5073_s18 }
  0x6c   : > { %p5076_p0 = pnand %p5074_p13, %p5365_p11  ;;  %p5081_p4 = por %p5080_p3, %p5079_p2 }
  0x6e   : > { %p5077_p1 = pneg %p5076_p0 }
  0x70   : > { %p5082_p10 = pnand %p5081_p4, %p5077_p1 }
  0x72   : > { %5085 = shalt.err (!%p5082_p10)
}
  0x73   : > { %s5247_s29 = smov 128   ;;  %s5248_s20 = smov 8  }
  0x74   : > { %4673 = dma.hbm_to_vmem [thread:$0]  (!%p5348_p8), %s352_s5, 2048, %s354_s3, %s5394_s21, %s5247_s29, %s5247_s29, %s5248_s20  }
  0x75   : > { %s372_s10 = scalar_lea.hbm %s7231_s7, %s4569_s25  ;;  %s367_s11 = scalar_lea.vmem [#allocation12], %s4278_s2 }
  0x76   : > { %s373_s8 = sshll.u32 %s372_s10, 4  ;;  %s375_s18 = sshll.u32 %s367_s11, 4  ;;  %s374_s8 = int_to_ptr.hbm [resolvable:$true] %s373_s8  ;;  %s376_s18 = int_to_ptr.vmem [resolvable:$true] %s375_s18 }
  0x77   : > { %s364_s19 = scalar_lea.sflag [#allocation13], %s5346_s15  ;;  %s5101_s26 = sshra.s32 %s374_s8, 4  ;;  %s5102_s26 = int_to_ptr.hbm [resolvable:$true] %s5101_s26 }
  0x78   : > { %s5103_s30 = scalar_lea.hbm %s5102_s26, 128  ;;  %s5108_s3 = scalar_lea.hbm %s7231_s7, 256 }
  0x79   : > { %p5104_p9 = scmp.ne.s32.totalorder %s5102_s26, %s5103_s30  ;;  %p5109_p0 = scmp.lt.s32.totalorder %s5102_s26, %s7231_s7 }
  0x7a   : > { %p5110_p1 = scmp.lt.s32.totalorder %s5108_s3, %s5103_s30 }
  0x7b   : > { %p5106_p12 = pnand %p5104_p9, %p5365_p11 }
  0x7c   : > { %p5111_p2 = por %p5110_p1, %p5109_p0 }
  0x7d   : > { %p5107_p13 = pneg %p5106_p12 }
  0x7f   : > { %p5112_p3 = pnand %p5111_p2, %p5107_p13 }
  0x81   : > { %5115 = shalt.err (!%p5112_p3)
}
  0x82   : > { %s7270_s15 = smov 64   ;;  %387 = sbr.rel (%p5385_p6) target bundleno = 2348 (0x92c), region = 48 }
  0x83   : > { %4676 = dma.hbm_to_vmem [thread:$0]  (!%p5348_p8), %s374_s8, 2048, %s376_s18, %s364_s19, %s7270_s15, %s7270_s15, %s5244_s24  }
  0x87   : > { %s389_s12 = sand.u32 1, %s5233_s28  }
  0x88   : > { %s4285_s2 = sshll.u32 %s389_s12, 3  ;;  %s390_s13 = scalar_lea.sflag [#allocation4], %s389_s12 }
  0x89   : > { %s5482_s29 = scalar_lea.vmem [#allocation3], %s4285_s2 }
  0x8a   : > { %5204 = dma.done.wait (%p5341_p7), %s390_s13, 128  }
  0x8b   : > { %5206 = vsyncadd (%p5341_p7), %s390_s13, 4294967168  ;;  %s399_s16 = sand.u32 1, %s5322_s9   ;;  %s4286_s20 = sshll.u32 %s389_s12, 1 }
  0x8c   : > { %s400_s24 = scalar_lea.sflag [#allocation7], %s399_s16  ;;  %s5489_s17 = scalar_lea.vmem [#allocation6], %s4286_s20 }
  0x8d   : > { %5208 = dma.done.wait (%p5341_p7), %s400_s24, 3104  }
  0x8e   : > { %5210 = vsyncadd (%p5341_p7), %s400_s24, 4294964192  ;;  %s4637_s27 = smul.u32 192, %s389_s12  ;;  %s4287_s22 = sshll.u32 %s389_s12, 6 }
  0x8f   : > { %s420_s8 = scalar_lea.sflag [#allocation10], %s399_s16  ;;  %s5497_s11 = scalar_lea.vmem [#allocation9], %s4287_s22 }
  0x90   : > { %s5495_s10 = scalar_lea.vmem [#allocation8], %s4637_s27 }
  0x91   : > { %5212 = dma.done.wait (%p5341_p7), %s420_s8, 3072  }
  0x92   : > { %5214 = vsyncadd (%p5341_p7), %s420_s8, 4294964224  ;;  %s4288_s18 = sshll.u32 %s389_s12, 7  ;;  %s440_s26 = scalar_lea.sflag [#allocation13], %s389_s12 }
  0x93   : > { %s5503_s19 = scalar_lea.vmem [#allocation11], %s4288_s18  ;;  %s5505_s30 = scalar_lea.vmem [#allocation12], %s4288_s18 }
  0x94   : > { %5216 = dma.done.wait (%p5341_p7), %s440_s26, 2048  }
  0x95   : > { %5218 = vsyncadd (%p5341_p7), %s440_s26, 4294965248  ;;  %p499_p8 = scmp.lt.s32.totalorder %s5322_s9, 1  ;;  %s515_s3 = sshll.u32 %s7224_s0, 4  ;;  %s516_s3 = int_to_ptr.hbm [resolvable:$true] %s515_s3 }
  0x96   : > { %s5249_s25 = smov [#allocation14]   ;;  %s7271_s13 = sld [smem:[#allocation40_spill]] }
  0x97   : > { %s500_s5 = scalar_select %p499_p8, %s5322_s9, 1 }
  0x98   : > { %s5516_s15 = sshll.u32 %s5249_s25, 4  ;;  %s518_s15 = int_to_ptr.vmem [resolvable:$true] %s5516_s15 }
  0x99   : > { %s4638_s12 = smul.u32 3, %s500_s5 }
  0x9a   : > { %4652 = dma.hbm_to_vmem [thread:$0]  (%p52_p5), %s516_s3, 512, %s518_s15, [#allocation2] }
  0x9c   : > { %s5526_s16 = scalar_lea.vmem %s7271_s13, %s4638_s12 }
  0x9d   : > { %5220 = dma.done.wait (%p52_p5), [#allocation2], 512 }
  0x9e   : > { %5222 = vsyncadd (%p52_p5), [#allocation2], 4294966784  ;;  %v526_v0 = vld [vmem:[#allocation14 + $0x10] sm:$0xff]  ;;  %v524_v1 = vld [vmem:[#allocation14] sm:$0xff]  ;;  %v5250_v4 = vmov 128.0   ;;  %s5251_s20 = smov 32  }
  0x9f   : > { %533 = vadd.xlane.f32.xlu2 %v526_v0  ;;  %529 = vadd.xlane.f32.xlu0 %v524_v1  ;;  %v525_v2 = vld [vmem:[#allocation14 + $0x8] sm:$0xff]  ;;  %v527_v3 = vld [vmem:[#allocation14 + $0x18] sm:$0xff]  ;;  %4848 = vrcp.f32 %v5250_v4  ;;  %v4593_v28 = vld [vmem:[%s5495_s10 + $0xb0] sm:$0xf0]  ;;  %s5252_s24 = smov 64   ;;  %s5253_s27 = smov 96  }
  0xa0   : > { %v4377_v27 = vld [vmem:[%s5495_s10 + $0xa8] sm:$0xf]  ;;  %v4592_v29 = vld [vmem:[%s5495_s10 + $0xac] sm:$0xf]  ;;  %v4379_v31 = vld [vmem:[%s5495_s10 + $0xb4] sm:$0xf0] }
  0xa1   : > { %v4378_v30 = vor.u32 %v4593_v28, %v4377_v27  ;;  %v4385_v32 = vld [vmem:[%s5495_s10 + $0xb0] sm:$0xf]  ;;  %v4594_v33 = vld [vmem:[%s5495_s10 + $0xb8] sm:$0xf0]  ;;  %v4382_v34 = vor.u32 %v4592_v29, %v4379_v31  ;;  %v4589_v38 = vld [vmem:[%s5495_s10 + $0x94] sm:$0xf] }
  0xa2   : > { %v4386_v35 = vor.u32 %v4594_v33, %v4385_v32  ;;  %v4365_v36 = vld [vmem:[%s5495_s10 + $0x90] sm:$0xf]  ;;  %v4590_v37 = vld [vmem:[%s5495_s10 + $0x98] sm:$0xf0]  ;;  %v4367_v40 = vld [vmem:[%s5495_s10 + $0x9c] sm:$0xf0] }
  0xa3   : > { %796 = vmatpush.bf16.msra.mxu0 %v4378_v30  ;;  %815 = vmatpush.bf16.msra.mxu1 %v4382_v34  ;;  %v4366_v39 = vor.u32 %v4590_v37, %v4365_v36  ;;  %v4373_v41 = vld [vmem:[%s5495_s10 + $0x98] sm:$0xf]  ;;  %v4591_v42 = vld [vmem:[%s5495_s10 + $0xa0] sm:$0xf0]  ;;  %v4370_v43 = vor.u32 %v4589_v38, %v4367_v40  ;;  %v4586_v47 = vld [vmem:[%s5495_s10 + $0x7c] sm:$0xf] }
  0xa4   : > { %834 = vmatpush.bf16.msra.mxu2 %v4386_v35  ;;  %v4374_v44 = vor.u32 %v4591_v42, %v4373_v41  ;;  %v4353_v45 = vld [vmem:[%s5495_s10 + $0x78] sm:$0xf]  ;;  %v4587_v46 = vld [vmem:[%s5495_s10 + $0x80] sm:$0xf0]  ;;  %v4355_v49 = vld [vmem:[%s5495_s10 + $0x84] sm:$0xf0] }
  0xa5   : > { %v4849_v5 = vpop.eup %4848  ;;  %v4354_v48 = vor.u32 %v4587_v46, %v4353_v45  ;;  %v4361_v50 = vld [vmem:[%s5495_s10 + $0x80] sm:$0xf]  ;;  %v4588_v51 = vld [vmem:[%s5495_s10 + $0x88] sm:$0xf0]  ;;  %v4358_v52 = vor.u32 %v4586_v47, %v4355_v49  ;;  %v4583_v56 = vld [vmem:[%s5495_s10 + $0x64] sm:$0xf] }
  0xa6   : > { %v538_v6 = vmul.f32 128.0, %v4849_v5  ;;  %vm542_vm0 = vweird.f32 %v4849_v5  ;;  %v4362_v53 = vor.u32 %v4588_v51, %v4361_v50  ;;  %v4341_v54 = vld [vmem:[%s5495_s10 + $0x60] sm:$0xf]  ;;  %v4584_v55 = vld [vmem:[%s5495_s10 + $0x68] sm:$0xf0]  ;;  %vm894_vm13 = vcmask 1047556  }
  0xa7   : > { %531 = vadd.xlane.f32.xlu0 %v525_v2  ;;  %535 = vadd.xlane.f32.xlu2 %v527_v3  ;;  %v4342_v57 = vor.u32 %v4584_v55, %v4341_v54  ;;  %v4343_v58 = vld [vmem:[%s5495_s10 + $0x6c] sm:$0xf0]  ;;  %v4349_v59 = vld [vmem:[%s5495_s10 + $0x68] sm:$0xf]  ;;  %v4585_v60 = vld [vmem:[%s5495_s10 + $0x70] sm:$0xf0] }
  0xa8   : > { %v539_v7 = vsub.f32 1.0, %v538_v6  ;;  %797 = vmatpush.bf16.msra.mxu0 %v4366_v39  ;;  %816 = vmatpush.bf16.msra.mxu1 %v4370_v43  ;;  %v4346_v61 = vor.u32 %v4583_v56, %v4343_v58  ;;  %v4350_v62 = vor.u32 %v4585_v60, %v4349_v59  ;;  %v4329_v63 = vld [vmem:[%s5495_s10 + $0x48] sm:$0xf]  ;;  %v4337_v4 = vld [vmem:[%s5495_s10 + $0x50] sm:$0xf]  ;;  %vm2352_vm14 = vcmask 261120  }
  0xa9   : > { %835 = vmatpush.bf16.msra.mxu2 %v4374_v44  ;;  %v4313_v27 = vld [vmem:[%s5495_s10 + $0x20] sm:$0xf]  ;;  %v4576_v28 = vld [vmem:[%s5495_s10 + $0x28] sm:$0xf0]  ;;  %v4571_v36 = vld [vmem:[%s5495_s10 + $0x4] sm:$0xf] }
  0xaa   : > { %v540_v8 = vmul.f32 %v4849_v5, %v539_v7  ;;  %v4314_v32 = vor.u32 %v4576_v28, %v4313_v27  ;;  %v4293_v34 = vld [vmem:[%s5495_s10] sm:$0xf]  ;;  %v4572_v35 = vld [vmem:[%s5495_s10 + $0x8] sm:$0xf0]  ;;  %v4295_v40 = vld [vmem:[%s5495_s10 + $0xc] sm:$0xf0] }
  0xab   : > { %v4294_v39 = vor.u32 %v4572_v35, %v4293_v34  ;;  %v4298_v41 = vor.u32 %v4571_v36, %v4295_v40  ;;  %v4301_v42 = vld [vmem:[%s5495_s10 + $0x8] sm:$0xf]  ;;  %v4573_v43 = vld [vmem:[%s5495_s10 + $0x10] sm:$0xf0]  ;;  %vm2583_vm15 = vcmask 130048   ;;  %s7318_s22 = sld [smem:[#allocation43_spill]] }
  0xac   : > { %v541_v9 = vadd.f32 %v4849_v5, %v540_v8  ;;  %798 = vmatpush.bf16.msra.mxu0 %v4354_v48  ;;  %817 = vmatpush.bf16.msra.mxu1 %v4358_v52  ;;  %v4317_v8 = vld [vmem:[%s5495_s10 + $0x30] sm:$0xf]  ;;  %v4302_v44 = vor.u32 %v4573_v43, %v4301_v42  ;;  %p4679_p5 = scmp.eq.s32.totalorder %s5322_s9, 1  ;;  %s5256_s8 = smov 128  }
  0xad   : > { %836 = vmatpush.bf16.msra.mxu2 %v4362_v53 }
  0xae   : > { %v5532_v10 = vsel %vm542_vm0, %v4849_v5, %v541_v9  ;;  %v4582_v5 = vld [vmem:[%s5495_s10 + $0x58] sm:$0xf0]  ;;  %vm3492_vm0 = vcmask 523264  }
  0xaf   : > { %7272 = vst [vmem:[#allocation28_spill] sm:$0xff] %v5532_v10  ;;  %v4338_v7 = vor.u32 %v4582_v5, %v4337_v4  ;;  %v4578_v9 = vld [vmem:[%s5495_s10 + $0x38] sm:$0xf0] }
  0xb0   : > { %799 = vmatpush.bf16.msra.mxu0 %v4342_v57  ;;  %818 = vmatpush.bf16.msra.mxu1 %v4346_v61 }
  0xb1   : > { %837 = vmatpush.bf16.msra.mxu2 %v4350_v62 }
  0xb5   : > { %838 = vmatpush.bf16.msra.mxu2 %v4338_v7 }
 0x112   : > { %v534_v11 = vpop.xlane.xlu2 %533  ;;  %v530_v12 = vpop.xlane.xlu0 %529 }
 0x113   : > { %v546_v13 = vmul.f32 %v5532_v10, %v534_v11  ;;  %v544_v14 = vmul.f32 %v5532_v10, %v530_v12  ;;  %v4577_v11 = vld [vmem:[%s5495_s10 + $0x34] sm:$0xf]  ;;  %v4318_v12 = vor.u32 %v4578_v9, %v4317_v8 }
 0x115   : > { %v5536_v15 = vsub.f32 %v526_v0, %v546_v13  ;;  %v5538_v16 = vsub.f32 %v524_v1, %v544_v14  ;;  %v4581_v0 = vld [vmem:[%s5495_s10 + $0x50] sm:$0xf0]  ;;  %v4580_v1 = vld [vmem:[%s5495_s10 + $0x4c] sm:$0xf]  ;;  %v4319_v13 = vld [vmem:[%s5495_s10 + $0x3c] sm:$0xf0] }
 0x116   : > { %v4325_v14 = vld [vmem:[%s5495_s10 + $0x38] sm:$0xf] }
 0x117   : > { %v554_v17 = vmul.f32 %v5536_v15, %v5536_v15  ;;  %v552_v18 = vmul.f32 %v5538_v16, %v5538_v16 }
 0x119   : > { %560 = vadd.xlane.f32.xlu0 %v554_v17  ;;  %556 = vadd.xlane.f32.xlu1 %v552_v18  ;;  %v4579_v17 = vld [vmem:[%s5495_s10 + $0x40] sm:$0xf0]  ;;  %v4322_v18 = vor.u32 %v4577_v11, %v4319_v13 }
 0x11a   : > { %v532_v19 = vpop.xlane.xlu0 %531  ;;  %v536_v20 = vpop.xlane.xlu2 %535 }
 0x11b   : > { %v545_v21 = vmul.f32 %v5532_v10, %v532_v19  ;;  %v547_v23 = vmul.f32 %v5532_v10, %v536_v20  ;;  %v4326_v19 = vor.u32 %v4579_v17, %v4325_v14  ;;  %v4305_v20 = vld [vmem:[%s5495_s10 + $0x18] sm:$0xf] }
 0x11d   : > { %v5545_v22 = vsub.f32 %v525_v2, %v545_v21  ;;  %v5550_v25 = vsub.f32 %v527_v3, %v547_v23  ;;  %v4330_v2 = vor.u32 %v4581_v0, %v4329_v63  ;;  %v4331_v3 = vld [vmem:[%s5495_s10 + $0x54] sm:$0xf0]  ;;  %839 = vmatpush.bf16.msra.mxu2 %v4326_v19  ;;  %v4575_v21 = vld [vmem:[%s5495_s10 + $0x20] sm:$0xf0]  ;;  %v4574_v23 = vld [vmem:[%s5495_s10 + $0x1c] sm:$0xf] }
 0x11e   : > { %v4334_v6 = vor.u32 %v4580_v1, %v4331_v3 }
 0x11f   : > { %v553_v24 = vmul.f32 %v5545_v22, %v5545_v22  ;;  %v555_v26 = vmul.f32 %v5550_v25, %v5550_v25  ;;  %800 = vmatpush.bf16.msra.mxu0 %v4330_v2  ;;  %v528_v2 = vld [vmem:[%s5482_s29] sm:$0xff] }
 0x120   : > { %819 = vmatpush.bf16.msra.mxu1 %v4334_v6  ;;  %v616_v6 = vperm.slane %v528_v2, 0  ;;  %v621_v17 = vperm.slane %v528_v2, 1 }
 0x121   : > { %558 = vadd.xlane.f32.xlu1 %v553_v24  ;;  %v4306_v24 = vor.u32 %v4575_v21, %v4305_v20  ;;  %840 = vmatpush.bf16.msra.mxu2 %v4314_v32 }
 0x123   : > { %801 = vmatpush.bf16.msra.mxu0 %v4318_v12 }
 0x124   : > { %820 = vmatpush.bf16.msra.mxu1 %v4322_v18 }
 0x125   : > { %841 = vmatpush.bf16.msra.mxu2 %v4302_v44 }
 0x127   : > { %802 = vmatpush.bf16.msra.mxu0 %v4306_v24 }
 0x129   : > { %562 = vadd.xlane.f32.xlu1 %v555_v26  ;;  %v4307_v26 = vld [vmem:[%s5495_s10 + $0x24] sm:$0xf0]  ;;  %s4086_s10 = sshll.u32 %s7318_s22, 4  ;;  %s4087_s10 = int_to_ptr.hbm [resolvable:$true] %s4086_s10 }
 0x12a   : > { %v4310_v31 = vor.u32 %v4574_v23, %v4307_v26 }
 0x12b   : > { %803 = vmatpush.bf16.msra.mxu0 %v4294_v39 }
 0x12c   : > { %821 = vmatpush.bf16.msra.mxu1 %v4310_v31 }
 0x130   : > { %822 = vmatpush.bf16.msra.mxu1 %v4298_v41 }
 0x18c   : > { %v557_v29 = vpop.xlane.xlu1 %556  ;;  %v561_v30 = vpop.xlane.xlu0 %560 }
 0x18d   : > { %v564_v33 = vmul.f32 %v557_v29, %v5532_v10  ;;  %v566_v38 = vmul.f32 %v561_v30, %v5532_v10 }
 0x18f   : > { %v568_v37 = vadd.f32 1e-06, %v564_v33  ;;  %v570_v45 = vadd.f32 1e-06, %v566_v38  ;;  %v660_v38 = vld [vmem:[%s5526_s16] sm:$0x7] }
 0x190   : > { %v663_v39 = vperm.slane %v660_v38, 1 }
 0x191   : > { %4850 = vrsqrt.f32 %v568_v37  ;;  %vm578_vm2 = vweird.f32 %v568_v37  ;;  %vm598_vm9 = vweird.f32 %v570_v45 }
 0x192   : > { %4852 = vrsqrt.f32 %v570_v45 }
 0x194   : > { %v559_v46 = vpop.xlane.xlu1 %558 }
 0x195   : > { %v565_v47 = vmul.f32 %v559_v46, %v5532_v10 }
 0x197   : > { %v4851_v48 = vpop.eup %4850  ;;  %v569_v49 = vadd.f32 1e-06, %v565_v47 }
 0x198   : > { %v573_v50 = vmul.f32 %v4851_v48, %v568_v37  ;;  %v4853_v54 = vpop.eup %4852  ;;  %vm579_vm1 = vweird.f32 %v4851_v48 }
 0x199   : > { %4854 = vrsqrt.f32 %v569_v49  ;;  %v593_v60 = vmul.f32 %v4853_v54, %v570_v45  ;;  %vm580_vm3 = vmor %vm578_vm2, %vm579_vm1  ;;  %vm588_vm5 = vweird.f32 %v569_v49  ;;  %vm599_vm10 = vweird.f32 %v4853_v54 }
 0x19a   : > { %v574_v51 = vmul.f32 %v4851_v48, %v573_v50  ;;  %vm600_vm12 = vmor %vm598_vm9, %vm599_vm10  ;;  %vm3497_vm1 = vcmask 785408  }
 0x19b   : > { %v594_v0 = vmul.f32 %v4853_v54, %v593_v60  ;;  %v664_v60 = vperm.slane %v660_v38, 2 }
 0x19c   : > { %v575_v52 = vmul.f32 0.5, %v574_v51  ;;  %v563_v53 = vpop.xlane.xlu1 %562 }
 0x19d   : > { %v567_v55 = vmul.f32 %v563_v53, %v5532_v10  ;;  %v595_v7 = vmul.f32 0.5, %v594_v0 }
 0x19e   : > { %v576_v56 = vsub.f32 1.5, %v575_v52 }
 0x19f   : > { %v4855_v57 = vpop.eup %4854  ;;  %v571_v58 = vadd.f32 1e-06, %v567_v55  ;;  %v596_v18 = vsub.f32 1.5, %v595_v7  ;;  %v5254_v7 = vmov 1983009808  }
 0x1a0   : > { %v577_v59 = vmul.f32 %v4851_v48, %v576_v56  ;;  %v583_v61 = vmul.f32 %v4855_v57, %v569_v49  ;;  %vm589_vm4 = vweird.f32 %v4855_v57 }
 0x1a1   : > { %4856 = vrsqrt.f32 %v571_v58  ;;  %vm590_vm6 = vmor %vm588_vm5, %vm589_vm4  ;;  %vm608_vm7 = vweird.f32 %v571_v58  ;;  %v597_v24 = vmul.f32 %v4853_v54, %v596_v18 }
 0x1a2   : > { %v584_v62 = vmul.f32 %v4855_v57, %v583_v61  ;;  %v581_v63 = vsel %vm580_vm3, %v4851_v48, %v577_v59 }
 0x1a3   : > { %v612_v5 = vmul.f32 %v581_v63, %v5538_v16 }
 0x1a4   : > { %v585_v1 = vmul.f32 0.5, %v584_v62 }
 0x1a5   : > { %v617_v14 = vmul.f32 %v616_v6, %v612_v5 }
 0x1a6   : > { %v586_v3 = vsub.f32 1.5, %v585_v1 }
 0x1a7   : > { %v4857_v4 = vpop.eup %4856  ;;  %v622_v21 = vadd.f32 %v621_v17, %v617_v14 }
 0x1a8   : > { %v587_v8 = vmul.f32 %v4855_v57, %v586_v3  ;;  %v603_v9 = vmul.f32 %v4857_v4, %v571_v58  ;;  %vm609_vm8 = vweird.f32 %v4857_v4 }
 0x1a9   : > { %vm610_vm11 = vmor %vm608_vm7, %vm609_vm8 }
 0x1aa   : > { %v591_v11 = vsel %vm590_vm6, %v4855_v57, %v587_v8  ;;  %v604_v12 = vmul.f32 %v4857_v4, %v603_v9  ;;  %v899_v8 = vunpack.c.l.s4 %v5254_v7 }
 0x1ab   : > { %v613_v13 = vmul.f32 %v591_v11, %v5545_v22  ;;  %v601_v22 = vsel %vm600_vm12, %v4853_v54, %v597_v24 }
 0x1ac   : > { %v605_v19 = vmul.f32 0.5, %v604_v12  ;;  %v614_v30 = vmul.f32 %v601_v22, %v5536_v15 }
 0x1ad   : > { %v618_v20 = vmul.f32 %v616_v6, %v613_v13 }
 0x1ae   : > { %v606_v16 = vsub.f32 1.5, %v605_v19  ;;  %v619_v32 = vmul.f32 %v616_v6, %v614_v30 }
 0x1af   : > { %v623_v23 = vadd.f32 %v621_v17, %v618_v20 }
 0x1b0   : > { %v607_v26 = vmul.f32 %v4857_v4, %v606_v16  ;;  %v624_v34 = vadd.f32 %v621_v17, %v619_v32  ;;  %v5670_v16 = vunpack.c.0.s8 %v899_v8 }
 0x1b1   : > { %v626_v27 = vpack.c.bf16 %v623_v23, %v622_v21  ;;  %v5255_v23 = vmov 1934713408  }
 0x1b2   : > { %v611_v28 = vsel %vm610_vm11, %v4857_v4, %v607_v26  ;;  %v923_v24 = vunpack.c.l.s4 %v5255_v23 }
 0x1b3   : > { %804 = vmatmul.bf16.vlgmr.msra.gmra.mxu0 %v626_v27  ;;  %823 = vmatmul.bf16.vlgmr.msra.gmra.mxu1 %v626_v27  ;;  %v615_v29 = vmul.f32 %v611_v28, %v5550_v25  ;;  %v662_v25 = vperm.slane %v660_v38, 0 }
 0x1b4   : > { %842 = vmatmul.bf16.vlgmr.msra.gmra.mxu2 %v626_v27 }
 0x1b5   : > { %v620_v31 = vmul.f32 %v616_v6, %v615_v29 }
 0x1b7   : > { %v625_v33 = vadd.f32 %v621_v17, %v620_v31 }
 0x1b9   : > { %v627_v35 = vpack.c.bf16 %v625_v33, %v624_v34 }
 0x1c3   : > { %809 = vmatmul.bf16.gmra.mxu0 %v627_v35  ;;  %828 = vmatmul.bf16.gmra.mxu1 %v627_v35 }
 0x1c4   : > { %847 = vmatmul.bf16.gmra.mxu2 %v627_v35 }
 0x230   : > { %v805_v36 = vpop.f32.mrf.mxu0  ;;  %v824_v37 = vpop.f32.mrf.mxu1 }
 0x231   : > { %v5612_v42 = vadd.f32 %v824_v37, %v663_v39  ;;  %v5623_v47 = vadd.f32 %v805_v36, %v662_v25 }
 0x233   : > { %v1392_v17 = vrot.slane %v5612_v42, 4  ;;  %v896_v18 = vrot.slane %v5623_v47, 4 }
 0x237   : > { %v843_v44 = vpop.f32.mrf.mxu2 }
 0x238   : > { %v807_v40 = vpop.f32.mrf.mxu0  ;;  %v826_v41 = vpop.f32.mrf.mxu1  ;;  %v5649_v62 = vadd.f32 %v843_v44, %v664_v60 }
 0x239   : > { %v5614_v43 = vadd.f32 %v826_v41, %v663_v39  ;;  %v5621_v45 = vadd.f32 %v807_v40, %v662_v25  ;;  %v5684_v40 = vunpack.c.0.s8 %v923_v24 }
 0x23a   : > { %v1888_v19 = vrot.slane %v5649_v62, 4 }
 0x23b   : > { %v4738_v15 = vpack.i.bf16 %v5614_v43, %v5612_v42  ;;  %v4748_v49 = vpack.i.bf16 %v5621_v45, %v5623_v47  ;;  %v1448_v29 = vrot.slane %v5614_v43, 4  ;;  %v952_v30 = vrot.slane %v5621_v45, 4 }
 0x23d   : > { %4739 = vrot.lane.b32.xlu1 %v4738_v15, %s5251_s20  ;;  %4734 = vrot.lane.b32.xlu0 %v4738_v15, %s5252_s24 }
 0x23e   : > { %4729 = vrot.lane.b32.xlu2 %v4738_v15, %s5253_s27 }
 0x23f   : > { %v845_v50 = vpop.f32.mrf.mxu2 }
 0x240   : > { %v829_v46 = vpop.f32.mrf.mxu1  ;;  %v810_v48 = vpop.f32.mrf.mxu0  ;;  %v5647_v61 = vadd.f32 %v845_v50, %v664_v60 }
 0x241   : > { %v5629_v52 = vadd.f32 %v829_v46, %v663_v39  ;;  %v5640_v57 = vadd.f32 %v810_v48, %v662_v25 }
 0x242   : > { %v4788_v63 = vpack.i.bf16 %v5647_v61, %v5649_v62  ;;  %v1944_v31 = vrot.slane %v5647_v61, 4 }
 0x245   : > { %4749 = vrot.lane.b32.xlu0 %v4748_v49, %s5252_s24 }
 0x246   : > { %4744 = vrot.lane.b32.xlu2 %v4748_v49, %s5253_s27 }
 0x247   : > { %v848_v58 = vpop.f32.mrf.mxu2 }
 0x248   : > { %v831_v51 = vpop.f32.mrf.mxu1  ;;  %v812_v55 = vpop.f32.mrf.mxu0  ;;  %v5658_v2 = vadd.f32 %v848_v58, %v664_v60 }
 0x249   : > { %v5631_v53 = vadd.f32 %v831_v51, %v663_v39  ;;  %v5638_v56 = vadd.f32 %v812_v55, %v662_v25 }
 0x24a   : > { %7274 = vst [vmem:[#allocation30_spill] sm:$0xff] %v5658_v2 }
 0x24b   : > { %v4763_v54 = vpack.i.bf16 %v5631_v53, %v5629_v52  ;;  %v4778_v59 = vpack.i.bf16 %v5638_v56, %v5640_v57  ;;  %v1560_v35 = vrot.slane %v5631_v53, 4 }
 0x24d   : > { %4764 = vrot.lane.b32.xlu0 %v4763_v54, %s5252_s24  ;;  %4759 = vrot.lane.b32.xlu1 %v4763_v54, %s5253_s27 }
 0x24e   : > { %4754 = vrot.lane.b32.xlu2 %v4748_v49, %s5251_s20 }
 0x24f   : > { %v850_v0 = vpop.f32.mrf.mxu2 }
 0x250   : > { %v5656_v1 = vadd.f32 %v850_v0, %v664_v60 }
 0x252   : > { %7273 = vst [vmem:[#allocation29_spill] sm:$0xff] %v5656_v1  ;;  %v5662_v3 = vpack.i.bf16 %v5656_v1, %v5658_v2 }
 0x254   : > { %7275 = vst [vmem:[#allocation31_spill] sm:$0xff] %v5662_v3 }
 0x255   : > { %4779 = vrot.lane.b32.xlu0 %v4778_v59, %s5252_s24  ;;  %4774 = vrot.lane.b32.xlu1 %v4778_v59, %s5253_s27 }
 0x256   : > { %4769 = vrot.lane.b32.xlu2 %v4763_v54, %s5251_s20 }
 0x25d   : > { %4789 = vrot.lane.b32.xlu0 %v4788_v63, %s5253_s27  ;;  %4799 = vrot.lane.b32.xlu1 %v4788_v63, %s5251_s20 }
 0x25e   : > { %4784 = vrot.lane.b32.xlu2 %v4778_v59, %s5251_s20 }
 0x265   : > { %4804 = vrot.lane.b32.xlu1 %v5662_v3, %s5253_s27 }
 0x266   : > { %4794 = vrot.lane.b32.xlu2 %v4788_v63, %s5252_s24 }
 0x298   : > { %v4730_v4 = vpop.permute.xlu2 %4729 }
 0x299   : > { %v4732_v20 = vunpack.i.h.bf16 %v4730_v4  ;;  %v4731_v26 = vunpack.i.l.bf16 %v4730_v4 }
 0x29b   : > { %v1460_v37 = vrot.slane %v4732_v20, 4  ;;  %v1404_v25 = vrot.slane %v4731_v26, 4 }
 0x2a0   : > { %v4745_v5 = vpop.permute.xlu2 %4744 }
 0x2a1   : > { %v4746_v6 = vunpack.i.l.bf16 %v4745_v5  ;;  %v4747_v9 = vunpack.i.h.bf16 %v4745_v5 }
 0x2a3   : > { %v908_v14 = vrot.slane %v4746_v6, 4  ;;  %v964_v27 = vrot.slane %v4747_v9, 4 }
 0x2a8   : > { %v4755_v11 = vpop.permute.xlu2 %4754 }
 0x2a9   : > { %v4757_v12 = vunpack.i.h.bf16 %v4755_v11  ;;  %v4756_v13 = vunpack.i.l.bf16 %v4755_v11 }
 0x2ab   : > { %v906_v21 = vrot.slane %v4756_v13, 4  ;;  %v962_v28 = vrot.slane %v4757_v12, 4  ;;  %v909_v22 = vsel %vm894_vm13, %v4756_v13, %v908_v14  ;;  %v965_v34 = vsel %vm894_vm13, %v4757_v12, %v964_v27 }
 0x2ac   : > { %v5682_v38 = vperm.slane %v909_v22, %v5670_v16  ;;  %v5692_v50 = vperm.slane %v965_v34, %v5670_v16 }
 0x2ad   : > { %v907_v33 = vsel %vm894_vm13, %v906_v21, %v4746_v6  ;;  %v963_v44 = vsel %vm894_vm13, %v962_v28, %v4747_v9 }
 0x2ae   : > { %v5689_v49 = vperm.slane %v907_v33, %v5670_v16  ;;  %v930_v63 = vrot.slane %v5682_v38, 4  ;;  %v5698_v0 = vperm.slane %v963_v44, %v5670_v16  ;;  %v986_v33 = vrot.slane %v5692_v50, 4 }
 0x2af   : > { %v4740_v39 = vpop.permute.xlu1 %4739  ;;  %v4735_v41 = vpop.permute.xlu0 %4734 }
 0x2b0   : > { %v4742_v46 = vunpack.i.h.bf16 %v4740_v39  ;;  %v4741_v48 = vunpack.i.l.bf16 %v4740_v39  ;;  %v4737_v51 = vunpack.i.h.bf16 %v4735_v41  ;;  %v4736_v54 = vunpack.i.l.bf16 %v4735_v41  ;;  %v5707_v21 = vpop.permute.xlu2 %4769 }
 0x2b2   : > { %v1458_v55 = vrot.slane %v4742_v46, 4  ;;  %v1461_v58 = vsel %vm894_vm13, %v4742_v46, %v1460_v37  ;;  %v1402_v59 = vrot.slane %v4741_v48, 4  ;;  %v1405_v60 = vsel %vm894_vm13, %v4741_v48, %v1404_v25 }
 0x2b3   : > { %v1469_v4 = vperm.slane %v1461_v58, %v5670_v16  ;;  %v1413_v5 = vperm.slane %v1405_v60, %v5670_v16  ;;  %v1446_v8 = vrot.slane %v4737_v51, 4  ;;  %v1449_v9 = vsel %vm894_vm13, %v4737_v51, %v1448_v29 }
 0x2b4   : > { %v1459_v6 = vsel %vm894_vm13, %v1458_v55, %v4732_v20  ;;  %v1403_v7 = vsel %vm894_vm13, %v1402_v59, %v4731_v26  ;;  %v1457_v24 = vperm.slane %v1449_v9, %v5670_v16  ;;  %v1390_v27 = vrot.slane %v4736_v54, 4 }
 0x2b5   : > { %v1465_v11 = vperm.slane %v1459_v6, %v5670_v16  ;;  %v1482_v12 = vrot.slane %v1469_v4, 4  ;;  %v1409_v13 = vperm.slane %v1403_v7, %v5670_v16  ;;  %v1426_v14 = vrot.slane %v1413_v5, 4 }
 0x2b6   : > { %v1447_v23 = vsel %vm894_vm13, %v1446_v8, %v5614_v43  ;;  %v1393_v20 = vsel %vm894_vm13, %v4736_v54, %v1392_v17  ;;  %v1484_v37 = vrot.slane %v1457_v24, 4  ;;  %v1391_v39 = vsel %vm894_vm13, %v1390_v27, %v5612_v42 }
 0x2b7   : > { %v1470_v26 = vrot.slane %v1465_v11, 4  ;;  %v1414_v28 = vrot.slane %v1409_v13, 4  ;;  %v1453_v22 = vperm.slane %v1447_v23, %v5670_v16  ;;  %v1401_v29 = vperm.slane %v1393_v20, %v5670_v16 }
 0x2b8   : > { %v1483_v34 = vsel %vm894_vm13, %v1482_v12, %v1457_v24  ;;  %v1397_v17 = vperm.slane %v1391_v39, %v5670_v16  ;;  %v1485_v46 = vsel %vm894_vm13, %v1469_v4, %v1484_v37  ;;  %v4772_v54 = vunpack.i.h.bf16 %v5707_v21  ;;  %v5751_v37 = vpop.permute.xlu2 %4784 }
 0x2b9   : > { %v1471_v43 = vsel %vm894_vm13, %v1470_v26, %v1453_v22  ;;  %v1472_v41 = vrot.slane %v1453_v22, 4  ;;  %v1489_v25 = vperm.slane %v1483_v34, %v5684_v40  ;;  %v1427_v48 = vsel %vm894_vm13, %v1426_v14, %v1401_v29  ;;  %v4750_v14 = vpop.permute.xlu0 %4749 }
 0x2ba   : > { %v5723_v44 = vperm.slane %v1471_v43, %v5684_v40  ;;  %v1428_v51 = vrot.slane %v1401_v29, 4  ;;  %v1493_v42 = vperm.slane %v1485_v46, %v5684_v40  ;;  %v1415_v58 = vsel %vm894_vm13, %v1414_v28, %v1397_v17 }
 0x2bb   : > { %v1473_v55 = vsel %vm894_vm13, %v1465_v11, %v1472_v41  ;;  %v4771_v59 = vunpack.i.l.bf16 %v5707_v21  ;;  %v1416_v6 = vrot.slane %v1397_v17, 4  ;;  %v5734_v7 = vperm.slane %v1415_v58, %v5684_v40 }
 0x2bc   : > { %v1481_v60 = vperm.slane %v1473_v55, %v5684_v40  ;;  %v1498_v4 = vrot.slane %v1489_v25, 4  ;;  %v1500_v8 = vrot.slane %v1493_v42, 4  ;;  %v1429_v9 = vsel %vm894_vm13, %v1413_v5, %v1428_v51 }
 0x2bd   : > { %v1433_v12 = vperm.slane %v1427_v48, %v5684_v40  ;;  %v1494_v11 = vrot.slane %v5723_v44, 4  ;;  %v1417_v24 = vsel %vm894_vm13, %v1409_v13, %v1416_v6  ;;  %v1437_v27 = vperm.slane %v1429_v9, %v5684_v40 }
 0x2be   : > { %v5739_v23 = vrot.slane %v1481_v60, 4  ;;  %v918_v20 = vrot.slane %v5689_v49, 4  ;;  %v1501_v26 = vsel %vm894_vm13, 0.0, %v1500_v8  ;;  %v1425_v28 = vperm.slane %v1417_v24, %v5684_v40 }
 0x2bf   : > { %v1438_v22 = vrot.slane %v5734_v7, 4  ;;  %v1684_v29 = vrot.slane %v1501_v26, 4  ;;  %v1444_v34 = vrot.slane %v1437_v27, 4  ;;  %v4752_v39 = vunpack.i.h.bf16 %v4750_v14 }
 0x2c0   : > { %v5749_v5 = vsel %vm894_vm13, 0.0, %v5739_v23  ;;  %v974_v13 = vrot.slane %v5698_v0, 4  ;;  %v5756_v43 = vrot.slane %v4772_v54, 4  ;;  %v5758_v41 = vrot.slane %v1425_v28, 4  ;;  %v4760_v28 = vpop.permute.xlu1 %4759 }
 0x2c1   : > { %v1442_v17 = vrot.slane %v1433_v12, 4  ;;  %v5762_v46 = vrot.slane %v4771_v59, 4  ;;  %v5765_v48 = vsel %vm894_vm13, 0.0, %v1494_v11  ;;  %v1499_v51 = vsel %vm894_vm13, 0.0, %v1498_v4 }
 0x2c2   : > { %v5769_v55 = vsel %vm894_vm13, %v1500_v8, %v1489_v25  ;;  %v5773_v58 = vsel %vm894_vm13, 0.0, %v1438_v22  ;;  %v1445_v60 = vsel %vm894_vm13, 0.0, %v1444_v34  ;;  %v7239_v6 = vunpack.i.h.bf16 %v5751_v37 }
 0x2c3   : > { %v5778_v9 = vsel %vm894_vm13, %v1684_v29, %v1499_v51  ;;  %v950_v24 = vrot.slane %v4752_v39, 4  ;;  %v953_v4 = vsel %vm894_vm13, %v4752_v39, %v952_v30  ;;  %v4751_v11 = vunpack.i.l.bf16 %v4750_v14 }
 0x2c4   : > { %v5785_v25 = vsel %vm894_vm13, 0.0, %v5758_v41  ;;  %v1443_v8 = vsel %vm894_vm13, 0.0, %v1442_v17  ;;  %v5789_v27 = vsel %vm894_vm13, %v1444_v34, %v1433_v12  ;;  %v961_v26 = vperm.slane %v953_v4, %v5670_v16 }
 0x2c5   : > { %v1630_v22 = vrot.slane %v1445_v60, 4  ;;  %v951_v29 = vsel %vm894_vm13, %v950_v24, %v5621_v45  ;;  %v893_v51 = vrot.slane %v4751_v11, 4  ;;  %v897_v30 = vsel %vm894_vm13, %v4751_v11, %v896_v18 }
 0x2c6   : > { %v957_v14 = vperm.slane %v951_v29, %v5670_v16  ;;  %v987_v39 = vsel %vm894_vm13, %v986_v33, %v961_v26  ;;  %v988_v12 = vrot.slane %v961_v26, 4  ;;  %v905_v34 = vperm.slane %v897_v30, %v5670_v16 }
 0x2c7   : > { %v5804_v17 = vrot.slane %v7239_v6, 4  ;;  %v993_v45 = vperm.slane %v987_v39, %v5684_v40  ;;  %v895_v60 = vsel %vm894_vm13, %v893_v51, %v5623_v47  ;;  %v4762_v24 = vunpack.i.h.bf16 %v4760_v28 }
 0x2c8   : > { %v975_v18 = vsel %vm894_vm13, %v974_v13, %v957_v14  ;;  %v976_v4 = vrot.slane %v957_v14, 4  ;;  %v989_v11 = vsel %vm894_vm13, %v5692_v50, %v988_v12  ;;  %v901_v33 = vperm.slane %v895_v60, %v5670_v16 }
 0x2c9   : > { %v7238_v26 = vunpack.i.l.bf16 %v5751_v37  ;;  %v5815_v29 = vperm.slane %v975_v18, %v5684_v40  ;;  %v997_v30 = vperm.slane %v989_v11, %v5684_v40  ;;  %v931_v47 = vsel %vm894_vm13, %v930_v63, %v905_v34 }
 0x2ca   : > { %v977_v13 = vsel %vm894_vm13, %v5698_v0, %v976_v4  ;;  %v919_v51 = vsel %vm894_vm13, %v918_v20, %v901_v33  ;;  %v920_v14 = vrot.slane %v901_v33, 4  ;;  %v932_v50 = vrot.slane %v905_v34, 4 }
 0x2cb   : > { %v985_v39 = vperm.slane %v977_v13, %v5684_v40  ;;  %v1002_v12 = vrot.slane %v993_v45, 4  ;;  %v1004_v60 = vrot.slane %v997_v30, 4  ;;  %v1572_v42 = vrot.slane %v4762_v24, 4 }
 0x2cc   : > { %v998_v18 = vrot.slane %v5815_v29, 4  ;;  %v921_v11 = vsel %vm894_vm13, %v5689_v49, %v920_v14  ;;  %v5829_v36 = vperm.slane %v919_v51, %v5684_v40  ;;  %v933_v63 = vsel %vm894_vm13, %v5682_v38, %v932_v50  ;;  %v4765_v51 = vpop.permute.xlu0 %4764 }
 0x2cd   : > { %v5833_v0 = vrot.slane %v985_v39, 4  ;;  %v1005_v20 = vsel %vm894_vm13, 0.0, %v1004_v60  ;;  %v1183_v34 = vsel %vm894_vm13, %v1004_v60, %v993_v45  ;;  %v937_v4 = vperm.slane %v931_v47, %v5684_v40 }
 0x2ce   : > { %v5839_v33 = vperm.slane %v1183_v34, %v5670_v16  ;;  %v1188_v30 = vrot.slane %v1005_v20, 4  ;;  %v929_v49 = vperm.slane %v921_v11, %v5684_v40  ;;  %v941_v13 = vperm.slane %v933_v63, %v5684_v40 }
 0x2cf   : > { %v5845_v38 = vsel %vm894_vm13, %v1630_v22, %v1443_v8  ;;  %v5849_v14 = vsel %vm894_vm13, 0.0, %v5833_v0  ;;  %v4761_v45 = vunpack.i.l.bf16 %v4760_v28  ;;  %v5853_v47 = vrot.slane %v7238_v26, 4 }
 0x2d0   : > { %v1003_v50 = vsel %vm894_vm13, 0.0, %v1002_v12  ;;  %v5856_v39 = vrot.slane %v929_v49, 4  ;;  %v1571_v60 = vsel %vm894_vm13, %v5756_v43, %v4762_v24  ;;  %v5861_v11 = vsel %vm894_vm13, 0.0, %v998_v18  ;;  %v4795_v49 = vpop.permute.xlu2 %4794 }
 0x2d1   : > { %v942_v8 = vrot.slane %v5829_v36, 4  ;;  %v948_v22 = vrot.slane %v941_v13, 4  ;;  %v1573_v28 = vsel %vm894_vm13, %v4772_v54, %v1572_v42  ;;  %v1189_v20 = vsel %vm894_vm13, %v1188_v30, %v1003_v50 }
 0x2d2   : > { %v946_v34 = vrot.slane %v937_v4, 4  ;;  %v1515_v18 = vsel %vm894_vm13, %v5762_v46, %v4761_v45  ;;  %v1516_v13 = vrot.slane %v4761_v45, 4  ;;  %v5876_v54 = vsel %vm894_vm13, 0.0, %v5856_v39 }
 0x2d3   : > { %v949_v43 = vsel %vm894_vm13, 0.0, %v948_v22  ;;  %v1129_v24 = vsel %vm894_vm13, %v948_v22, %v937_v4  ;;  %v1577_v30 = vperm.slane %v1571_v60, %v5670_v16  ;;  %v1581_v50 = vperm.slane %v1573_v28, %v5670_v16 }
 0x2d4   : > { %v1134_v42 = vrot.slane %v949_v43, 4  ;;  %v5881_v12 = vperm.slane %v1129_v24, %v5670_v16  ;;  %v1517_v4 = vsel %vm894_vm13, %v4771_v59, %v1516_v13  ;;  %v4797_v22 = vunpack.i.h.bf16 %v4795_v49 }
 0x2d5   : > { %v4796_v46 = vunpack.i.l.bf16 %v4795_v49  ;;  %v5887_v45 = vperm.slane %v1189_v20, %v5670_v16  ;;  %v947_v63 = vsel %vm894_vm13, 0.0, %v946_v34  ;;  %v1521_v43 = vperm.slane %v1515_v18, %v5670_v16 }
 0x2d6   : > { %v4767_v15 = vunpack.i.h.bf16 %v4765_v51  ;;  %v5892_v60 = vsel %vm894_vm13, 0.0, %v942_v8  ;;  %v1135_v24 = vsel %vm894_vm13, %v1134_v42, %v947_v63  ;;  %v1525_v21 = vperm.slane %v1517_v4, %v5670_v16 }
 0x2d7   : > { %v1582_v59 = vrot.slane %v1577_v30, 4  ;;  %v1594_v13 = vrot.slane %v1581_v50, 4  ;;  %v1942_v49 = vrot.slane %v4797_v22, 4  ;;  %v1945_v20 = vsel %vm894_vm13, %v4797_v22, %v1944_v31 }
 0x2d8   : > { %v1886_v18 = vrot.slane %v4796_v46, 4  ;;  %v1558_v26 = vrot.slane %v4767_v15, 4  ;;  %v1561_v8 = vsel %vm894_vm13, %v4767_v15, %v1560_v35  ;;  %v5905_v28 = vperm.slane %v1135_v24, %v5670_v16 }
 0x2d9   : > { %v1526_v63 = vrot.slane %v1521_v43, 4  ;;  %v1889_v42 = vsel %vm894_vm13, %v4796_v46, %v1888_v19  ;;  %v1569_v4 = vperm.slane %v1561_v8, %v5670_v16  ;;  %v1538_v6 = vrot.slane %v1525_v21, 4 }
 0x2da   : > { %v5912_v31 = vperm.slane %v1945_v20, %v5670_v16  ;;  %v1559_v22 = vsel %vm894_vm13, %v1558_v26, %v5631_v53  ;;  %v4766_v34 = vunpack.i.l.bf16 %v4765_v51  ;;  %v1943_v35 = vsel %vm894_vm13, %v1942_v49, %v5647_v61 }
 0x2db   : > { %v1565_v15 = vperm.slane %v1559_v22, %v5670_v16  ;;  %v1595_v24 = vsel %vm894_vm13, %v1594_v13, %v1569_v4  ;;  %v1596_v32 = vrot.slane %v1569_v4, 4  ;;  %v1887_v19 = vsel %vm894_vm13, %v1886_v18, %v5649_v62 }
 0x2dc   : > { %v5923_v46 = vperm.slane %v1889_v42, %v5670_v16  ;;  %v1502_v20 = vrot.slane %v4766_v34, 4  ;;  %v7276_v8 = vrot.slane %v5629_v52, 4  ;;  %v5932_v13 = vperm.slane %v1943_v35, %v5670_v16 }
 0x2dd   : > { %v1583_v26 = vsel %vm894_vm13, %v1582_v59, %v1565_v15  ;;  %v1584_v51 = vrot.slane %v1565_v15, 4  ;;  %v1597_v61 = vsel %vm894_vm13, %v1581_v50, %v1596_v32  ;;  %v1601_v62 = vperm.slane %v1595_v24, %v5684_v40 }
 0x2de   : > { %v1505_v53 = vsel %vm894_vm13, %v4766_v34, %v7276_v8  ;;  %v1605_v18 = vperm.slane %v1597_v61, %v5684_v40  ;;  %v1503_v42 = vsel %vm894_vm13, %v1502_v20, %v5629_v52  ;;  %v5942_v32 = vperm.slane %v1887_v19, %v5670_v16  ;;  %v4775_v61 = vpop.permute.xlu1 %4774 }
 0x2df   : > { %v1513_v49 = vperm.slane %v1505_v53, %v5670_v16  ;;  %v1585_v34 = vsel %vm894_vm13, %v1577_v30, %v1584_v51  ;;  %v1509_v59 = vperm.slane %v1503_v42, %v5670_v16  ;;  %v5945_v50 = vperm.slane %v1583_v26, %v5684_v40 }
 0x2e0   : > { %v1593_v35 = vperm.slane %v1585_v34, %v5684_v40  ;;  %v1612_v15 = vrot.slane %v1605_v18, 4  ;;  %v1610_v19 = vrot.slane %v1601_v62, 4 }
 0x2e1   : > { %v1540_v22 = vrot.slane %v1513_v49, 4  ;;  %v1527_v24 = vsel %vm894_vm13, %v1526_v63, %v1509_v59  ;;  %v1528_v8 = vrot.slane %v1509_v59, 4  ;;  %v1539_v52 = vsel %vm894_vm13, %v1538_v6, %v1513_v49  ;;  %v4780_v6 = vpop.permute.xlu0 %4779 }
 0x2e2   : > { %v5953_v51 = vrot.slane %v1593_v35, 4  ;;  %v5956_v26 = vsel %vm894_vm13, 0.0, %v1612_v15  ;;  %v1787_v18 = vsel %vm894_vm13, %v1612_v15, %v1601_v62  ;;  %v5961_v42 = vperm.slane %v1527_v24, %v5684_v40 }
 0x2e3   : > { %v1541_v20 = vsel %vm894_vm13, %v1525_v21, %v1540_v22  ;;  %7278 = vst [vmem:[#allocation33_spill] sm:$0xff] %v5956_v26  ;;  %v1529_v63 = vsel %vm894_vm13, %v1521_v43, %v1528_v8  ;;  %v1545_v34 = vperm.slane %v1539_v52, %v5684_v40  ;;  %v4777_v35 = vunpack.i.h.bf16 %v4775_v61 }
 0x2e4   : > { %7277 = vst [vmem:[#allocation32_spill] sm:$0xff] %v5953_v51  ;;  %v1549_v59 = vperm.slane %v1541_v20, %v5684_v40  ;;  %v5969_v22 = vsel %vm894_vm13, 0.0, %v5953_v51  ;;  %v1537_v62 = vperm.slane %v1529_v63, %v5684_v40  ;;  %v4776_v43 = vunpack.i.l.bf16 %v4775_v61 }
 0x2e5   : > { %7279 = vst [vmem:[#allocation34_spill] sm:$0xff] %v5969_v22  ;;  %v5973_v15 = vsel %vm894_vm13, 0.0, %v1610_v19  ;;  %v5976_v24 = vperm.slane %v1787_v18, %v5670_v16  ;;  %v4782_v49 = vunpack.i.h.bf16 %v4780_v6  ;;  %v1075_v20 = vsel %vm894_vm13, %v5804_v17, %v4777_v35 }
 0x2e6   : > { %7280 = vst [vmem:[#allocation35_spill] sm:$0xff] %v5973_v15  ;;  %v1076_v53 = vrot.slane %v4777_v35, 4  ;;  %v4781_v4 = vunpack.i.l.bf16 %v4780_v6  ;;  %v1554_v21 = vrot.slane %v1545_v34, 4  ;;  %v1556_v61 = vrot.slane %v1549_v59, 4 }
 0x2e7   : > { %7281 = vst [vmem:[#allocation36_spill] sm:$0xff] %v5976_v24  ;;  %v1081_v19 = vperm.slane %v1075_v20, %v5670_v16  ;;  %v5984_v30 = vrot.slane %v1537_v62, 4  ;;  %v7282_v18 = vunpack.i.h.bf16 %v5751_v37  ;;  %v1019_v52 = vsel %vm894_vm13, %v5853_v47, %v4776_v43 }
 0x2e8   : > { %v1020_v10 = vrot.slane %v4776_v43, 4  ;;  %v1025_v6 = vperm.slane %v1019_v52, %v5670_v16  ;;  %v1062_v63 = vrot.slane %v4782_v49, 4  ;;  %v7283_v59 = vunpack.i.l.bf16 %v5751_v37 }
 0x2e9   : > { %v1077_v8 = vsel %vm894_vm13, %v7282_v18, %v1076_v53  ;;  %v1086_v35 = vrot.slane %v1081_v19, 4  ;;  %v7284_v62 = vrot.slane %v5638_v56, 4  ;;  %v1006_v2 = vrot.slane %v4781_v4, 4 }
 0x2ea   : > { %v1085_v17 = vperm.slane %v1077_v8, %v5670_v16  ;;  %v1021_v20 = vsel %vm894_vm13, %v7283_v59, %v1020_v10  ;;  %v7285_v53 = vrot.slane %v5640_v57, 4  ;;  %v1030_v18 = vrot.slane %v1025_v6, 4 }
 0x2eb   : > { %v1065_v1 = vsel %vm894_vm13, %v4782_v49, %v7284_v62  ;;  %v1029_v8 = vperm.slane %v1021_v20, %v5670_v16  ;;  %v1063_v52 = vsel %vm894_vm13, %v1062_v63, %v5638_v56  ;;  %v6006_v37 = vsel %vm894_vm13, 0.0, %v1554_v21 }
 0x2ec   : > { %v1009_v47 = vsel %vm894_vm13, %v4781_v4, %v7285_v53  ;;  %v1098_v43 = vrot.slane %v1085_v17, 4  ;;  %v1069_v10 = vperm.slane %v1063_v52, %v5670_v16  ;;  %v1073_v59 = vperm.slane %v1065_v1, %v5670_v16 }
 0x2ed   : > { %v1007_v49 = vsel %vm894_vm13, %v1006_v2, %v5640_v57  ;;  %v6013_v62 = vsel %vm894_vm13, 0.0, %v1556_v61  ;;  %v1042_v4 = vrot.slane %v1029_v8, 4  ;;  %v1017_v53 = vperm.slane %v1009_v47, %v5670_v16 }
 0x2ee   : > { %v1013_v20 = vperm.slane %v1007_v49, %v5670_v16  ;;  %v1087_v56 = vsel %vm894_vm13, %v1086_v35, %v1069_v10  ;;  %v1088_v63 = vrot.slane %v1069_v10, 4  ;;  %v1099_v21 = vsel %vm894_vm13, %v1098_v43, %v1073_v59  ;;  %v6026_v35 = vpop.permute.xlu1 %4799 }
 0x2ef   : > { %v1100_v3 = vrot.slane %v1073_v59, 4  ;;  %v1733_v52 = vsel %vm894_vm13, %v1556_v61, %v1545_v34  ;;  %v1105_v1 = vperm.slane %v1099_v21, %v5684_v40  ;;  %v1093_v26 = vperm.slane %v1087_v56, %v5684_v40 }
 0x2f0   : > { %v1031_v57 = vsel %vm894_vm13, %v1030_v18, %v1013_v20  ;;  %v1032_v2 = vrot.slane %v1013_v20, 4  ;;  %v1089_v24 = vsel %vm894_vm13, %v1081_v19, %v1088_v63  ;;  %v1043_v47 = vsel %vm894_vm13, %v1042_v4, %v1017_v53 }
 0x2f1   : > { %v1101_v49 = vsel %vm894_vm13, %v1085_v17, %v1100_v3  ;;  %v6030_v43 = vsel %vm894_vm13, 0.0, %v5984_v30  ;;  %v1097_v34 = vperm.slane %v1089_v24, %v5684_v40  ;;  %v1114_v18 = vrot.slane %v1105_v1, 4 }
 0x2f2   : > { %v1109_v61 = vperm.slane %v1101_v49, %v5684_v40  ;;  %v6035_v10 = vperm.slane %v1733_v52, %v5670_v16  ;;  %v1033_v19 = vsel %vm894_vm13, %v1025_v6, %v1032_v2  ;;  %v1037_v3 = vperm.slane %v1031_v57, %v5684_v40 }
 0x2f3   : > { %v1044_v17 = vrot.slane %v1017_v53, 4  ;;  %v1112_v59 = vrot.slane %v1097_v34, 4  ;;  %v1049_v20 = vperm.slane %v1043_v47, %v5684_v40  ;;  %v4802_v56 = vunpack.i.h.bf16 %v6026_v35 }
 0x2f4   : > { %7286 = vst [vmem:[#allocation37_spill] sm:$0xff] %v6035_v10  ;;  %v1116_v4 = vrot.slane %v1109_v61, 4  ;;  %v1110_v63 = vrot.slane %v1093_v26, 4  ;;  %v1041_v24 = vperm.slane %v1033_v19, %v5684_v40  ;;  %v4801_v49 = vunpack.i.l.bf16 %v6026_v35  ;;  %v4790_v35 = vpop.permute.xlu0 %4789 }
 0x2f5   : > { %v1045_v21 = vsel %vm894_vm13, %v1029_v8, %v1044_v17  ;;  %v1113_v52 = vsel %vm894_vm13, 0.0, %v1112_v59  ;;  %v1115_v6 = vsel %vm894_vm13, 0.0, %v1114_v18  ;;  %v1054_v61 = vrot.slane %v1037_v3, 4 }
 0x2f6   : > { %v1117_v57 = vsel %vm894_vm13, 0.0, %v1116_v4  ;;  %v1291_v53 = vsel %vm894_vm13, %v1116_v4, %v1105_v1  ;;  %v1285_v15 = vrot.slane %v1113_v52, 4  ;;  %v1053_v19 = vperm.slane %v1045_v21, %v5684_v40 }
 0x2f7   : > { %v1296_v34 = vrot.slane %v1117_v57, 4  ;;  %v1056_v8 = vrot.slane %v1041_v24, 4  ;;  %v1058_v17 = vrot.slane %v1049_v20, 4  ;;  %v1280_v22 = vsel %vm894_vm13, %v1112_v59, %v1093_v26 }
 0x2f8   : > { %v6053_v18 = vperm.slane %v1291_v53, %v5670_v16  ;;  %v1954_v1 = vrot.slane %v4802_v56, 4  ;;  %v1111_v4 = vsel %vm894_vm13, 0.0, %v1110_v63  ;;  %v1060_v2 = vrot.slane %v1053_v19, 4 }
 0x2f9   : > { %v1297_v51 = vsel %vm894_vm13, %v1296_v34, %v1115_v6  ;;  %v1226_v57 = vsel %vm894_vm13, %v1056_v8, %v1037_v3  ;;  %v1898_v47 = vrot.slane %v4801_v49, 4  ;;  %v1055_v24 = vsel %vm894_vm13, 0.0, %v1054_v61 }
 0x2fa   : > { %7287 = vst [vmem:[#allocation38_spill] sm:$0xff] %v6053_v18  ;;  %v6059_v52 = vperm.slane %v1297_v51, %v5670_v16  ;;  %v4792_v21 = vunpack.i.h.bf16 %v4790_v35  ;;  %v4791_v10 = vunpack.i.l.bf16 %v4790_v35  ;;  %v6063_v26 = vperm.slane %v1280_v22, %v5670_v16 }
 0x2fb   : > { %v6066_v59 = vsel %vm894_vm13, %v1285_v15, %v1111_v4  ;;  %v1057_v6 = vsel %vm894_vm13, 0.0, %v1056_v8  ;;  %v1059_v63 = vsel %vm894_vm13, 0.0, %v1058_v17  ;;  %v1061_v53 = vsel %vm894_vm13, 0.0, %v1060_v2 }
 0x2fc   : > { %7288 = vst [vmem:[#allocation39_spill] sm:$0xff] %v6063_v26  ;;  %v6073_v51 = vperm.slane %v1226_v57, %v5670_v16  ;;  %v1955_v34 = vsel %vm894_vm13, %v1954_v1, %v4792_v21  ;;  %v1956_v61 = vrot.slane %v4792_v21, 4  ;;  %v1899_v19 = vsel %vm894_vm13, %v1898_v47, %v4791_v10 }
 0x2fd   : > { %v1961_v22 = vperm.slane %v1955_v34, %v5670_v16  ;;  %v1900_v15 = vrot.slane %v4791_v10, 4  ;;  %v1314_v35 = vrot.slane %v6059_v52, 4  ;;  %v1231_v8 = vrot.slane %v1057_v6, 4 }
 0x2fe   : > { %v1237_v17 = vsel %vm894_vm13, %v1060_v2, %v1049_v20  ;;  %v1905_v4 = vperm.slane %v1899_v19, %v5670_v16  ;;  %v1242_v3 = vrot.slane %v1061_v53, 4  ;;  %v1957_v18 = vsel %vm894_vm13, %v4802_v56, %v1956_v61 }
 0x2ff   : > { %v1966_v57 = vrot.slane %v1961_v22, 4  ;;  %v7289_v26 = vrot.slane %v5932_v13, 4  ;;  %v1965_v21 = vperm.slane %v1957_v18, %v5670_v16  ;;  %v1901_v10 = vsel %vm894_vm13, %v4801_v49, %v1900_v15 }
 0x300   : > { %v1910_v34 = vrot.slane %v1905_v4, 4  ;;  %v6089_v6 = vperm.slane %v1237_v17, %v5670_v16  ;;  %v1909_v56 = vperm.slane %v1901_v10, %v5670_v16  ;;  %v7290_v2 = vrot.slane %v5942_v32, 4 }
 0x301   : > { %v1969_v1 = vsel %vm894_vm13, %v1961_v22, %v7289_v26  ;;  %v1967_v20 = vsel %vm894_vm13, %v1966_v57, %v5932_v13  ;;  %v1978_v18 = vrot.slane %v1965_v21, 4  ;;  %v7291_v61 = vrot.slane %v5912_v31, 4 }
 0x302   : > { %v1977_v47 = vperm.slane %v1969_v1, %v5684_v40  ;;  %v1913_v53 = vsel %vm894_vm13, %v1905_v4, %v7290_v2  ;;  %v1973_v26 = vperm.slane %v1967_v20, %v5684_v40  ;;  %v1911_v15 = vsel %vm894_vm13, %v1910_v34, %v5942_v32 }
 0x303   : > { %v1981_v49 = vsel %vm894_vm13, %v1965_v21, %v7291_v61  ;;  %v1922_v13 = vrot.slane %v1909_v56, 4  ;;  %v1614_v17 = vsel %vm894_vm13, %v5758_v41, %v5734_v7  ;;  %v6108_v4 = vsel %vm894_vm13, %v1231_v8, %v1055_v24 }
 0x304   : > { %v1992_v22 = vrot.slane %v1977_v47, 4  ;;  %v1989_v19 = vperm.slane %v1981_v49, %v5684_v40  ;;  %v1243_v57 = vsel %vm894_vm13, %v1242_v3, %v1059_v63  ;;  %v1979_v1 = vsel %vm894_vm13, %v1978_v18, %v5912_v31 }
 0x305   : > { %v1990_v21 = vrot.slane %v1973_v26, 4  ;;  %v1985_v47 = vperm.slane %v1979_v1, %v5684_v40  ;;  %v1921_v32 = vperm.slane %v1913_v53, %v5684_v40  ;;  %v1262_v34 = vrot.slane %v6089_v6, 4 }
 0x306   : > { %v1993_v10 = vsel %vm894_vm13, 0.0, %v1992_v22  ;;  %v1996_v20 = vrot.slane %v1989_v19, 4  ;;  %v1917_v7 = vperm.slane %v1911_v15, %v5684_v40  ;;  %v1923_v41 = vsel %vm894_vm13, %v1922_v13, %v5923_v46 }
 0x307   : > { %v7292_v24 = vrot.slane %v5923_v46, 4  ;;  %v6124_v31 = vperm.slane %v1243_v57, %v5670_v16  ;;  %v1994_v3 = vrot.slane %v1985_v47, 4  ;;  %v2164_v2 = vsel %vm894_vm13, %v1992_v22, %v1973_v26 }
 0x308   : > { %v1997_v8 = vsel %vm894_vm13, 0.0, %v1996_v20  ;;  %v1991_v53 = vsel %vm894_vm13, 0.0, %v1990_v21  ;;  %v2169_v18 = vrot.slane %v1993_v10, 4  ;;  %v1929_v61 = vperm.slane %v1923_v41, %v5684_v40 }
 0x309   : > { %v1925_v63 = vsel %vm894_vm13, %v1909_v56, %v7292_v24  ;;  %v2175_v19 = vsel %vm894_vm13, %v1996_v20, %v1985_v47  ;;  %v2180_v46 = vrot.slane %v1997_v8, 4  ;;  %v1936_v15 = vrot.slane %v1921_v32, 4 }
 0x30a   : > { %v1933_v49 = vperm.slane %v1925_v63, %v5684_v40  ;;  %v7293_v56 = vrot.slane %v5785_v25, 4  ;;  %v1934_v57 = vrot.slane %v1917_v7, 4  ;;  %v1938_v1 = vrot.slane %v1929_v61, 4 }
 0x30b   : > { %v1260_v22 = vrot.slane %v6124_v31, 4  ;;  %v1995_v21 = vsel %vm894_vm13, 0.0, %v1994_v3  ;;  %v1937_v10 = vsel %vm894_vm13, 0.0, %v1936_v15  ;;  %v6143_v47 = vperm.slane %v1614_v17, %v5670_v16 }
 0x30c   : > { %v1620_v13 = vsel %vm894_vm13, %v7293_v56, %v5773_v58  ;;  %v1940_v24 = vrot.slane %v1933_v49, 4  ;;  %v6146_v20 = vperm.slane %v2164_v2, %v5670_v16  ;;  %v6149_v58 = vsel %vm894_vm13, %v2169_v18, %v1991_v53 }
 0x30d   : > { %v6137_v26 = vperm.slane %v1620_v13, %v5670_v16  ;;  %v6152_v25 = vperm.slane %v2175_v19, %v5670_v16  ;;  %v2110_v32 = vsel %vm894_vm13, %v1936_v15, %v1917_v7  ;;  %v2115_v63 = vrot.slane %v1937_v10, 4 }
 0x30e   : > { %v1941_v41 = vsel %vm894_vm13, 0.0, %v1940_v24  ;;  %v6158_v3 = vperm.slane %v5845_v38, %v5670_v16  ;;  %v6162_v8 = vsel %vm894_vm13, %v2180_v46, %v1995_v21  ;;  %v1935_v2 = vsel %vm894_vm13, 0.0, %v1934_v57 }
 0x30f   : > { %v1636_v17 = vrot.slane %v6137_v26, 4  ;;  %v1939_v53 = vsel %vm894_vm13, 0.0, %v1938_v1  ;;  %v6168_v18 = vperm.slane %v5789_v27, %v5670_v16  ;;  %v6171_v7 = vperm.slane %v2110_v32, %v5670_v16 }
 0x310   : > { %v2121_v49 = vsel %vm894_vm13, %v1940_v24, %v1929_v61  ;;  %v1648_v19 = vrot.slane %v6158_v3, 4  ;;  %v2126_v46 = vrot.slane %v1941_v41, 4  ;;  %v1668_v56 = vsel %vm894_vm13, %v5739_v23, %v5723_v44 }
 0x311   : > { %v1637_v38 = vsel %vm894_vm13, %v1636_v17, %v6143_v47  ;;  %v7294_v27 = vrot.slane %v5749_v5, 4  ;;  %v6186_v57 = vsel %vm894_vm13, %v2115_v63, %v1935_v2  ;;  %v6195_v24 = vperm.slane %v5778_v9, %v5670_v16 }
 0x312   : > { %v1643_v15 = vperm.slane %v1637_v38, %v5684_v40  ;;  %v1649_v61 = vsel %vm894_vm13, %v1648_v19, %v6168_v18  ;;  %v6198_v44 = vperm.slane %v2121_v49, %v5670_v16  ;;  %v1638_v23 = vrot.slane %v6143_v47, 4 }
 0x313   : > { %v1674_v13 = vsel %vm894_vm13, %v7294_v27, %v5765_v48  ;;  %v1655_v5 = vperm.slane %v1649_v61, %v5684_v40  ;;  %v1672_v21 = vperm.slane %v1668_v56, %v5670_v16  ;;  %v6205_v10 = vperm.slane %v5769_v55, %v5670_v16 }
 0x314   : > { %v6191_v1 = vperm.slane %v1674_v13, %v5670_v16  ;;  %v1662_v48 = vrot.slane %v1643_v15, 4  ;;  %v1702_v41 = vrot.slane %v6195_v24, 4  ;;  %v1650_v9 = vrot.slane %v6168_v18, 4 }
 0x315   : > { %v1660_v63 = vrot.slane %v1655_v5, 4  ;;  %v7295_v47 = vrot.slane %v5876_v54, 4  ;;  %v6216_v49 = vsel %vm894_vm13, %v2126_v46, %v1939_v53  ;;  %v1118_v54 = vsel %vm894_vm13, %v5856_v39, %v5829_v36 }
 0x316   : > { %v1690_v32 = vrot.slane %v6191_v1, 4  ;;  %v1663_v17 = vsel %vm894_vm13, %v1655_v5, %v1662_v48  ;;  %v1703_v38 = vsel %vm894_vm13, %v1702_v41, %v6205_v10  ;;  %v1152_v48 = vrot.slane %v5905_v28, 4 }
 0x317   : > { %v1124_v2 = vsel %vm894_vm13, %v7295_v47, %v5892_v60  ;;  %v1832_v19 = vpack.c.bf16 %v1663_v17, %v1663_v17  ;;  %v1661_v56 = vsel %vm894_vm13, %v1660_v63, %v1643_v15  ;;  %v1709_v27 = vperm.slane %v1703_v38, %v5684_v40 }
 0x318   : > { %v1691_v55 = vsel %vm894_vm13, %v1690_v32, %v1672_v21  ;;  %v1692_v60 = vrot.slane %v1672_v21, 4  ;;  %v1830_v13 = vpack.c.bf16 %v1661_v56, %v1661_v56  ;;  %v6228_v46 = vperm.slane %v1124_v2, %v5670_v16 }
 0x319   : > { %v1697_v18 = vperm.slane %v1691_v55, %v5684_v40  ;;  %v2380_v53 = vunpack.c.l.b16 %v1832_v19  ;;  %v1714_v61 = vrot.slane %v1709_v27, 4  ;;  %v1172_v15 = vsel %vm894_vm13, %v5833_v0, %v5815_v29 }
 0x31a   : > { %v2349_v32 = vunpack.c.l.b16 %v1830_v13  ;;  %v6235_v41 = vperm.slane %v1118_v54, %v5670_v16  ;;  %v1140_v36 = vrot.slane %v6228_v46, 4  ;;  %v6239_v39 = vperm.slane %v1172_v15, %v5670_v16 }
 0x31b   : > { %v1716_v5 = vrot.slane %v1697_v18, 4  ;;  %v1715_v21 = vsel %vm894_vm13, %v1714_v61, %v1697_v18  ;;  %v1153_v17 = vsel %vm894_vm13, %v1152_v48, %v5881_v12  ;;  %v7296_v47 = vrot.slane %v5849_v14, 4 }
 0x31c   : > { %v1831_v0 = vpack.c.bf16 %v1715_v21, %v1715_v21  ;;  %v1141_v55 = vsel %vm894_vm13, %v1140_v36, %v6235_v41  ;;  %v6252_v38 = vperm.slane %v1153_v17, %v5684_v40  ;;  %v1704_v19 = vrot.slane %v6205_v10, 4 }
 0x31d   : > { %v1717_v63 = vsel %vm894_vm13, %v1709_v27, %v1716_v5  ;;  %v1178_v29 = vsel %vm894_vm13, %v7296_v47, %v5861_v11  ;;  %v6256_v56 = vperm.slane %v1141_v55, %v5684_v40  ;;  %v1206_v14 = vrot.slane %v5887_v45, 4 }
 0x31e   : > { %v1833_v2 = vpack.c.bf16 %v1717_v63, %v1717_v63  ;;  %v6259_v18 = vperm.slane %v1178_v29, %v5670_v16  ;;  %v2350_v27 = vunpack.c.l.b16 %v1831_v0  ;;  %v1142_v54 = vrot.slane %v6235_v41, 4 }
 0x31f   : > { %v1164_v13 = vrot.slane %v6252_v38, 4  ;;  %v1196_v5 = vrot.slane %v6239_v39, 4  ;;  %v1207_v10 = vsel %vm894_vm13, %v1206_v14, %v5839_v33  ;;  %v1639_v48 = vsel %vm894_vm13, %v6137_v26, %v1638_v23 }
 0x320   : > { %v2381_v11 = vunpack.c.l.b16 %v1833_v2  ;;  %v1194_v61 = vrot.slane %v6259_v18, 4  ;;  %v2351_v15 = vpack.c.b16 %v2350_v27, %v2349_v32  ;;  %v6273_v63 = vperm.slane %v1207_v10, %v5684_v40 }
 0x321   : > { %v1165_v21 = vsel %vm894_vm13, %v1164_v13, %v6256_v56  ;;  %v1651_v29 = vsel %vm894_vm13, %v6158_v3, %v1650_v9  ;;  %v1693_v0 = vsel %vm894_vm13, %v6191_v1, %v1692_v60  ;;  %v6288_v55 = vperm.slane %v1639_v48, %v5684_v40 }
 0x322   : > { %v2382_v36 = vpack.c.b16 %v2381_v11, %v2380_v53  ;;  %v1195_v17 = vsel %vm894_vm13, %v1194_v61, %v6239_v39  ;;  %v1334_v47 = vpack.c.bf16 %v1165_v21, %v1165_v21  ;;  %v2357_v26 = vsel %vm2352_vm14, %v2351_v15, 0 }
 0x323   : > { %v6284_v53 = vperm.slane %v1195_v17, %v5684_v40  ;;  %v1218_v32 = vrot.slane %v6273_v63, 4  ;;  %2366 = vmatpush.bf16.xpose.msra.mxu3 %v2357_v26  ;;  %v6291_v14 = vperm.slane %v1651_v29, %v5684_v40  ;;  %v1705_v3 = vsel %vm894_vm13, %v6195_v24, %v1704_v19 }
 0x324   : > { %v2387_v23 = vsel %vm2352_vm14, %v2382_v36, 0  ;;  %v2344_v2 = vunpack.c.l.b16 %v1334_v47  ;;  %v6298_v9 = vperm.slane %v1693_v0, %v5684_v40  ;;  %v6301_v60 = vperm.slane %v1705_v3, %v5684_v40 }
 0x325   : > { %v1219_v1 = vsel %vm894_vm13, %v1218_v32, %v6284_v53  ;;  %v7297_v27 = vrot.slane %v5961_v42, 4  ;;  %v1664_v61 = vrot.slane %v6291_v14, 4  ;;  %v7298_v10 = vrot.slane %v5945_v50, 4  ;;  %v7301_v32 = vld [vmem:[#allocation37_spill] sm:$0xff] }
 0x326   : > { %v1335_v13 = vpack.c.bf16 %v1219_v1, %v1219_v1  ;;  %v1722_v19 = vsel %vm894_vm13, %v5984_v30, %v5961_v42  ;;  %v1718_v48 = vrot.slane %v6301_v60, 4  ;;  %v7299_v36 = vrot.slane %v6030_v43, 4 }
 0x327   : > { %v1551_v11 = vsel %vm894_vm13, 0.0, %v7297_v27  ;;  %v1607_v24 = vsel %vm894_vm13, 0.0, %v7298_v10  ;;  %v1726_v15 = vperm.slane %v1722_v19, %v5670_v16  ;;  %v7300_v17 = vrot.slane %v6013_v62, 4  ;;  %v7302_v62 = vld [vmem:[#allocation32_spill] sm:$0xff] }
 0x328   : > { %v1728_v21 = vsel %vm894_vm13, %v7299_v36, %v1551_v11  ;;  %v2345_v29 = vunpack.c.l.b16 %v1335_v13  ;;  %v1665_v0 = vsel %vm894_vm13, %v1664_v61, %v6288_v55  ;;  %v1719_v42 = vsel %vm894_vm13, %v1718_v48, %v6298_v9  ;;  %v7303_v11 = vld [vmem:[#allocation34_spill] sm:$0xff] }
 0x329   : > { %v1739_v47 = vsel %vm894_vm13, %v7300_v17, %v6006_v37  ;;  %v1732_v26 = vperm.slane %v1728_v21, %v5670_v16  ;;  %v1746_v43 = vrot.slane %v1726_v15, 4  ;;  %v1758_v3 = vrot.slane %v7301_v32, 4 }
 0x32a   : > { %v1743_v30 = vperm.slane %v1739_v47, %v5670_v16  ;;  %v2346_v1 = vpack.c.b16 %v2345_v29, %v2344_v2  ;;  %v1835_v27 = vpack.c.bf16 %v1719_v42, %v1719_v42  ;;  %v1776_v37 = vsel %vm894_vm13, %v7302_v62, %v5945_v50  ;;  %v7305_v47 = vld [vmem:[#allocation35_spill] sm:$0xff] }
 0x32b   : > { %2396 = vmatpush.bf16.xpose.msrb.mxu3 %v2387_v23  ;;  %v1834_v23 = vpack.c.bf16 %v1665_v0, %v1665_v0  ;;  %v7304_v13 = vrot.slane %v7303_v11, 4  ;;  %v1747_v19 = vsel %vm894_vm13, %v1732_v26, %v1746_v43  ;;  %v1780_v48 = vperm.slane %v1776_v37, %v5670_v16 }
 0x32c   : > { %v1759_v36 = vsel %vm894_vm13, %v1743_v30, %v1758_v3  ;;  %4387 = vmatmul.msk.bf16.vlgmr.msra.gmra.mxu3 %vm2352_vm14, %v2346_v1  ;;  %v2411_v21 = vunpack.c.l.b16 %v1835_v27  ;;  %v6340_v2 = vperm.slane %v1747_v19, %v5684_v40  ;;  %v1744_v3 = vrot.slane %v1732_v26, 4 }
 0x32d   : > { %v1782_v61 = vsel %vm894_vm13, %v7304_v13, %v1607_v24  ;;  %v2410_v10 = vunpack.c.l.b16 %v1834_v23  ;;  %v6343_v17 = vperm.slane %v1759_v36, %v5684_v40  ;;  %v7306_v24 = vld [vmem:[#allocation33_spill] sm:$0xff]  ;;  %v1800_v42 = vrot.slane %v1780_v48, 4  ;;  %v7308_v23 = vld [vmem:[#allocation36_spill] sm:$0xff] }
 0x32e   : > { %v1786_v50 = vperm.slane %v1782_v61, %v5670_v16  ;;  %v7307_v29 = vrot.slane %v7306_v24, 4  ;;  %v1812_v43 = vrot.slane %v7308_v23, 4  ;;  %v1166_v1 = vrot.slane %v6256_v56, 4 }
 0x32f   : > { %v2412_v27 = vpack.c.b16 %v2411_v21, %v2410_v10  ;;  %v1772_v62 = vrot.slane %v6343_v17, 4  ;;  %v1745_v13 = vsel %vm894_vm13, %v1744_v3, %v1726_v15  ;;  %v1756_v61 = vrot.slane %v1743_v30, 4 }
 0x330   : > { %v1793_v0 = vsel %vm894_vm13, %v7307_v29, %v7305_v47  ;;  %v1801_v11 = vsel %vm894_vm13, %v1786_v50, %v1800_v42  ;;  %v1798_v19 = vrot.slane %v1786_v50, 4  ;;  %v1751_v24 = vperm.slane %v1745_v13, %v5684_v40 }
 0x331   : > { %v1797_v37 = vperm.slane %v1793_v0, %v5670_v16  ;;  %v2417_v36 = vsel %vm2352_vm14, %v2412_v27, 0  ;;  %v1773_v47 = vsel %vm894_vm13, %v1772_v62, %v6340_v2  ;;  %v6360_v26 = vperm.slane %v1801_v11, %v5684_v40 }
 0x332   : > { %v1842_v21 = vpack.c.bf16 %v1773_v47, %v1773_v47  ;;  %v1757_v15 = vsel %vm894_vm13, %v1756_v61, %v7301_v32  ;;  %v1220_v30 = vrot.slane %v6284_v53, 4  ;;  %v1799_v29 = vsel %vm894_vm13, %v1798_v19, %v1780_v48 }
 0x333   : > { %v1813_v56 = vsel %vm894_vm13, %v1797_v37, %v1812_v43  ;;  %2426 = vmatpush.bf16.xpose.msra.mxu3 %v2417_v36  ;;  %v1763_v50 = vperm.slane %v1757_v15, %v5684_v40  ;;  %v1810_v0 = vrot.slane %v1797_v37, 4  ;;  %v1770_v3 = vrot.slane %v1751_v24, 4 }
 0x334   : > { %v6364_v10 = vperm.slane %v1813_v56, %v5684_v40  ;;  %v2530_v43 = vunpack.c.l.b16 %v1842_v21  ;;  %v1805_v27 = vperm.slane %v1799_v29, %v5684_v40  ;;  %v6378_v32 = vperm.slane %v6108_v4, %v5670_v16 }
 0x335   : > { %v1768_v62 = vrot.slane %v1763_v50, 4  ;;  %v1811_v11 = vsel %vm894_vm13, %v1810_v0, %v7308_v23  ;;  %v1250_v53 = vrot.slane %v6073_v51, 4  ;;  %v1771_v61 = vsel %vm894_vm13, %v1763_v50, %v1770_v3 }
 0x336   : > { %v1826_v42 = vrot.slane %v6364_v10, 4  ;;  %v1817_v37 = vperm.slane %v1811_v11, %v5684_v40  ;;  %v1824_v13 = vrot.slane %v1805_v27, 4  ;;  %v1840_v47 = vpack.c.bf16 %v1771_v61, %v1771_v61 }
 0x337   : > { %v1769_v36 = vsel %vm894_vm13, %v1768_v62, %v1751_v24  ;;  %v1251_v23 = vsel %vm894_vm13, %v6378_v32, %v1250_v53  ;;  %v1774_v4 = vrot.slane %v6340_v2, 4  ;;  %v1263_v50 = vsel %vm894_vm13, %v6124_v31, %v1262_v34  ;;  %v7310_v34 = vld [vmem:[#allocation38_spill] sm:$0xff] }
 0x338   : > { %v1827_v48 = vsel %vm894_vm13, %v1826_v42, %v6360_v26  ;;  %v1822_v56 = vrot.slane %v1817_v37, 4  ;;  %v1838_v21 = vpack.c.bf16 %v1769_v36, %v1769_v36  ;;  %v1825_v15 = vsel %vm894_vm13, %v1817_v37, %v1824_v13 }
 0x339   : > { %v1843_v19 = vpack.c.bf16 %v1827_v48, %v1827_v48  ;;  %v1841_v0 = vpack.c.bf16 %v1825_v15, %v1825_v15  ;;  %v2500_v42 = vunpack.c.l.b16 %v1840_v47  ;;  %v6396_v62 = vperm.slane %v1251_v23, %v5684_v40 }
 0x33a   : > { %v1823_v24 = vsel %vm894_vm13, %v1822_v56, %v1805_v27  ;;  %v2470_v3 = vunpack.c.l.b16 %v1838_v21  ;;  %v6399_v11 = vperm.slane %v1263_v50, %v5684_v40  ;;  %v1290_v13 = vperm.slane %v6066_v59, %v5670_v16 }
 0x33b   : > { %v2531_v29 = vunpack.c.l.b16 %v1843_v19  ;;  %v1839_v48 = vpack.c.bf16 %v1823_v24, %v1823_v24  ;;  %v2501_v37 = vunpack.c.l.b16 %v1841_v0  ;;  %v7309_v19 = vld [vmem:[#allocation39_spill] sm:$0xff]  ;;  %v7311_v47 = vrot.slane %v7310_v34, 4 }
 0x33c   : > { %v1276_v61 = vrot.slane %v6399_v11, 4  ;;  %v1304_v36 = vrot.slane %v7309_v19, 4  ;;  %v1167_v23 = vsel %vm894_vm13, %v6252_v38, %v1166_v1  ;;  %v1221_v0 = vsel %vm894_vm13, %v6273_v63, %v1220_v30 }
 0x33d   : > { %v2532_v53 = vpack.c.b16 %v2531_v29, %v2530_v43  ;;  %v1317_v27 = vsel %vm894_vm13, %v6059_v52, %v7311_v47  ;;  %v2471_v43 = vunpack.c.l.b16 %v1839_v48  ;;  %v2502_v21 = vpack.c.b16 %v2501_v37, %v2500_v42 }
 0x33e   : > { %v6413_v15 = vperm.slane %v1317_v27, %v5684_v40  ;;  %v1277_v59 = vsel %vm894_vm13, %v1276_v61, %v6396_v62  ;;  %v1305_v29 = vsel %vm894_vm13, %v1290_v13, %v1304_v36  ;;  %v1336_v50 = vpack.c.bf16 %v1167_v23, %v1167_v23 }
 0x33f   : > { %v2537_v56 = vsel %vm2352_vm14, %v2532_v53, 0  ;;  %v2472_v24 = vpack.c.b16 %v2471_v43, %v2470_v3  ;;  %v2507_v38 = vsel %vm2352_vm14, %v2502_v21, 0  ;;  %v6422_v1 = vperm.slane %v1305_v29, %v5684_v40 }
 0x340   : > { %2546 = vmatpush.bf16.xpose.msrb.mxu2 %v2537_v56  ;;  %v1330_v42 = vrot.slane %v6413_v15, 4  ;;  %v1346_v53 = vpack.c.bf16 %v1277_v59, %v1277_v59  ;;  %v1337_v48 = vpack.c.bf16 %v1221_v0, %v1221_v0  ;;  %v2375_v37 = vunpack.c.l.b16 %v1336_v50 }
 0x341   : > { %v1666_v47 = vrot.slane %v6288_v55, 4  ;;  %v1828_v61 = vrot.slane %v6360_v26, 4  ;;  %v2477_v36 = vsel %vm2352_vm14, %v2472_v24, 0  ;;  %v1720_v30 = vrot.slane %v6298_v9, 4 }
 0x342   : > { %v1331_v63 = vsel %vm894_vm13, %v1330_v42, %v6422_v1  ;;  %2486 = vmatpush.bf16.xpose.msrb.mxu1 %v2477_v36  ;;  %v2525_v27 = vunpack.c.l.b16 %v1346_v53  ;;  %v2376_v23 = vunpack.c.l.b16 %v1337_v48  ;;  %v1248_v21 = vrot.slane %v6378_v32, 4 }
 0x343   : > { %v1347_v3 = vpack.c.bf16 %v1331_v63, %v1331_v63  ;;  %v1667_v56 = vsel %vm894_vm13, %v6291_v14, %v1666_v47  ;;  %v1721_v55 = vsel %vm894_vm13, %v6301_v60, %v1720_v30  ;;  %v1261_v59 = vsel %vm894_vm13, %v1260_v22, %v6089_v6 }
 0x344   : > { %v1836_v43 = vpack.c.bf16 %v1667_v56, %v1667_v56  ;;  %v2377_v29 = vpack.c.b16 %v2376_v23, %v2375_v37  ;;  %v1837_v0 = vpack.c.bf16 %v1721_v55, %v1721_v55  ;;  %v6441_v50 = vperm.slane %v1261_v59, %v5684_v40 }
 0x345   : > { %v2526_v9 = vunpack.c.l.b16 %v1347_v3  ;;  %v1249_v14 = vsel %vm894_vm13, %v1248_v21, %v6073_v51  ;;  %v1315_v60 = vsel %vm894_vm13, %v1314_v35, %v7310_v34  ;;  %v2120_v52 = vperm.slane %v6186_v57, %v5670_v16 }
 0x346   : > { %v2440_v24 = vunpack.c.l.b16 %v1836_v43  ;;  %4388 = vmatmul.msk.bf16.vlgmr.msrb.gmra.mxu3 %vm2352_vm14, %v2377_v29  ;;  %v2441_v6 = vunpack.c.l.b16 %v1837_v0  ;;  %v6451_v31 = vperm.slane %v1249_v14, %v5684_v40  ;;  %v1272_v22 = vrot.slane %v6441_v50, 4 }
 0x347   : > { %v2527_v32 = vpack.c.b16 %v2526_v9, %v2525_v27  ;;  %v6457_v51 = vperm.slane %v1315_v60, %v5684_v40  ;;  %v2131_v35 = vperm.slane %v6216_v49, %v5670_v16  ;;  %v2134_v47 = vrot.slane %v6171_v7, 4 }
 0x348   : > { %v1273_v34 = vsel %vm894_vm13, %v1272_v22, %v6451_v31  ;;  %v1274_v53 = vrot.slane %v6451_v31, 4  ;;  %v2146_v57 = vrot.slane %v6198_v44, 4  ;;  %v2174_v63 = vperm.slane %v6149_v58, %v5670_v16 }
 0x349   : > { %4393 = vmatmul.msk.bf16.vlgmr.msrb.gmra.mxu2 %vm2352_vm14, %v2527_v32  ;;  %v1342_v37 = vpack.c.bf16 %v1273_v34, %v1273_v34  ;;  %v2185_v30 = vperm.slane %v6162_v8, %v5670_v16  ;;  %v2135_v23 = vsel %vm894_vm13, %v2120_v52, %v2134_v47  ;;  %v2188_v58 = vrot.slane %v6146_v20, 4 }
 0x34a   : > { %2516 = vmatpush.bf16.xpose.msra.mxu1 %v2507_v38  ;;  %v1302_v38 = vrot.slane %v1290_v13, 4  ;;  %v2442_v13 = vpack.c.b16 %v2441_v6, %v2440_v24  ;;  %v2147_v56 = vsel %vm894_vm13, %v2131_v35, %v2146_v57  ;;  %v6484_v43 = vperm.slane %v2135_v23, %v5684_v40 }
 0x34b   : > { %v2465_v27 = vunpack.c.l.b16 %v1342_v37  ;;  %v6487_v21 = vperm.slane %v2147_v56, %v5684_v40  ;;  %v2200_v8 = vrot.slane %v6152_v25, 4  ;;  %v2132_v59 = vrot.slane %v2120_v52, 4 }
 0x34c   : > { %v1303_v42 = vsel %vm894_vm13, %v1302_v38, %v7309_v19  ;;  %v1326_v19 = vrot.slane %v6457_v51, 4  ;;  %v2447_v49 = vsel %vm2352_vm14, %v2442_v13, 0  ;;  %v2144_v9 = vrot.slane %v2131_v35, 4 }
 0x34d   : > { %v6468_v48 = vperm.slane %v1303_v42, %v5684_v40  ;;  %2456 = vmatpush.bf16.xpose.msrb.mxu3 %v2447_v49  ;;  %v2186_v29 = vrot.slane %v2174_v63, 4  ;;  %v2160_v24 = vrot.slane %v6487_v21, 4  ;;  %v2189_v14 = vsel %vm894_vm13, %v2174_v63, %v2188_v58 }
 0x34e   : > { %v2198_v38 = vrot.slane %v2185_v30, 4  ;;  %v6494_v60 = vperm.slane %v2189_v14, %v5684_v40  ;;  %v2201_v32 = vsel %vm894_vm13, %v2185_v30, %v2200_v8  ;;  %v2133_v6 = vsel %vm894_vm13, %v2132_v59, %v6171_v7 }
 0x34f   : > { %v1328_v36 = vrot.slane %v6468_v48, 4  ;;  %v1327_v3 = vsel %vm894_vm13, %v1326_v19, %v6468_v48  ;;  %v2145_v22 = vsel %vm894_vm13, %v2144_v9, %v6198_v44  ;;  %v2161_v52 = vsel %vm894_vm13, %v2160_v24, %v6484_v43 }
 0x350   : > { %v1343_v55 = vpack.c.bf16 %v1327_v3, %v1327_v3  ;;  %v6504_v35 = vperm.slane %v2201_v32, %v5684_v40  ;;  %v2139_v13 = vperm.slane %v2133_v6, %v5684_v40  ;;  %v2330_v34 = vpack.c.bf16 %v2161_v52, %v2161_v52 }
 0x351   : > { %v2151_v19 = vperm.slane %v2145_v22, %v5684_v40  ;;  %v2187_v37 = vsel %vm894_vm13, %v2186_v29, %v6146_v20  ;;  %v2199_v7 = vsel %vm894_vm13, %v2198_v38, %v6152_v25  ;;  %v1143_v3 = vsel %vm894_vm13, %v6228_v46, %v1142_v54 }
 0x352   : > { %v2466_v0 = vunpack.c.l.b16 %v1343_v55  ;;  %v2214_v44 = vrot.slane %v6504_v35, 4  ;;  %v2158_v47 = vrot.slane %v2139_v13, 4  ;;  %v2193_v57 = vperm.slane %v2187_v37, %v5684_v40 }
 0x353   : > { %v2205_v49 = vperm.slane %v2199_v7, %v5684_v40  ;;  %v2839_v63 = vunpack.c.l.b16 %v2330_v34  ;;  %v2156_v30 = vrot.slane %v2151_v19, 4  ;;  %v7312_v20 = vrot.slane %v5881_v12, 4 }
 0x354   : > { %v2467_v42 = vpack.c.b16 %v2466_v0, %v2465_v27  ;;  %v2215_v27 = vsel %vm894_vm13, %v2214_v44, %v6494_v60  ;;  %v2212_v56 = vrot.slane %v2193_v57, 4  ;;  %v2159_v55 = vsel %vm894_vm13, %v2151_v19, %v2158_v47 }
 0x355   : > { %v1155_v25 = vsel %vm894_vm13, %v5905_v28, %v7312_v20  ;;  %v2210_v23 = vrot.slane %v2205_v49, 4  ;;  %v2331_v58 = vpack.c.bf16 %v2215_v27, %v2215_v27  ;;  %v2157_v8 = vsel %vm894_vm13, %v2156_v30, %v2139_v13 }
 0x356   : > { %4391 = vmatmul.msk.bf16.vlgmr.msrb.gmra.mxu1 %vm2352_vm14, %v2467_v42  ;;  %v2328_v59 = vpack.c.bf16 %v2159_v55, %v2159_v55  ;;  %v6529_v41 = vperm.slane %v1143_v3, %v5684_v40  ;;  %v2326_v12 = vpack.c.bf16 %v2157_v8, %v2157_v8  ;;  %v2213_v54 = vsel %vm894_vm13, %v2205_v49, %v2212_v56 }
 0x357   : > { %v2211_v46 = vsel %vm894_vm13, %v2210_v23, %v2193_v57  ;;  %v1163_v28 = vperm.slane %v1155_v25, %v5684_v40  ;;  %v2840_v9 = vunpack.c.l.b16 %v2331_v58  ;;  %v2329_v0 = vpack.c.bf16 %v2213_v54, %v2213_v54 }
 0x358   : > { %v2327_v29 = vpack.c.bf16 %v2211_v46, %v2211_v46  ;;  %v2811_v24 = vunpack.c.l.b16 %v2328_v59  ;;  %v2783_v14 = vunpack.c.l.b16 %v2326_v12  ;;  %v1197_v32 = vsel %vm894_vm13, %v6259_v18, %v1196_v5 }
 0x359   : > { %v1168_v38 = vrot.slane %v1163_v28, 4  ;;  %v7313_v6 = vrot.slane %v5839_v33, 4  ;;  %v2841_v42 = vpack.c.b16 %v2840_v9, %v2839_v63  ;;  %v2812_v13 = vunpack.c.l.b16 %v2329_v0 }
 0x35a   : > { %v2784_v52 = vunpack.c.l.b16 %v2327_v29  ;;  %v1205_v34 = vperm.slane %v1197_v32, %v5684_v40  ;;  %v1275_v39 = vsel %vm894_vm13, %v6441_v50, %v1274_v53  ;;  %v1329_v33 = vsel %vm894_vm13, %v6457_v51, %v1328_v36 }
 0x35b   : > { %v1209_v22 = vsel %vm894_vm13, %v5887_v45, %v7313_v6  ;;  %v1169_v19 = vsel %vm894_vm13, %v1168_v38, %v6529_v41  ;;  %2853 = vmatpush.bf16.msra.mxu2 %v2841_v42  ;;  %v2813_v18 = vpack.c.b16 %v2812_v13, %v2811_v24  ;;  %v1344_v7 = vpack.c.bf16 %v1275_v39, %v1275_v39 }
 0x35c   : > { %v1217_v37 = vperm.slane %v1209_v22, %v5684_v40  ;;  %v2785_v45 = vpack.c.b16 %v2784_v52, %v2783_v14  ;;  %v1338_v5 = vpack.c.bf16 %v1169_v19, %v1169_v19  ;;  %v1345_v47 = vpack.c.bf16 %v1329_v33, %v1329_v33 }
 0x35d   : > { %v1775_v31 = vsel %vm894_vm13, %v6343_v17, %v1774_v4  ;;  %v1829_v50 = vsel %vm894_vm13, %v6364_v10, %v1828_v61  ;;  %2825 = vmatpush.bf16.msrb.mxu1 %v2813_v18  ;;  %v2495_v51 = vunpack.c.l.b16 %v1344_v7  ;;  %v1278_v36 = vrot.slane %v6396_v62, 4 }
 0x35e   : > { %v1222_v44 = vrot.slane %v1217_v37, 4  ;;  %2797 = vmatpush.bf16.msrb.mxu0 %v2785_v45  ;;  %v1844_v53 = vpack.c.bf16 %v1775_v31, %v1775_v31  ;;  %v1845_v48 = vpack.c.bf16 %v1829_v50, %v1829_v50  ;;  %v1332_v57 = vrot.slane %v6422_v1, 4 }
 0x35f   : > { %v2496_v2 = vunpack.c.l.b16 %v1345_v47  ;;  %v2405_v30 = vunpack.c.l.b16 %v1338_v5  ;;  %v1279_v10 = vsel %vm894_vm13, %v6399_v11, %v1278_v36  ;;  %v1170_v1 = vrot.slane %v6529_v41, 4 }
 0x360   : > { %v1223_v49 = vsel %vm894_vm13, %v1222_v44, %v1205_v34  ;;  %v2560_v17 = vunpack.c.l.b16 %v1844_v53  ;;  %v2561_v4 = vunpack.c.l.b16 %v1845_v48  ;;  %v1333_v62 = vsel %vm894_vm13, %v6413_v15, %v1332_v57 }
 0x361   : > { %v1339_v63 = vpack.c.bf16 %v1223_v49, %v1223_v49  ;;  %v2497_v26 = vpack.c.b16 %v2496_v2, %v2495_v51  ;;  %v1224_v25 = vrot.slane %v1205_v34, 4  ;;  %v1348_v27 = vpack.c.bf16 %v1279_v10, %v1279_v10 }
 0x362   : > { %v2562_v20 = vpack.c.b16 %v2561_v4, %v2560_v17  ;;  %v1349_v23 = vpack.c.bf16 %v1333_v62, %v1333_v62  ;;  %v2162_v55 = vrot.slane %v6484_v43, 4  ;;  %v2216_v58 = vrot.slane %v6494_v60, 4 }
 0x363   : > { %v2406_v3 = vunpack.c.l.b16 %v1339_v63  ;;  %v2555_v8 = vunpack.c.l.b16 %v1348_v27  ;;  %v1171_v59 = vsel %vm894_vm13, %v1163_v28, %v1170_v1  ;;  %v1225_v15 = vsel %vm894_vm13, %v1217_v37, %v1224_v25 }
 0x364   : > { %v2567_v56 = vsel %vm2352_vm14, %v2562_v20, 0  ;;  %v2556_v11 = vunpack.c.l.b16 %v1349_v23  ;;  %v2163_v41 = vsel %vm894_vm13, %v6487_v21, %v2162_v55  ;;  %v2217_v12 = vsel %vm894_vm13, %v6504_v35, %v2216_v58 }
 0x365   : > { %v2407_v61 = vpack.c.b16 %v2406_v3, %v2405_v30  ;;  %v1340_v54 = vpack.c.bf16 %v1171_v59, %v1171_v59  ;;  %v1341_v9 = vpack.c.bf16 %v1225_v15, %v1225_v15  ;;  %v2332_v29 = vpack.c.bf16 %v2163_v41, %v2163_v41  ;;  %v6637_v3 = vpop.permute.xlu1 %4804 }
 0x366   : > { %4392 = vmatmul.msk.bf16.vlgmr.msra.gmra.mxu1 %vm2352_vm14, %v2497_v26  ;;  %v2557_v46 = vpack.c.b16 %v2556_v11, %v2555_v8  ;;  %v2333_v43 = vpack.c.bf16 %v2217_v12, %v2217_v12  ;;  %v7314_v26 = vld [vmem:[#allocation31_spill] sm:$0xff] }
 0x367   : > { %4389 = vmatmul.msk.bf16.vlgmr.msra.gmra.mxu3 %vm2352_vm14, %v2407_v61  ;;  %v2435_v0 = vunpack.c.l.b16 %v1340_v54  ;;  %v2436_v60 = vunpack.c.l.b16 %v1341_v9  ;;  %v2867_v24 = vunpack.c.l.b16 %v2332_v29 }
 0x368   : > { %2576 = vmatpush.bf16.xpose.msra.mxu3 %v2567_v56  ;;  %v2868_v14 = vunpack.c.l.b16 %v2333_v43 }
 0x369   : > { %v2437_v38 = vpack.c.b16 %v2436_v60, %v2435_v0 }
 0x36a   : > { %v2869_v32 = vpack.c.b16 %v2868_v14, %v2867_v24 }
 0x377   : > { %4390 = vmatmul.msk.bf16.vlgmr.msrb.gmra.mxu3 %vm2352_vm14, %v2437_v38 }
 0x378   : > { %2881 = vmatpush.bf16.msrb.mxu3 %v2869_v32 }
 0x387   : > { %4394 = vmatmul.msk.bf16.vlgmr.msra.gmra.mxu3 %vm2352_vm14, %v2557_v46 }
 0x3af   : > { %v6583_v21 = vpop.f32.mrf.mxu3 }
 0x3b0   : > { %v2584_v35 = vsel %vm2583_vm15, %v6583_v21, -inf }
 0x3b1   : > { %2585 = vmax.xlane.f32.xlu0 %v2584_v35 }
 0x3b7   : > { %v6587_v28 = vpop.f32.mrf.mxu3 }
 0x3b8   : > { %v2587_v6 = vsel %vm2583_vm15, %v6587_v28, -inf }
 0x3b9   : > { %2588 = vmax.xlane.f32.xlu2 %v2587_v6 }
 0x3c9   : > { %v6599_v34 = vpop.f32.mrf.mxu3 }
 0x3ca   : > { %v2590_v39 = vsel %vm2583_vm15, %v6599_v34, -inf }
 0x3cc   : > { %v6591_v22 = vpop.f32.mrf.mxu2 }
 0x3cd   : > { %v2620_v42 = vsel %vm2583_vm15, %v6591_v22, -inf }
 0x3ce   : > { %2621 = vmax.xlane.f32.xlu2 %v2620_v42 }
 0x3d1   : > { %v2400_v45 = vpop.f32.mrf.mxu3 }
 0x3d2   : > { %v2593_v44 = vsel %vm2583_vm15, %v2400_v45, -inf }
 0x3d3   : > { %v6595_v52 = vpop.f32.mrf.mxu1 }
 0x3d4   : > { %v2608_v13 = vsel %vm2583_vm15, %v6595_v52, -inf  ;;  %v6607_v33 = vpop.f32.mrf.mxu2 }
 0x3d5   : > { %2609 = vmax.xlane.f32.xlu1 %v2608_v13  ;;  %v2623_v7 = vsel %vm2583_vm15, %v6607_v33, -inf }
 0x3db   : > { %v6601_v19 = vpop.f32.mrf.mxu1 }
 0x3dc   : > { %v2611_v37 = vsel %vm2583_vm15, %v6601_v19, -inf }
 0x3dd   : > { %2612 = vmax.xlane.f32.xlu0 %v2611_v37  ;;  %2591 = vmax.xlane.f32.xlu1 %v2590_v39 }
 0x3e3   : > { %v6609_v18 = vpop.f32.mrf.mxu1 }
 0x3e4   : > { %v2614_v5 = vsel %vm2583_vm15, %v6609_v18, -inf }
 0x3e5   : > { %2615 = vmax.xlane.f32.xlu2 %v2614_v5  ;;  %2624 = vmax.xlane.f32.xlu1 %v2623_v7 }
 0x3e6   : > { %2594 = vmax.xlane.f32.xlu0 %v2593_v44 }
 0x3ea   : > { %v2428_v47 = vpop.f32.mrf.mxu3 }
 0x3eb   : > { %v2596_v31 = vsel %vm2583_vm15, %v2428_v47, -inf  ;;  %v6617_v50 = vpop.f32.mrf.mxu1 }
 0x3ec   : > { %v2617_v48 = vsel %vm2583_vm15, %v6617_v50, -inf }
 0x3ed   : > { %2597 = vmax.xlane.f32.xlu1 %v2596_v31 }
 0x3f2   : > { %v2430_v51 = vpop.f32.mrf.mxu3 }
 0x3f3   : > { %v2599_v53 = vsel %vm2583_vm15, %v2430_v51, -inf }
 0x3f4   : > { %2600 = vmax.xlane.f32.xlu0 %v2599_v53 }
 0x3f5   : > { %2618 = vmax.xlane.f32.xlu1 %v2617_v48 }
 0x3fa   : > { %v2458_v36 = vpop.f32.mrf.mxu3 }
 0x3fb   : > { %v2602_v57 = vsel %vm2583_vm15, %v2458_v36, -inf }
 0x3fc   : > { %2603 = vmax.xlane.f32.xlu2 %v2602_v57 }
 0x402   : > { %v6623_v49 = vpop.f32.mrf.mxu3 }
 0x403   : > { %v2605_v2 = vsel %vm2583_vm15, %v6623_v49, -inf }
 0x404   : > { %2606 = vmax.xlane.f32.xlu1 %v2605_v2 }
 0x40a   : > { %v6627_v63 = vpop.f32.mrf.mxu3 }
 0x40b   : > { %v2626_v30 = vsel %vm2583_vm15, %v6627_v63, -inf }
 0x40c   : > { %2627 = vmax.xlane.f32.xlu0 %v2626_v30 }
 0x412   : > { %v6631_v17 = vpop.f32.mrf.mxu3 }
 0x413   : > { %v2629_v4 = vsel %vm2583_vm15, %v6631_v17, -inf }
 0x414   : > { %2630 = vmax.xlane.f32.xlu2 %v2629_v4 }
 0x41d   : > { %4809 = vrot.lane.b32.xlu1 %v7314_v26, %s5252_s24 }
 0x424   : > { %v2586_v20 = vpop.xlane.xlu0 %2585 }
 0x425   : > { %v2632_v11 = vsub.f32 %v6583_v21, %v2586_v20 }
 0x427   : > { %v2648_v41 = vmul.f32 1.442695, %v2632_v11 }
 0x42c   : > { %v2589_v1 = vpop.xlane.xlu2 %2588 }
 0x42d   : > { %v2633_v43 = vsub.f32 %v6587_v28, %v2589_v1 }
 0x42f   : > { %v2650_v24 = vmul.f32 1.442695, %v2633_v43 }
 0x441   : > { %v6641_v55 = vpop.xlane.xlu2 %2621 }
 0x448   : > { %v2610_v10 = vpop.xlane.xlu1 %2609 }
 0x449   : > { %v2640_v21 = vsub.f32 %v6595_v52, %v2610_v10 }
 0x44b   : > { %v2664_v37 = vmul.f32 1.442695, %v2640_v21 }
 0x450   : > { %v6639_v62 = vpop.xlane.xlu0 %2612  ;;  %v2592_v61 = vpop.xlane.xlu1 %2591 }
 0x451   : > { %v2634_v6 = vsub.f32 %v6599_v34, %v2592_v61 }
 0x453   : > { %v2652_v39 = vmul.f32 1.442695, %v2634_v6 }
 0x458   : > { %v2625_v25 = vpop.xlane.xlu1 %2624  ;;  %v2616_v12 = vpop.xlane.xlu2 %2615 }
 0x459   : > { %v2595_v27 = vpop.xlane.xlu0 %2594  ;;  %v2645_v34 = vsub.f32 %v6607_v33, %v2625_v25  ;;  %v2642_v57 = vsub.f32 %v6609_v18, %v2616_v12  ;;  %v2641_v18 = vsub.f32 %v6601_v19, %v6639_v62 }
 0x45a   : > { %v2635_v23 = vsub.f32 %v2400_v45, %v2595_v27 }
 0x45b   : > { %v2674_v31 = vmul.f32 1.442695, %v2645_v34  ;;  %v2668_v20 = vmul.f32 1.442695, %v2642_v57  ;;  %v2666_v25 = vmul.f32 1.442695, %v2641_v18 }
 0x45c   : > { %v2654_v56 = vmul.f32 1.442695, %v2635_v23 }
 0x45e   : > { %4858 = vpow2.f32 %v2654_v56 }
 0x460   : > { %v2598_v58 = vpop.xlane.xlu1 %2597 }
 0x461   : > { %v2636_v8 = vsub.f32 %v2428_v47, %v2598_v58 }
 0x463   : > { %v2656_v59 = vmul.f32 1.442695, %v2636_v8 }
 0x464   : > { %v6644_v15 = vpop.eup %4858 }
 0x465   : > { %4860 = vpow2.f32 %v2656_v59  ;;  %v2689_v46 = vsel %vm2583_vm15, %v6644_v15, 0.0 }
 0x466   : > { %2690 = vadd.xlane.f32.xlu1 %v2689_v46  ;;  %4862 = vpow2.f32 %v2648_v41  ;;  %v2644_v41 = vsub.f32 %v6591_v22, %v6641_v55 }
 0x467   : > { %v2601_v54 = vpop.xlane.xlu0 %2600 }
 0x468   : > { %v2637_v9 = vsub.f32 %v2430_v51, %v2601_v54  ;;  %v2619_v52 = vpop.xlane.xlu1 %2618  ;;  %v2672_v54 = vmul.f32 1.442695, %v2644_v41 }
 0x469   : > { %v2643_v11 = vsub.f32 %v6617_v50, %v2619_v52 }
 0x46a   : > { %v2658_v0 = vmul.f32 1.442695, %v2637_v9 }
 0x46b   : > { %v6648_v29 = vpop.eup %4860  ;;  %v2670_v46 = vmul.f32 1.442695, %v2643_v11 }
 0x46c   : > { %v2692_v60 = vsel %vm2583_vm15, %v6648_v29, 0.0  ;;  %4864 = vpow2.f32 %v2658_v0  ;;  %v6653_v38 = vpop.eup %4862 }
 0x46d   : > { %2693 = vadd.xlane.f32.xlu0 %v2692_v60  ;;  %4866 = vpow2.f32 %v2650_v24  ;;  %v2680_v13 = vsel %vm2583_vm15, %v6653_v38, 0.0 }
 0x46f   : > { %v2604_v14 = vpop.xlane.xlu2 %2603 }
 0x470   : > { %v2638_v32 = vsub.f32 %v2458_v36, %v2604_v14 }
 0x472   : > { %v6656_v35 = vpop.eup %4864  ;;  %v2660_v42 = vmul.f32 1.442695, %v2638_v32 }
 0x473   : > { %v2695_v28 = vsel %vm2583_vm15, %v6656_v35, 0.0  ;;  %v6663_v45 = vpop.eup %4866 }
 0x474   : > { %4868 = vpow2.f32 %v2660_v42  ;;  %2696 = vadd.xlane.f32.xlu2 %v2695_v28  ;;  %v2683_v44 = vsel %vm2583_vm15, %v6663_v45, 0.0  ;;  %v7315_v28 = vld [vmem:[#allocation30_spill] sm:$0xff] }
 0x475   : > { %2681 = vadd.xlane.f32.xlu0 %v2680_v13  ;;  %4870 = vpow2.f32 %v2664_v37  ;;  %v2000_v13 = vrot.slane %v7315_v28, 4  ;;  %v7316_v37 = vld [vmem:[#allocation29_spill] sm:$0xff] }
 0x476   : > { %4872 = vpow2.f32 %v2652_v39  ;;  %v2056_v39 = vrot.slane %v7316_v37, 4 }
 0x477   : > { %v2607_v48 = vpop.xlane.xlu1 %2606  ;;  %4874 = vpow2.f32 %v2674_v31  ;;  %v4807_v31 = vunpack.i.h.bf16 %v6637_v3 }
 0x478   : > { %v2639_v2 = vsub.f32 %v6623_v49, %v2607_v48 }
 0x47a   : > { %v6665_v5 = vpop.eup %4868  ;;  %v2662_v10 = vmul.f32 1.442695, %v2639_v2 }
 0x47b   : > { %v2698_v7 = vsel %vm2583_vm15, %v6665_v5, 0.0  ;;  %v6672_v47 = vpop.eup %4870 }
 0x47c   : > { %2699 = vadd.xlane.f32.xlu1 %v2698_v7  ;;  %v6674_v53 = vpop.eup %4872  ;;  %v2704_v30 = vsel %vm2583_vm15, %v6672_v47, 0.0 }
 0x47d   : > { %2684 = vadd.xlane.f32.xlu0 %v2683_v44  ;;  %v2686_v4 = vsel %vm2583_vm15, %v6674_v53, 0.0  ;;  %v6683_v61 = vpop.eup %4874 }
 0x47e   : > { %v2719_v1 = vsel %vm2583_vm15, %v6683_v61, 0.0 }
 0x47f   : > { %v2628_v51 = vpop.xlane.xlu0 %2627 }
 0x480   : > { %v2646_v36 = vsub.f32 %v6627_v63, %v2628_v51  ;;  %v4806_v51 = vunpack.i.l.bf16 %v6637_v3 }
 0x482   : > { %v2676_v33 = vmul.f32 1.442695, %v2646_v36 }
 0x484   : > { %4876 = vpow2.f32 %v2676_v33  ;;  %2705 = vadd.xlane.f32.xlu1 %v2704_v30 }
 0x485   : > { %2687 = vadd.xlane.f32.xlu0 %v2686_v4  ;;  %4878 = vpow2.f32 %v2668_v20  ;;  %v2068_v20 = vrot.slane %v4807_v31, 4 }
 0x486   : > { %4880 = vpow2.f32 %v2662_v10  ;;  %v2012_v10 = vrot.slane %v4806_v51, 4 }
 0x487   : > { %v2631_v23 = vpop.xlane.xlu2 %2630  ;;  %4882 = vpow2.f32 %v2666_v25 }
 0x488   : > { %v2647_v19 = vsub.f32 %v6631_v17, %v2631_v23 }
 0x48a   : > { %v6685_v63 = vpop.eup %4876  ;;  %v2678_v58 = vmul.f32 1.442695, %v2647_v19 }
 0x48b   : > { %v2722_v49 = vsel %vm2583_vm15, %v6685_v63, 0.0  ;;  %v6695_v27 = vpop.eup %4878 }
 0x48c   : > { %2723 = vadd.xlane.f32.xlu1 %v2722_v49  ;;  %4814 = vrot.lane.b32.xlu2 %v7314_v26, %s5251_s20  ;;  %v6697_v56 = vpop.eup %4880  ;;  %v2710_v62 = vsel %vm2583_vm15, %v6695_v27, 0.0  ;;  %4884 = vpow2.f32 %v2678_v58 }
 0x48d   : > { %2720 = vadd.xlane.f32.xlu0 %v2719_v1  ;;  %v2701_v26 = vsel %vm2583_vm15, %v6697_v56, 0.0  ;;  %v6704_v8 = vpop.eup %4882  ;;  %4886 = vpow2.f32 %v2670_v46 }
 0x48e   : > { %v2707_v59 = vsel %vm2583_vm15, %v6704_v8, 0.0  ;;  %4888 = vpow2.f32 %v2672_v54 }
 0x48f   : > { %v4810_v22 = vpop.permute.xlu1 %4809 }
 0x490   : > { %v4812_v60 = vunpack.i.h.bf16 %v4810_v22  ;;  %v4811_v24 = vunpack.i.l.bf16 %v4810_v22 }
 0x492   : > { %v6709_v17 = vpop.eup %4884  ;;  %v2054_v14 = vrot.slane %v4812_v60, 4  ;;  %v1998_v52 = vrot.slane %v4811_v24, 4  ;;  %v2057_v7 = vsel %vm894_vm13, %v4812_v60, %v2056_v39  ;;  %v2001_v44 = vsel %vm894_vm13, %v4811_v24, %v2000_v13 }
 0x493   : > { %v2725_v12 = vsel %vm2583_vm15, %v6709_v17, 0.0  ;;  %v6715_v9 = vpop.eup %4886  ;;  %v2065_v57 = vperm.slane %v2057_v7, %v5670_v16  ;;  %v2009_v2 = vperm.slane %v2001_v44, %v5670_v16 }
 0x494   : > { %2711 = vadd.xlane.f32.xlu1 %v2710_v62  ;;  %v2713_v50 = vsel %vm2583_vm15, %v6715_v9, 0.0  ;;  %v6719_v43 = vpop.eup %4888  ;;  %v2055_v34 = vsel %vm894_vm13, %v2054_v14, %v7316_v37  ;;  %v1999_v33 = vsel %vm894_vm13, %v1998_v52, %v7315_v28 }
 0x495   : > { %2702 = vadd.xlane.f32.xlu0 %v2701_v26  ;;  %v2716_v0 = vsel %vm2583_vm15, %v6719_v43, 0.0  ;;  %v2061_v36 = vperm.slane %v2055_v34, %v5670_v16  ;;  %v2005_v3 = vperm.slane %v1999_v33, %v5670_v16  ;;  %v2092_v62 = vrot.slane %v2065_v57, 4 }
 0x496   : > { %v2036_v26 = vrot.slane %v2009_v2, 4 }
 0x497   : > { %v2080_v19 = vrot.slane %v2061_v36, 4 }
 0x49d   : > { %2708 = vadd.xlane.f32.xlu0 %v2707_v59 }
 0x4a5   : > { %2726 = vadd.xlane.f32.xlu0 %v2725_v12 }
 0x4ad   : > { %2714 = vadd.xlane.f32.xlu0 %v2713_v50 }
 0x4b5   : > { %2717 = vadd.xlane.f32.xlu2 %v2716_v0  ;;  %v2024_v0 = vrot.slane %v2005_v3, 4 }
 0x4d9   : > { %v2691_v32 = vpop.xlane.xlu1 %2690 }
 0x4e0   : > { %v2694_v55 = vpop.xlane.xlu0 %2693 }
 0x4e1   : > { %4890 = vrcp.f32 %v2694_v55 }
 0x4e7   : > { %v2697_v21 = vpop.xlane.xlu2 %2696  ;;  %v4891_v42 = vpop.eup %4890 }
 0x4e8   : > { %v2682_v6 = vpop.xlane.xlu0 %2681  ;;  %4892 = vrcp.f32 %v2697_v21  ;;  %v2748_v48 = vmul.f32 %v4891_v42, %v6648_v29 }
 0x4e9   : > { %4894 = vrcp.f32 %v2691_v32 }
 0x4ea   : > { %v2764_v18 = vpack.c.bf16 %v2748_v48, %v2748_v48  ;;  %4896 = vrcp.f32 %v2682_v6 }
 0x4ec   : > { %v2834_v12 = vunpack.c.l.b16 %v2764_v18 }
 0x4ee   : > { %v4893_v30 = vpop.eup %4892 }
 0x4ef   : > { %v4895_v4 = vpop.eup %4894  ;;  %v2749_v49 = vmul.f32 %v4893_v30, %v6656_v35  ;;  %v4815_v1 = vpop.permute.xlu2 %4814 }
 0x4f0   : > { %v4817_v29 = vunpack.i.h.bf16 %v4815_v1  ;;  %v4816_v25 = vunpack.i.l.bf16 %v4815_v1  ;;  %v2685_v23 = vpop.xlane.xlu0 %2684  ;;  %v6740_v11 = vmul.f32 %v4895_v4, %v6644_v15  ;;  %v4897_v21 = vpop.eup %4896 }
 0x4f1   : > { %v2765_v58 = vpack.c.bf16 %v2749_v49, %v2749_v49  ;;  %4898 = vrcp.f32 %v2685_v23  ;;  %v2744_v48 = vmul.f32 %v4897_v21, %v6653_v38 }
 0x4f2   : > { %v2066_v59 = vrot.slane %v4817_v29, 4  ;;  %v2069_v46 = vsel %vm894_vm13, %v4817_v29, %v2068_v20  ;;  %v2010_v41 = vrot.slane %v4816_v25, 4  ;;  %v2013_v50 = vsel %vm894_vm13, %v4816_v25, %v2012_v10  ;;  %v2700_v20 = vpop.xlane.xlu1 %2699 }
 0x4f3   : > { %v2835_v35 = vunpack.c.l.b16 %v2765_v58  ;;  %v2077_v54 = vperm.slane %v2069_v46, %v5670_v16  ;;  %v2021_v60 = vperm.slane %v2013_v50, %v5670_v16  ;;  %v2763_v6 = vpack.c.bf16 %v6740_v11, %v6740_v11 }
 0x4f4   : > { %v2067_v22 = vsel %vm894_vm13, %v2066_v59, %v4807_v31  ;;  %v2011_v55 = vsel %vm894_vm13, %v2010_v41, %v4806_v51  ;;  %v2760_v58 = vpack.c.bf16 %v2744_v48, %v2744_v48  ;;  %4900 = vrcp.f32 %v2700_v20 }
 0x4f5   : > { %v2836_v24 = vpack.c.b16 %v2835_v35, %v2834_v12  ;;  %v2073_v15 = vperm.slane %v2067_v22, %v5670_v16  ;;  %v2090_v14 = vrot.slane %v2077_v54, 4  ;;  %v2093_v32 = vsel %vm894_vm13, %v2077_v54, %v2092_v62 }
 0x4f6   : > { %v2101_v42 = vperm.slane %v2093_v32, %v5684_v40  ;;  %v2017_v28 = vperm.slane %v2011_v55, %v5670_v16  ;;  %v2034_v52 = vrot.slane %v2021_v60, 4  ;;  %v2037_v4 = vsel %vm894_vm13, %v2021_v60, %v2036_v26 }
 0x4f7   : > { %v2078_v13 = vrot.slane %v2073_v15, 4  ;;  %v2081_v37 = vsel %vm894_vm13, %v2073_v15, %v2080_v19  ;;  %v2091_v39 = vsel %vm894_vm13, %v2090_v14, %v2065_v57  ;;  %4397 = vmatmul.msk.bf16.vlgmr.msra.gmra.mxu2 %vm2583_vm15, %v2836_v24  ;;  %v4899_v23 = vpop.eup %4898  ;;  %v2045_v50 = vperm.slane %v2037_v4, %v5684_v40 }
 0x4f8   : > { %v2089_v34 = vperm.slane %v2081_v37, %v5684_v40  ;;  %v2097_v7 = vperm.slane %v2091_v39, %v5684_v40  ;;  %v2108_v44 = vrot.slane %v2101_v42, 4  ;;  %v2022_v31 = vrot.slane %v2017_v28, 4  ;;  %v2688_v51 = vpop.xlane.xlu0 %2687 }
 0x4f9   : > { %v2079_v33 = vsel %vm894_vm13, %v2078_v13, %v2061_v36  ;;  %v2025_v30 = vsel %vm894_vm13, %v2017_v28, %v2024_v0  ;;  %v2035_v38 = vsel %vm894_vm13, %v2034_v52, %v2009_v2  ;;  %v2745_v0 = vmul.f32 %v4899_v23, %v6663_v45 }
 0x4fa   : > { %v2085_v57 = vperm.slane %v2079_v33, %v5684_v40  ;;  %v2104_v10 = vrot.slane %v2089_v34, 4  ;;  %v2106_v18 = vrot.slane %v2097_v7, 4  ;;  %v2109_v49 = vsel %vm894_vm13, 0.0, %v2108_v44  ;;  %v4901_v37 = vpop.eup %4900  ;;  %v2706_v33 = vpop.xlane.xlu1 %2705 }
 0x4fb   : > { %v2283_v1 = vsel %vm894_vm13, %v2108_v44, %v2097_v7  ;;  %v2288_v29 = vrot.slane %v2109_v49, 4  ;;  %v2023_v25 = vsel %vm894_vm13, %v2022_v31, %v2005_v3  ;;  %v2033_v12 = vperm.slane %v2025_v30, %v5684_v40 }
 0x4fc   : > { %v2102_v36 = vrot.slane %v2085_v57, 4  ;;  %v2105_v19 = vsel %vm894_vm13, 0.0, %v2104_v10  ;;  %v2107_v62 = vsel %vm894_vm13, 0.0, %v2106_v18  ;;  %v2272_v26 = vsel %vm894_vm13, %v2104_v10, %v2085_v57 }
 0x4fd   : > { %v6772_v59 = vperm.slane %v2283_v1, %v5670_v16  ;;  %v2289_v46 = vsel %vm894_vm13, %v2288_v29, %v2107_v62  ;;  %v6776_v41 = vperm.slane %v2272_v26, %v5670_v16  ;;  %v2277_v3 = vrot.slane %v2105_v19, 4 }
 0x4fe   : > { %v2029_v2 = vperm.slane %v2023_v25, %v5684_v40  ;;  %v2103_v35 = vsel %vm894_vm13, 0.0, %v2102_v36  ;;  %v2041_v54 = vperm.slane %v2035_v38, %v5684_v40  ;;  %v6785_v22 = vperm.slane %v2289_v46, %v5670_v16 }
 0x4ff   : > { %v2308_v55 = vrot.slane %v6772_v59, 4  ;;  %v2048_v24 = vrot.slane %v2033_v12, 4  ;;  %v2052_v32 = vrot.slane %v2045_v50, 4  ;;  %v2761_v21 = vpack.c.bf16 %v2745_v0, %v2745_v0 }
 0x500   : > { %v2046_v60 = vrot.slane %v2029_v2, 4  ;;  %v6788_v15 = vpop.xlane.xlu0 %2720  ;;  %v2050_v14 = vrot.slane %v2041_v54, 4  ;;  %4902 = vrcp.f32 %v2688_v51  ;;  %v2278_v45 = vsel %vm894_vm13, %v2277_v3, %v2103_v35 }
 0x501   : > { %v2049_v28 = vsel %vm894_vm13, 0.0, %v2048_v24  ;;  %v2218_v13 = vsel %vm894_vm13, %v2048_v24, %v2029_v2  ;;  %v2053_v52 = vsel %vm894_vm13, 0.0, %v2052_v32  ;;  %v2778_v44 = vunpack.c.l.b16 %v2760_v58 }
 0x502   : > { %v2047_v42 = vsel %vm894_vm13, 0.0, %v2046_v60  ;;  %v2051_v39 = vsel %vm894_vm13, 0.0, %v2050_v14  ;;  %v2222_v34 = vperm.slane %v2218_v13, %v5670_v16  ;;  %v2223_v7 = vrot.slane %v2049_v28, 4 }
 0x503   : > { %v2229_v31 = vsel %vm894_vm13, %v2052_v32, %v2041_v54  ;;  %v2234_v51 = vrot.slane %v2053_v52, 4  ;;  %v2779_v48 = vunpack.c.l.b16 %v2761_v21  ;;  %v2282_v57 = vperm.slane %v2278_v45, %v5670_v16  ;;  %v2724_v21 = vpop.xlane.xlu1 %2723 }
 0x504   : > { %v2233_v30 = vperm.slane %v2229_v31, %v5670_v16  ;;  %v2224_v4 = vsel %vm894_vm13, %v2223_v7, %v2047_v42  ;;  %v2242_v20 = vrot.slane %v2222_v34, 4  ;;  %v2296_v1 = vrot.slane %v6776_v41, 4 }
 0x505   : > { %v2235_v10 = vsel %vm894_vm13, %v2234_v51, %v2051_v39  ;;  %v2780_v18 = vpack.c.b16 %v2779_v48, %v2778_v44  ;;  %v2228_v49 = vperm.slane %v2224_v4, %v5670_v16  ;;  %v2750_v25 = vmul.f32 %v4901_v37, %v6665_v5 }
 0x506   : > { %v4903_v29 = vpop.eup %4902  ;;  %v2239_v38 = vperm.slane %v2235_v10, %v5670_v16  ;;  %v2254_v23 = vrot.slane %v2233_v30, 4  ;;  %v2309_v36 = vsel %vm894_vm13, %v6785_v22, %v2308_v55  ;;  %v2297_v58 = vsel %vm894_vm13, %v2282_v57, %v2296_v1 }
 0x507   : > { %v2746_v19 = vmul.f32 %v4903_v29, %v6674_v53  ;;  %4395 = vmatmul.msk.bf16.vlgmr.msrb.gmra.mxu0 %vm2583_vm15, %v2780_v18  ;;  %v2243_v26 = vsel %vm894_vm13, %v2228_v49, %v2242_v20  ;;  %v2305_v5 = vperm.slane %v2297_v58, %v5684_v40  ;;  %v2317_v2 = vperm.slane %v2309_v36, %v5684_v40 }
 0x508   : > { %v2703_v62 = vpop.xlane.xlu0 %2702  ;;  %v2255_v3 = vsel %vm894_vm13, %v2239_v38, %v2254_v23  ;;  %v2807_v12 = vunpack.c.l.b16 %v2763_v6  ;;  %v2766_v53 = vpack.c.bf16 %v2750_v25, %v2750_v25  ;;  %v2251_v35 = vperm.slane %v2243_v26, %v5684_v40 }
 0x509   : > { %4904 = vrcp.f32 %v2703_v62  ;;  %v2762_v46 = vpack.c.bf16 %v2746_v19, %v2746_v19  ;;  %v2263_v54 = vperm.slane %v2255_v3, %v5684_v40  ;;  %v2322_v0 = vrot.slane %v2317_v2, 4 }
 0x50a   : > { %v2240_v55 = vrot.slane %v2228_v49, 4  ;;  %v2252_v60 = vrot.slane %v2239_v38, 4  ;;  %v2294_v14 = vrot.slane %v2282_v57, 4  ;;  %v2862_v13 = vunpack.c.l.b16 %v2766_v53 }
 0x50b   : > { %v2806_v50 = vunpack.c.l.b16 %v2762_v46  ;;  %v2268_v24 = vrot.slane %v2263_v54, 4  ;;  %v2323_v42 = vsel %vm894_vm13, %v2322_v0, %v2305_v5  ;;  %4906 = vrcp.f32 %v2706_v33  ;;  %v2712_v3 = vpop.xlane.xlu1 %2711 }
 0x50c   : > { %v2241_v28 = vsel %vm894_vm13, %v2240_v55, %v2222_v34  ;;  %v2253_v11 = vsel %vm894_vm13, %v2252_v60, %v2233_v30  ;;  %v2339_v37 = vpack.c.bf16 %v2323_v42, %v2323_v42  ;;  %v2295_v34 = vsel %vm894_vm13, %v2294_v14, %v6776_v41 }
 0x50d   : > { %v2808_v32 = vpack.c.b16 %v2807_v12, %v2806_v50  ;;  %v2269_v45 = vsel %vm894_vm13, %v2268_v24, %v2251_v35  ;;  %v2247_v7 = vperm.slane %v2241_v28, %v5684_v40  ;;  %v2259_v44 = vperm.slane %v2253_v11, %v5684_v40 }
 0x50e   : > { %v2338_v52 = vpack.c.bf16 %v2269_v45, %v2269_v45  ;;  %v2952_v51 = vunpack.c.l.b16 %v2339_v37  ;;  %v2306_v48 = vrot.slane %v6785_v22, 4  ;;  %4908 = vrcp.f32 %v2724_v21 }
 0x50f   : > { %v4905_v6 = vpop.eup %4904  ;;  %4396 = vmatmul.msk.bf16.vlgmr.msrb.gmra.mxu1 %vm2583_vm15, %v2808_v32  ;;  %v2264_v20 = vrot.slane %v2259_v44, 4  ;;  %v2301_v57 = vperm.slane %v2295_v34, %v5684_v40  ;;  %v2270_v10 = vrot.slane %v2251_v35, 4  ;;  %v2324_v18 = vrot.slane %v2305_v5, 4 }
 0x510   : > { %v2751_v39 = vmul.f32 %v4905_v6, %v6697_v56  ;;  %v2709_v31 = vpop.xlane.xlu0 %2708  ;;  %v2951_v4 = vunpack.c.l.b16 %v2338_v52  ;;  %v2307_v56 = vsel %vm894_vm13, %v2306_v48, %v6772_v59  ;;  %v2266_v38 = vrot.slane %v2247_v7, 4 }
 0x511   : > { %v2265_v33 = vsel %vm894_vm13, %v2264_v20, %v2247_v7  ;;  %v2313_v29 = vperm.slane %v2307_v56, %v5684_v40  ;;  %v2271_v22 = vsel %vm894_vm13, %v2263_v54, %v2270_v10  ;;  %v2325_v25 = vsel %vm894_vm13, %v2317_v2, %v2324_v18  ;;  %v4907_v59 = vpop.eup %4906 }
 0x512   : > { %v2767_v30 = vpack.c.bf16 %v2751_v39, %v2751_v39  ;;  %v2953_v1 = vpack.c.b16 %v2952_v51, %v2951_v4  ;;  %v2334_v41 = vpack.c.bf16 %v2265_v33, %v2265_v33  ;;  %v2340_v19 = vpack.c.bf16 %v2271_v22, %v2271_v22 }
 0x513   : > { %v2318_v36 = vrot.slane %v2313_v29, 4  ;;  %v2341_v62 = vpack.c.bf16 %v2325_v25, %v2325_v25  ;;  %v2267_v26 = vsel %vm894_vm13, %v2259_v44, %v2266_v38  ;;  %v2320_v58 = vrot.slane %v2301_v57, 4 }
 0x514   : > { %v2863_v49 = vunpack.c.l.b16 %v2767_v30  ;;  %2965 = vmatpush.bf16.msrb.mxu2 %v2953_v1  ;;  %4910 = vrcp.f32 %v2709_v31  ;;  %v4909_v46 = vpop.eup %4908  ;;  %v2979_v12 = vunpack.c.l.b16 %v2340_v19  ;;  %v2336_v35 = vpack.c.bf16 %v2267_v26, %v2267_v26 }
 0x515   : > { %v2319_v5 = vsel %vm894_vm13, %v2318_v36, %v2301_v57  ;;  %v2980_v53 = vunpack.c.l.b16 %v2341_v62  ;;  %v2895_v50 = vunpack.c.l.b16 %v2334_v41  ;;  %v2321_v0 = vsel %vm894_vm13, %v2313_v29, %v2320_v58 }
 0x516   : > { %v2864_v23 = vpack.c.b16 %v2863_v49, %v2862_v13  ;;  %v2335_v54 = vpack.c.bf16 %v2319_v5, %v2319_v5  ;;  %v2752_v55 = vmul.f32 %v4907_v59, %v6672_v47  ;;  %v2337_v24 = vpack.c.bf16 %v2321_v0, %v2321_v0 }
 0x517   : > { %v2981_v60 = vpack.c.b16 %v2980_v53, %v2979_v12  ;;  %v2923_v14 = vunpack.c.l.b16 %v2336_v35  ;;  %v2758_v21 = vmul.f32 %v4909_v46, %v6685_v63 }
 0x518   : > { %4398 = vmatmul.msk.bf16.vlgmr.msrb.gmra.mxu3 %vm2583_vm15, %v2864_v23  ;;  %v2727_v2 = vpop.xlane.xlu0 %2726  ;;  %v2896_v32 = vunpack.c.l.b16 %v2335_v54  ;;  %v2924_v42 = vunpack.c.l.b16 %v2337_v24  ;;  %v2768_v6 = vpack.c.bf16 %v2752_v55, %v2752_v55 }
 0x519   : > { %4912 = vrcp.f32 %v2727_v2  ;;  %2993 = vmatpush.bf16.msra.mxu3 %v2981_v60  ;;  %v2774_v39 = vpack.c.bf16 %v2758_v21, %v2758_v21 }
 0x51a   : > { %4914 = vrcp.f32 %v2712_v3  ;;  %v4911_v28 = vpop.eup %4910  ;;  %v2897_v11 = vpack.c.b16 %v2896_v32, %v2895_v50  ;;  %v2925_v13 = vpack.c.b16 %v2924_v42, %v2923_v14  ;;  %v2890_v31 = vunpack.c.l.b16 %v2768_v6 }
 0x51b   : > { %v2753_v45 = vmul.f32 %v4911_v28, %v6704_v8  ;;  %v2974_v34 = vunpack.c.l.b16 %v2774_v39 }
 0x51c   : > { %2909 = vmatpush.bf16.msra.mxu0 %v2897_v11  ;;  %2937 = vmatpush.bf16.msra.mxu1 %v2925_v13 }
 0x51d   : > { %v2769_v47 = vpack.c.bf16 %v2753_v45, %v2753_v45 }
 0x51f   : > { %v4913_v37 = vpop.eup %4912  ;;  %v2891_v63 = vunpack.c.l.b16 %v2769_v47 }
 0x520   : > { %v2759_v52 = vmul.f32 %v4913_v37, %v6709_v17  ;;  %v2715_v7 = vpop.xlane.xlu0 %2714  ;;  %v4915_v44 = vpop.eup %4914 }
 0x521   : > { %4916 = vrcp.f32 %v2715_v7  ;;  %v2754_v48 = vmul.f32 %v4915_v44, %v6695_v27  ;;  %v2892_v30 = vpack.c.b16 %v2891_v63, %v2890_v31 }
 0x522   : > { %v2775_v51 = vpack.c.bf16 %v2759_v52, %v2759_v52  ;;  %4918 = vrcp.f32 %v6788_v15 }
 0x523   : > { %4399 = vmatmul.msk.bf16.vlgmr.msra.gmra.mxu0 %vm2583_vm15, %v2892_v30  ;;  %v2770_v57 = vpack.c.bf16 %v2754_v48, %v2754_v48 }
 0x524   : > { %v2975_v8 = vunpack.c.l.b16 %v2775_v51 }
 0x525   : > { %v2918_v49 = vunpack.c.l.b16 %v2770_v57 }
 0x526   : > { %v2976_v4 = vpack.c.b16 %v2975_v8, %v2974_v34 }
 0x527   : > { %v4917_v20 = vpop.eup %4916 }
 0x528   : > { %v2755_v17 = vmul.f32 %v4917_v20, %v6715_v9  ;;  %v2718_v56 = vpop.xlane.xlu2 %2717  ;;  %4402 = vmatmul.msk.bf16.vlgmr.msra.gmra.mxu3 %vm2583_vm15, %v2976_v4  ;;  %v4919_v10 = vpop.eup %4918 }
 0x529   : > { %4920 = vrcp.f32 %v2718_v56  ;;  %v2757_v15 = vmul.f32 %v4919_v10, %v6683_v61 }
 0x52a   : > { %v2771_v18 = vpack.c.bf16 %v2755_v17, %v2755_v17 }
 0x52b   : > { %v2773_v29 = vpack.c.bf16 %v2757_v15, %v2757_v15 }
 0x52c   : > { %v2919_v1 = vunpack.c.l.b16 %v2771_v18 }
 0x52d   : > { %v2947_v25 = vunpack.c.l.b16 %v2773_v29 }
 0x52e   : > { %v2920_v27 = vpack.c.b16 %v2919_v1, %v2918_v49 }
 0x52f   : > { %v4921_v33 = vpop.eup %4920 }
 0x530   : > { %v2756_v41 = vmul.f32 %v4921_v33, %v6719_v43  ;;  %4400 = vmatmul.msk.bf16.vlgmr.msra.gmra.mxu1 %vm2583_vm15, %v2920_v27 }
 0x532   : > { %v2772_v22 = vpack.c.bf16 %v2756_v41, %v2756_v41 }
 0x534   : > { %v2946_v9 = vunpack.c.l.b16 %v2772_v22 }
 0x536   : > { %v2948_v38 = vpack.c.b16 %v2947_v25, %v2946_v9 }
 0x538   : > { %4401 = vmatmul.msk.bf16.vlgmr.msrb.gmra.mxu2 %vm2583_vm15, %v2948_v38 }
 0x57a   : > { %v2855_v36 = vpop.f32.mrf.mxu2 }
 0x57b   : > { %v3000_v62 = vrot.slane %v2855_v36, 4 }
 0x582   : > { %v2857_v5 = vpop.f32.mrf.mxu2 }
 0x583   : > { %v3056_v0 = vrot.slane %v2857_v5, 4 }
 0x584   : > { %v2799_v23 = vpop.f32.mrf.mxu0 }
 0x585   : > { %v3002_v19 = vrot.slane %v2799_v23, 4  ;;  %v3001_v26 = vsel %vm894_vm13, %v3000_v62, %v2799_v23 }
 0x586   : > { %v3007_v3 = vperm.slane %v3001_v26, %v5670_v16 }
 0x587   : > { %v3003_v61 = vsel %vm894_vm13, %v2855_v36, %v3002_v19 }
 0x588   : > { %v3011_v58 = vperm.slane %v3003_v61, %v5670_v16  ;;  %v3026_v60 = vrot.slane %v3007_v3, 4 }
 0x58a   : > { %v3038_v54 = vrot.slane %v3011_v58, 4 }
 0x58c   : > { %v2827_v59 = vpop.f32.mrf.mxu1  ;;  %v2801_v43 = vpop.f32.mrf.mxu0 }
 0x58d   : > { %v3014_v46 = vrot.slane %v2827_v59, 4  ;;  %v3058_v53 = vrot.slane %v2801_v43, 4  ;;  %v3057_v21 = vsel %vm894_vm13, %v3056_v0, %v2801_v43 }
 0x58e   : > { %v3063_v52 = vperm.slane %v3057_v21, %v5670_v16 }
 0x58f   : > { %v3059_v42 = vsel %vm894_vm13, %v2857_v5, %v3058_v53 }
 0x590   : > { %v3067_v7 = vperm.slane %v3059_v42, %v5670_v16  ;;  %v3082_v10 = vrot.slane %v3063_v52, 4 }
 0x592   : > { %v3094_v1 = vrot.slane %v3067_v7, 4 }
 0x594   : > { %v2829_v45 = vpop.f32.mrf.mxu1 }
 0x595   : > { %v3070_v30 = vrot.slane %v2829_v45, 4 }
 0x59b   : > { %v2883_v12 = vpop.f32.mrf.mxu3 }
 0x59c   : > { %v3012_v35 = vrot.slane %v2883_v12, 4  ;;  %v3015_v2 = vsel %vm894_vm13, %v2883_v12, %v3014_v46 }
 0x59d   : > { %v3023_v50 = vperm.slane %v3015_v2, %v5670_v16 }
 0x59e   : > { %v3013_v55 = vsel %vm894_vm13, %v3012_v35, %v2827_v59 }
 0x59f   : > { %v3019_v24 = vperm.slane %v3013_v55, %v5670_v16  ;;  %v3036_v14 = vrot.slane %v3023_v50, 4  ;;  %v3039_v32 = vsel %vm894_vm13, %v3023_v50, %v3038_v54 }
 0x5a0   : > { %v3047_v28 = vperm.slane %v3039_v32, %v5684_v40 }
 0x5a1   : > { %v3024_v11 = vrot.slane %v3019_v24, 4  ;;  %v3027_v6 = vsel %vm894_vm13, %v3019_v24, %v3026_v60  ;;  %v3037_v13 = vsel %vm894_vm13, %v3036_v14, %v3011_v58 }
 0x5a2   : > { %v3035_v37 = vperm.slane %v3027_v6, %v5684_v40  ;;  %v3043_v39 = vperm.slane %v3037_v13, %v5684_v40  ;;  %v3054_v47 = vrot.slane %v3047_v28, 4 }
 0x5a3   : > { %v3025_v44 = vsel %vm894_vm13, %v3024_v11, %v3007_v3  ;;  %v2885_v31 = vpop.f32.mrf.mxu3 }
 0x5a4   : > { %v3031_v63 = vperm.slane %v3025_v44, %v5684_v40  ;;  %v3050_v51 = vrot.slane %v3035_v37, 4  ;;  %v3052_v34 = vrot.slane %v3043_v39, 4  ;;  %v3055_v48 = vsel %vm894_vm13, 0.0, %v3054_v47 }
 0x5a5   : > { %v3235_v8 = vsel %vm894_vm13, %v3054_v47, %v3043_v39  ;;  %v3068_v4 = vrot.slane %v2885_v31, 4  ;;  %v3240_v56 = vrot.slane %v3055_v48, 4  ;;  %v3071_v27 = vsel %vm894_vm13, %v2885_v31, %v3070_v30 }
 0x5a6   : > { %v3048_v20 = vrot.slane %v3031_v63, 4  ;;  %v3051_v57 = vsel %vm894_vm13, 0.0, %v3050_v51  ;;  %v3224_v17 = vsel %vm894_vm13, %v3050_v51, %v3031_v63  ;;  %v3053_v18 = vsel %vm894_vm13, 0.0, %v3052_v34  ;;  %v2911_v34 = vpop.f32.mrf.mxu0 }
 0x5a7   : > { %v3229_v15 = vrot.slane %v3051_v57, 4  ;;  %v3069_v49 = vsel %vm894_vm13, %v3068_v4, %v2829_v45  ;;  %v6885_v41 = vperm.slane %v3235_v8, %v5670_v16  ;;  %v3079_v22 = vperm.slane %v3071_v27, %v5670_v16 }
 0x5a8   : > { %v3075_v33 = vperm.slane %v3069_v49, %v5670_v16  ;;  %v3049_v29 = vsel %vm894_vm13, 0.0, %v3048_v20  ;;  %v3228_v25 = vperm.slane %v3224_v17, %v5670_v16  ;;  %v3241_v38 = vsel %vm894_vm13, %v3240_v56, %v3053_v18 }
 0x5a9   : > { %v3230_v9 = vsel %vm894_vm13, %v3229_v15, %v3049_v29  ;;  %v3092_v61 = vrot.slane %v3079_v22, 4  ;;  %v3095_v59 = vsel %vm894_vm13, %v3079_v22, %v3094_v1  ;;  %v6900_v2 = vperm.slane %v3241_v38, %v5670_v16 }
 0x5aa   : > { %v3080_v23 = vrot.slane %v3075_v33, 4  ;;  %v3083_v36 = vsel %vm894_vm13, %v3075_v33, %v3082_v10  ;;  %v3234_v19 = vperm.slane %v3230_v9, %v5670_v16  ;;  %v3248_v58 = vrot.slane %v3228_v25, 4 }
 0x5ab   : > { %v3091_v62 = vperm.slane %v3083_v36, %v5684_v40  ;;  %v2995_v26 = vpop.f32.mrf.mxu3  ;;  %v3103_v46 = vperm.slane %v3095_v59, %v5684_v40  ;;  %v3093_v5 = vsel %vm894_vm13, %v3092_v61, %v3067_v7  ;;  %v3260_v55 = vrot.slane %v6885_v41, 4 }
 0x5ac   : > { %v3081_v43 = vsel %vm894_vm13, %v3080_v23, %v3063_v52  ;;  %v3124_v53 = vrot.slane %v2995_v26, 4  ;;  %v3099_v54 = vperm.slane %v3093_v5, %v5684_v40  ;;  %v3249_v14 = vsel %vm894_vm13, %v3234_v19, %v3248_v58 }
 0x5ad   : > { %v3087_v3 = vperm.slane %v3081_v43, %v5684_v40  ;;  %v3106_v12 = vrot.slane %v3091_v62, 4  ;;  %v2939_v35 = vpop.f32.mrf.mxu1  ;;  %v3110_v50 = vrot.slane %v3103_v46, 4  ;;  %v3257_v52 = vperm.slane %v3249_v14, %v5684_v40 }
 0x5ae   : > { %v3126_v0 = vrot.slane %v2939_v35, 4  ;;  %v3108_v32 = vrot.slane %v3099_v54, 4  ;;  %v3125_v45 = vsel %vm894_vm13, %v3124_v53, %v2939_v35  ;;  %v3261_v63 = vsel %vm894_vm13, %v6900_v2, %v3260_v55 }
 0x5af   : > { %v3104_v60 = vrot.slane %v3087_v3, 4  ;;  %v3107_v24 = vsel %vm894_vm13, 0.0, %v3106_v12  ;;  %v3111_v21 = vsel %vm894_vm13, 0.0, %v3110_v50  ;;  %v3278_v42 = vsel %vm894_vm13, %v3106_v12, %v3087_v3 }
 0x5b0   : > { %v3289_v28 = vsel %vm894_vm13, %v3110_v50, %v3099_v54  ;;  %v3283_v11 = vrot.slane %v3107_v24, 4  ;;  %v3294_v13 = vrot.slane %v3111_v21, 4  ;;  %v3109_v37 = vsel %vm894_vm13, 0.0, %v3108_v32 }
 0x5b1   : > { %v3293_v6 = vperm.slane %v3289_v28, %v5670_v16  ;;  %v3127_v39 = vsel %vm894_vm13, %v2995_v26, %v3126_v0  ;;  %v3105_v47 = vsel %vm894_vm13, 0.0, %v3104_v60  ;;  %v3282_v51 = vperm.slane %v3278_v42, %v5670_v16 }
 0x5b2   : > { %v3295_v7 = vsel %vm894_vm13, %v3294_v13, %v3109_v37  ;;  %v6921_v30 = vperm.slane %v3125_v45, %v5670_v16  ;;  %v3269_v4 = vperm.slane %v3261_v63, %v5684_v40  ;;  %v3135_v20 = vperm.slane %v3127_v39, %v5670_v16  ;;  %v2913_v13 = vpop.f32.mrf.mxu0 }
 0x5b3   : > { %v3314_v44 = vrot.slane %v3293_v6, 4  ;;  %v2997_v31 = vpop.f32.mrf.mxu3  ;;  %v3299_v48 = vperm.slane %v3295_v7, %v5670_v16  ;;  %v3284_v17 = vsel %vm894_vm13, %v3283_v11, %v3105_v47  ;;  %v3302_v56 = vrot.slane %v3282_v51, 4 }
 0x5b4   : > { %v3180_v8 = vrot.slane %v2997_v31, 4  ;;  %v3246_v10 = vrot.slane %v3234_v19, 4  ;;  %v3288_v18 = vperm.slane %v3284_v17, %v5670_v16  ;;  %v3276_v15 = vrot.slane %v3257_v52, 4 }
 0x5b5   : > { %v2941_v57 = vpop.f32.mrf.mxu1  ;;  %v3114_v49 = vrot.slane %v2911_v34, 4  ;;  %v3274_v27 = vrot.slane %v3269_v4, 4  ;;  %v3315_v33 = vsel %vm894_vm13, %v3299_v48, %v3314_v44  ;;  %v3258_v38 = vrot.slane %v6900_v2, 4 }
 0x5b6   : > { %v3181_v1 = vsel %vm894_vm13, %v3180_v8, %v2941_v57  ;;  %v3303_v29 = vsel %vm894_vm13, %v3288_v18, %v3302_v56  ;;  %v3323_v22 = vperm.slane %v3315_v33, %v5684_v40  ;;  %v3247_v9 = vsel %vm894_vm13, %v3246_v10, %v3228_v25 }
 0x5b7   : > { %v3136_v23 = vrot.slane %v6921_v30, 4  ;;  %v3148_v36 = vrot.slane %v3135_v20, 4  ;;  %v3182_v19 = vrot.slane %v2941_v57, 4  ;;  %v3311_v62 = vperm.slane %v3303_v29, %v5684_v40 }
 0x5b8   : > { %v6936_v61 = vperm.slane %v3181_v1, %v5670_v16  ;;  %v3328_v59 = vrot.slane %v3323_v22, 4  ;;  %v3277_v26 = vsel %vm894_vm13, %v3269_v4, %v3276_v15  ;;  %v3300_v58 = vrot.slane %v3288_v18, 4 }
 0x5b9   : > { %v3275_v43 = vsel %vm894_vm13, %v3274_v27, %v3257_v52  ;;  %v3330_v3 = vrot.slane %v3311_v62, 4  ;;  %v6941_v25 = vperm.slane %v3247_v9, %v5684_v40  ;;  %v3312_v5 = vrot.slane %v3299_v48, 4 }
 0x5ba   : > { %v3329_v12 = vsel %vm894_vm13, %v3328_v59, %v3311_v62  ;;  %v3301_v2 = vsel %vm894_vm13, %v3300_v58, %v3282_v51  ;;  %v3183_v54 = vsel %vm894_vm13, %v2997_v31, %v3182_v19  ;;  %v3259_v14 = vsel %vm894_vm13, %v3258_v38, %v6885_v41 }
 0x5bb   : > { %v2967_v46 = vpop.f32.mrf.mxu2  ;;  %v4823_v50 = vpack.i.bf16 %v3329_v12, %v3275_v43  ;;  %v3331_v55 = vsel %vm894_vm13, %v3323_v22, %v3330_v3  ;;  %v6953_v32 = vperm.slane %v3301_v2, %v5684_v40  ;;  %v3313_v11 = vsel %vm894_vm13, %v3312_v5, %v3293_v6 }
 0x5bc   : > { %v3112_v53 = vrot.slane %v2967_v46, 4  ;;  %v3115_v35 = vsel %vm894_vm13, %v2967_v46, %v3114_v49  ;;  %v4828_v24 = vpack.i.bf16 %v3331_v55, %v3277_v26  ;;  %v3191_v45 = vperm.slane %v3183_v54, %v5670_v16 }
 0x5bd   : > { %v3123_v0 = vperm.slane %v3115_v35, %v5670_v16  ;;  %4824 = vrot.lane.b32.xlu0 %v4823_v50, %s5252_s24  ;;  %v3272_v41 = vrot.slane %v6941_v25, 4  ;;  %v3326_v39 = vrot.slane %v6953_v32, 4  ;;  %v6967_v44 = vperm.slane %v3313_v11, %v5684_v40 }
 0x5be   : > { %v3113_v60 = vsel %vm894_vm13, %v3112_v53, %v2911_v34  ;;  %4829 = vrot.lane.b32.xlu2 %v4828_v24, %s5253_s27  ;;  %v6972_v51 = vperm.slane %v3259_v14, %v5684_v40  ;;  %v3170_v34 = vrot.slane %v2913_v13, 4  ;;  %v3192_v48 = vrot.slane %v6936_v61, 4 }
 0x5bf   : > { %v3119_v21 = vperm.slane %v3113_v60, %v5670_v16  ;;  %v3149_v42 = vsel %vm894_vm13, %v3148_v36, %v3123_v0  ;;  %v3150_v28 = vrot.slane %v3123_v0, 4  ;;  %v3327_v4 = vsel %vm894_vm13, %v6967_v44, %v3326_v39 }
 0x5c0   : > { %v3155_v37 = vperm.slane %v3149_v42, %v5684_v40  ;;  %v3273_v10 = vsel %vm894_vm13, %v6972_v51, %v3272_v41  ;;  %v3204_v18 = vrot.slane %v3191_v45, 4 }
 0x5c1   : > { %v3137_v47 = vsel %vm894_vm13, %v3136_v23, %v3119_v21  ;;  %v3138_v52 = vrot.slane %v3119_v21, 4  ;;  %v3151_v7 = vsel %vm894_vm13, %v3135_v20, %v3150_v28  ;;  %v4818_v15 = vpack.i.bf16 %v3327_v4, %v3273_v10 }
 0x5c2   : > { %v3143_v6 = vperm.slane %v3137_v47, %v5684_v40  ;;  %v3159_v31 = vperm.slane %v3151_v7, %v5684_v40  ;;  %v3164_v63 = vrot.slane %v3155_v37, 4 }
 0x5c3   : > { %v3139_v8 = vsel %vm894_vm13, %v6921_v30, %v3138_v52  ;;  %v2969_v20 = vpop.f32.mrf.mxu2  ;;  %4819 = vrot.lane.b32.xlu1 %v4818_v15, %s5251_s20 }
 0x5c4   : > { %v3147_v57 = vperm.slane %v3139_v8, %v5684_v40  ;;  %v3160_v17 = vrot.slane %v3143_v6, 4  ;;  %v3166_v56 = vrot.slane %v3159_v31, 4  ;;  %v3168_v49 = vrot.slane %v2969_v20, 4 }
 0x5c5   : > { %v3171_v1 = vsel %vm894_vm13, %v2969_v20, %v3170_v34  ;;  %v3165_v33 = vsel %vm894_vm13, 0.0, %v3164_v63 }
 0x5c6   : > { %v3162_v27 = vrot.slane %v3147_v57, 4  ;;  %v3167_v30 = vsel %vm894_vm13, 0.0, %v3166_v56  ;;  %v3343_v29 = vsel %vm894_vm13, %v3166_v56, %v3155_v37  ;;  %v3169_v38 = vsel %vm894_vm13, %v3168_v49, %v2913_v13 }
 0x5c7   : > { %v6987_v22 = vperm.slane %v3343_v29, %v5670_v16  ;;  %v3348_v9 = vrot.slane %v3167_v30, 4  ;;  %v3179_v23 = vperm.slane %v3171_v1, %v5670_v16  ;;  %v3161_v36 = vsel %vm894_vm13, 0.0, %v3160_v17 }
 0x5c8   : > { %v3163_v19 = vsel %vm894_vm13, 0.0, %v3162_v27  ;;  %v3332_v62 = vsel %vm894_vm13, %v3162_v27, %v3143_v6  ;;  %v3175_v59 = vperm.slane %v3169_v38, %v5670_v16 }
 0x5c9   : > { %v3337_v26 = vrot.slane %v3163_v19, 4  ;;  %v3349_v58 = vsel %vm894_vm13, %v3348_v9, %v3165_v33  ;;  %v3368_v43 = vrot.slane %v6987_v22, 4  ;;  %v3205_v46 = vsel %vm894_vm13, %v3204_v18, %v3179_v23 }
 0x5ca   : > { %v3353_v3 = vperm.slane %v3349_v58, %v5670_v16  ;;  %v3193_v5 = vsel %vm894_vm13, %v3192_v48, %v3175_v59  ;;  %v3194_v12 = vrot.slane %v3175_v59, 4  ;;  %v3206_v53 = vrot.slane %v3179_v23, 4 }
 0x5cb   : > { %v3199_v35 = vperm.slane %v3193_v5, %v5684_v40  ;;  %v3211_v2 = vperm.slane %v3205_v46, %v5684_v40  ;;  %v3338_v54 = vsel %vm894_vm13, %v3337_v26, %v3161_v36  ;;  %v3336_v55 = vperm.slane %v3332_v62, %v5670_v16 }
 0x5cc   : > { %v3195_v50 = vsel %vm894_vm13, %v6936_v61, %v3194_v12  ;;  %v3207_v0 = vsel %vm894_vm13, %v3191_v45, %v3206_v53  ;;  %v3342_v60 = vperm.slane %v3338_v54, %v5670_v16  ;;  %v3369_v42 = vsel %vm894_vm13, %v3353_v3, %v3368_v43 }
 0x5cd   : > { %v3203_v24 = vperm.slane %v3195_v50, %v5684_v40  ;;  %v3215_v14 = vperm.slane %v3207_v0, %v5684_v40  ;;  %v3216_v21 = vrot.slane %v3199_v35, 4  ;;  %v3220_v11 = vrot.slane %v3211_v2, 4 }
 0x5ce   : > { %v3354_v37 = vrot.slane %v3342_v60, 4  ;;  %v3356_v41 = vrot.slane %v3336_v55, 4  ;;  %v3377_v31 = vperm.slane %v3369_v42, %v5684_v40  ;;  %v3366_v17 = vrot.slane %v3353_v3, 4  ;;  %v4597_v42 = vld [vmem:[%s5497_s11 + $0x10] sm:$0xff] }
 0x5cf   : > { %v3218_v28 = vrot.slane %v3203_v24, 4  ;;  %v3222_v13 = vrot.slane %v3215_v14, 4  ;;  %v3217_v63 = vsel %vm894_vm13, 0.0, %v3216_v21  ;;  %v3221_v34 = vsel %vm894_vm13, 0.0, %v3220_v11  ;;  %v4600_v24 = vld [vmem:[%s5497_s11 + $0x28] sm:$0xff]  ;;  %v4599_v14 = vld [vmem:[%s5497_s11 + $0x20] sm:$0xff] }
 0x5d0   : > { %v3355_v8 = vsel %vm894_vm13, %v3354_v37, %v3336_v55  ;;  %v3357_v10 = vsel %vm894_vm13, %v3342_v60, %v3356_v41  ;;  %v3382_v49 = vrot.slane %v3377_v31, 4  ;;  %v4602_v55 = vld [vmem:[%s5497_s11 + $0x38] sm:$0xff]  ;;  %v4601_v60 = vld [vmem:[%s5497_s11 + $0x30] sm:$0xff]  ;;  %v4595_v11 = vld [vmem:[%s5497_s11] sm:$0xff]  ;;  %v3324_v37 = vrot.slane %v6967_v44, 4 }
 0x5d1   : > { %v3219_v61 = vsel %vm894_vm13, 0.0, %v3218_v28  ;;  %v3223_v45 = vsel %vm894_vm13, 0.0, %v3222_v13  ;;  %v3386_v39 = vsel %vm894_vm13, %v3218_v28, %v3199_v35  ;;  %v3397_v47 = vsel %vm894_vm13, %v3222_v13, %v3211_v2  ;;  %3568 = vmatpush.bf16.msrb.mxu0 %v4602_v55  ;;  %v4598_v21 = vld [vmem:[%s5497_s11 + $0x18] sm:$0xff]  ;;  %v4596_v28 = vld [vmem:[%s5497_s11 + $0x8] sm:$0xff]  ;;  %s5257_s11 = smov 8  }
 0x5d2   : > { %v3391_v52 = vrot.slane %v3219_v61, 4  ;;  %v3401_v7 = vperm.slane %v3397_v47, %v5670_v16  ;;  %v3402_v6 = vrot.slane %v3223_v45, 4  ;;  %v3390_v48 = vperm.slane %v3386_v39, %v5670_v16 }
 0x5d3   : > { %v7028_v1 = vperm.slane %v3355_v8, %v5684_v40  ;;  %v3365_v9 = vperm.slane %v3357_v10, %v5684_v40  ;;  %v3270_v13 = vrot.slane %v6972_v51, 4 }
 0x5d4   : > { %v3403_v4 = vsel %vm894_vm13, %v3402_v6, %v3221_v34  ;;  %v3422_v20 = vrot.slane %v3401_v7, 4  ;;  %v3392_v57 = vsel %vm894_vm13, %v3391_v52, %v3217_v63  ;;  %v3410_v15 = vrot.slane %v3390_v48, 4 }
 0x5d5   : > { %v3407_v56 = vperm.slane %v3403_v4, %v5670_v16  ;;  %v3396_v18 = vperm.slane %v3392_v57, %v5670_v16  ;;  %v3367_v16 = vsel %vm894_vm13, %v3366_v17, %v6987_v22  ;;  %v3380_v59 = vrot.slane %v7028_v1, 4  ;;  %3569 = vmatpush.bf16.msrb.mxu0 %v4601_v60 }
 0x5d6   : > { %v7044_v58 = vperm.slane %v3367_v16, %v5684_v40  ;;  %v3383_v43 = vsel %vm894_vm13, %v3382_v49, %v3365_v9  ;;  %v3271_v39 = vsel %vm894_vm13, %v3270_v13, %v6941_v25 }
 0x5d7   : > { %v3411_v27 = vsel %vm894_vm13, %v3396_v18, %v3410_v15  ;;  %v3423_v33 = vsel %vm894_vm13, %v3407_v56, %v3422_v20  ;;  %v3408_v30 = vrot.slane %v3396_v18, 4  ;;  %v3420_v29 = vrot.slane %v3407_v56, 4 }
 0x5d8   : > { %v3419_v38 = vperm.slane %v3411_v27, %v5684_v40  ;;  %v3431_v23 = vperm.slane %v3423_v33, %v5684_v40  ;;  %v3381_v12 = vsel %vm894_vm13, %v7044_v58, %v3380_v59  ;;  %v7090_v59 = vld [vmem:[%s5482_s29] sm:$0xff] }
 0x5d9   : > { %v3409_v36 = vsel %vm894_vm13, %v3408_v30, %v3390_v48  ;;  %v3421_v19 = vsel %vm894_vm13, %v3420_v29, %v3401_v7  ;;  %3570 = vmatpush.bf16.msrb.mxu0 %v4600_v24 }
 0x5da   : > { %v3436_v62 = vrot.slane %v3431_v23, 4  ;;  %v7041_v26 = vperm.slane %v3409_v36, %v5684_v40  ;;  %v3427_v22 = vperm.slane %v3421_v19, %v5684_v40  ;;  %v3438_v2 = vrot.slane %v3419_v38, 4 }
 0x5db   : > { %v3384_v40 = vrot.slane %v3365_v9, 4 }
 0x5dc   : > { %v3437_v46 = vsel %vm894_vm13, %v3436_v62, %v3419_v38  ;;  %v3434_v3 = vrot.slane %v7041_v26, 4  ;;  %v3439_v54 = vsel %vm894_vm13, %v3431_v23, %v3438_v2  ;;  %v3432_v17 = vrot.slane %v3427_v22, 4  ;;  %v4949_v2 = vld [vmem:[#allocation14 + $0x10] sm:$0xff] }
 0x5dd   : > { %v4833_v5 = vpack.i.bf16 %v3437_v46, %v3383_v43  ;;  %v3385_v50 = vsel %vm894_vm13, %v3377_v31, %v3384_v40  ;;  %3571 = vmatpush.bf16.msrb.mxu0 %v4599_v14  ;;  %v3325_v31 = vsel %vm894_vm13, %v3324_v37, %v6953_v32  ;;  %v3378_v32 = vrot.slane %v7044_v58, 4  ;;  %v4947_v43 = vld [vmem:[#allocation14] sm:$0xff] }
 0x5de   : > { %v3435_v53 = vsel %vm894_vm13, %v3427_v22, %v3434_v3  ;;  %v4843_v0 = vpack.i.bf16 %v3439_v54, %v3385_v50  ;;  %v3433_v49 = vsel %vm894_vm13, %v3432_v17, %v7041_v26  ;;  %v3591_v26 = vperm.slane %v7090_v59, 4  ;;  %v7317_v14 = vld [vmem:[#allocation28_spill] sm:$0xff]  ;;  %v4487_v17 = vld [vmem:[%s5503_s19 + $0x68] sm:$0xf0] }
 0x5df   : > { %4834 = vrot.lane.b32.xlu0 %v4833_v5, %s5252_s24  ;;  %v4838_v35 = vpack.i.bf16 %v3435_v53, %v3381_v12  ;;  %v3379_v15 = vsel %vm894_vm13, %v3378_v32, %v7028_v1  ;;  %v4948_v5 = vld [vmem:[#allocation14 + $0x8] sm:$0xff] }
 0x5e1   : > { %4839 = vrot.lane.b32.xlu1 %v4838_v35, %s5251_s20  ;;  %3572 = vmatpush.bf16.msrb.mxu0 %v4598_v21 }
 0x5e5   : > { %3573 = vmatpush.bf16.msrb.mxu0 %v4597_v42 }
 0x5e9   : > { %4844 = vrot.lane.b32.xlu1 %v4843_v0, %s5253_s27  ;;  %3574 = vmatpush.bf16.msrb.mxu0 %v4596_v28  ;;  %v4950_v0 = vld [vmem:[#allocation14 + $0x18] sm:$0xff] }
 0x5ed   : > { %3575 = vmatpush.bf16.msrb.mxu0 %v4595_v11 }
 0x618   : > { %v4830_v61 = vpop.permute.xlu2 %4829 }
 0x619   : > { %v4832_v63 = vunpack.i.h.bf16 %v4830_v61  ;;  %v4831_v34 = vunpack.i.l.bf16 %v4830_v61 }
 0x62f   : > { %v4825_v41 = vpop.permute.xlu0 %4824 }
 0x630   : > { %v4827_v7 = vunpack.i.h.bf16 %v4825_v41  ;;  %v4826_v6 = vunpack.i.l.bf16 %v4825_v41 }
 0x635   : > { %v4820_v45 = vpop.permute.xlu1 %4819 }
 0x636   : > { %v4822_v47 = vunpack.i.h.bf16 %v4820_v45  ;;  %v4821_v52 = vunpack.i.l.bf16 %v4820_v45 }
 0x638   : > { %v3488_v51 = vsel %vm2352_vm14, %v3271_v39, %v4821_v52  ;;  %v3489_v44 = vsel %vm2352_vm14, %v3325_v31, %v4822_v47 }
 0x639   : > { %v3493_v48 = vsel %vm3492_vm0, %v3488_v51, %v4826_v6  ;;  %v3494_v8 = vsel %vm3492_vm0, %v3489_v44, %v4827_v7  ;;  %v4617_v51 = vld [vmem:[%s5503_s19 + $0x74] sm:$0xf] }
 0x63a   : > { %v3498_v25 = vsel %vm3497_vm1, %v3493_v48, %v4831_v34  ;;  %v3499_v4 = vsel %vm3497_vm1, %v3494_v8, %v4832_v63  ;;  %v4493_v63 = vld [vmem:[%s5503_s19 + $0x70] sm:$0xf]  ;;  %v4618_v34 = vld [vmem:[%s5503_s19 + $0x74] sm:$0xf0]  ;;  %v4495_v48 = vld [vmem:[%s5503_s19 + $0x78] sm:$0xf0] }
 0x63b   : > { %v3502_v20 = vpack.c.bf16 %v3499_v4, %v3498_v25  ;;  %v4494_v44 = vor.u32 %v4618_v34, %v4493_v63  ;;  %v4498_v8 = vor.u32 %v4617_v51, %v4495_v48  ;;  %v4485_v25 = vld [vmem:[%s5503_s19 + $0x60] sm:$0xf]  ;;  %v4616_v4 = vld [vmem:[%s5503_s19 + $0x64] sm:$0xf0]  ;;  %v4603_v48 = vld [vmem:[%s5503_s19 + $0x4] sm:$0xf] }
 0x63c   : > { %v4486_v32 = vor.u32 %v4616_v4, %v4485_v25  ;;  %v4437_v63 = vld [vmem:[%s5503_s19] sm:$0xf]  ;;  %v4604_v34 = vld [vmem:[%s5503_s19 + $0x4] sm:$0xf0] }
 0x63d   : > { %3576 = vmatmul.bf16.vlgmr.msrb.gmra.mxu0 %v3502_v20  ;;  %3790 = vmatpush.bf16.msrb.mxu1 %v4494_v44  ;;  %v4615_v20 = vld [vmem:[%s5503_s19 + $0x64] sm:$0xf]  ;;  %v4438_v4 = vor.u32 %v4604_v34, %v4437_v63 }
 0x63e   : > { %3809 = vmatpush.bf16.msra.mxu2 %v4498_v8  ;;  %v4439_v8 = vld [vmem:[%s5503_s19 + $0x8] sm:$0xf0]  ;;  %v4631_v34 = vld [vmem:[%s5505_s30 + $0x60] sm:$0xff] }
 0x641   : > { %3791 = vmatpush.bf16.msrb.mxu1 %v4486_v32 }
 0x651   : > { %v4835_v18 = vpop.permute.xlu0 %4834 }
 0x652   : > { %v4837_v30 = vunpack.i.h.bf16 %v4835_v18  ;;  %v4836_v29 = vunpack.i.l.bf16 %v4835_v18 }
 0x653   : > { %v4840_v57 = vpop.permute.xlu1 %4839 }
 0x654   : > { %v4842_v56 = vunpack.i.h.bf16 %v4840_v57  ;;  %v4841_v10 = vunpack.i.l.bf16 %v4840_v57 }
 0x656   : > { %v3490_v27 = vsel %vm2352_vm14, %v3379_v15, %v4841_v10  ;;  %v3491_v33 = vsel %vm2352_vm14, %v3433_v49, %v4842_v56  ;;  %v4477_v56 = vld [vmem:[%s5503_s19 + $0x50] sm:$0xf]  ;;  %v4614_v10 = vld [vmem:[%s5503_s19 + $0x54] sm:$0xf0]  ;;  %v4490_v15 = vor.u32 %v4615_v20, %v4487_v17  ;;  %v4613_v49 = vld [vmem:[%s5503_s19 + $0x54] sm:$0xf]  ;;  %v4442_v20 = vor.u32 %v4603_v48, %v4439_v8 }
 0x657   : > { %v3495_v16 = vsel %vm3492_vm0, %v3490_v27, %v4836_v29  ;;  %v3496_v36 = vsel %vm3492_vm0, %v3491_v33, %v4837_v30  ;;  %v4479_v27 = vld [vmem:[%s5503_s19 + $0x58] sm:$0xf0]  ;;  %v4478_v33 = vor.u32 %v4614_v10, %v4477_v56  ;;  %v3676_v10 = vperm.slane %v7090_v59, 2 }
 0x658   : > { %3810 = vmatpush.bf16.msra.mxu2 %v4490_v15  ;;  %v4482_v29 = vor.u32 %v4613_v49, %v4479_v27  ;;  %v4630_v8 = vld [vmem:[%s5505_s30 + $0x58] sm:$0xff] }
 0x659   : > { %3792 = vmatpush.bf16.msrb.mxu1 %v4478_v33  ;;  %v3681_v33 = vperm.slane %v7090_v59, 3 }
 0x65b   : > { %v4845_v9 = vpop.permute.xlu1 %4844 }
 0x65c   : > { %v4847_v38 = vunpack.i.h.bf16 %v4845_v9  ;;  %v4846_v23 = vunpack.i.l.bf16 %v4845_v9  ;;  %v4469_v9 = vld [vmem:[%s5503_s19 + $0x40] sm:$0xf]  ;;  %3811 = vmatpush.bf16.msra.mxu2 %v4482_v29 }
 0x65e   : > { %v3500_v19 = vsel %vm3497_vm1, %v3495_v16, %v4846_v23  ;;  %v3501_v1 = vsel %vm3497_vm1, %v3496_v36, %v4847_v38  ;;  %v4612_v38 = vld [vmem:[%s5503_s19 + $0x44] sm:$0xf0]  ;;  %v4611_v23 = vld [vmem:[%s5503_s19 + $0x44] sm:$0xf]  ;;  %v4471_v16 = vld [vmem:[%s5503_s19 + $0x48] sm:$0xf0] }
 0x65f   : > { %v3503_v62 = vpack.c.bf16 %v3501_v1, %v3500_v19  ;;  %v4470_v36 = vor.u32 %v4612_v38, %v4469_v9  ;;  %v4474_v19 = vor.u32 %v4611_v23, %v4471_v16  ;;  %v4461_v1 = vld [vmem:[%s5503_s19 + $0x30] sm:$0xf] }
 0x661   : > { %3581 = vmatmul.bf16.gmra.mxu0 %v3503_v62  ;;  %v4610_v62 = vld [vmem:[%s5503_s19 + $0x34] sm:$0xf0]  ;;  %3793 = vmatpush.bf16.msrb.mxu1 %v4470_v36 }
 0x662   : > { %3812 = vmatpush.bf16.msra.mxu2 %v4474_v19 }
 0x6ba   : > { %v3577_v58 = vpop.f32.mrf.mxu0 }
 0x6bb   : > { %v3587_v46 = vadd.f32 %v4947_v43, %v3577_v58  ;;  %v4609_v58 = vld [vmem:[%s5503_s19 + $0x34] sm:$0xf]  ;;  %v4463_v43 = vld [vmem:[%s5503_s19 + $0x38] sm:$0xf0] }
 0x6bd   : > { %v7093_v22 = vadd.f32 %v3591_v26, %v3587_v46 }
 0x6bf   : > { %3596 = vadd.xlane.f32.xlu0 %v7093_v22 }
 0x6c2   : > { %v3579_v3 = vpop.f32.mrf.mxu0 }
 0x6c3   : > { %v3588_v12 = vadd.f32 %v4948_v5, %v3579_v3  ;;  %v4462_v3 = vor.u32 %v4610_v62, %v4461_v1 }
 0x6c5   : > { %v7096_v53 = vadd.f32 %v3591_v26, %v3588_v12  ;;  %3794 = vmatpush.bf16.msrb.mxu1 %v4462_v3 }
 0x6c7   : > { %3598 = vadd.xlane.f32.xlu2 %v7096_v53 }
 0x6de   : > { %v3582_v35 = vpop.f32.mrf.mxu0 }
 0x6df   : > { %v3589_v40 = vadd.f32 %v4949_v2, %v3582_v35  ;;  %v4466_v35 = vor.u32 %v4609_v58, %v4463_v43  ;;  %v4453_v2 = vld [vmem:[%s5503_s19 + $0x20] sm:$0xf] }
 0x6e1   : > { %v7099_v54 = vadd.f32 %v3591_v26, %v3589_v40  ;;  %v4608_v40 = vld [vmem:[%s5503_s19 + $0x24] sm:$0xf0]  ;;  %3813 = vmatpush.bf16.msra.mxu2 %v4466_v35 }
 0x6e3   : > { %3600 = vadd.xlane.f32.xlu1 %v7099_v54 }
 0x6e6   : > { %v3584_v50 = vpop.f32.mrf.mxu0 }
 0x6e7   : > { %v3590_v55 = vadd.f32 %v4950_v0, %v3584_v50  ;;  %v4607_v0 = vld [vmem:[%s5503_s19 + $0x24] sm:$0xf] }
 0x6e9   : > { %v7102_v60 = vadd.f32 %v3591_v26, %v3590_v55  ;;  %v4455_v55 = vld [vmem:[%s5503_s19 + $0x28] sm:$0xf0] }
 0x6eb   : > { %3602 = vadd.xlane.f32.xlu0 %v7102_v60 }
 0x732   : > { %v3597_v24 = vpop.xlane.xlu0 %3596 }
 0x733   : > { %v3604_v21 = vmul.f32 %v3597_v24, %v7317_v14 }
 0x735   : > { %v7107_v42 = vsub.f32 %v7093_v22, %v3604_v21  ;;  %v4454_v21 = vor.u32 %v4608_v40, %v4453_v2 }
 0x737   : > { %v3612_v28 = vmul.f32 %v7107_v42, %v7107_v42  ;;  %3795 = vmatpush.bf16.msrb.mxu1 %v4454_v21 }
 0x739   : > { %3616 = vadd.xlane.f32.xlu2 %v3612_v28  ;;  %v4458_v28 = vor.u32 %v4607_v0, %v4455_v55 }
 0x73a   : > { %v3599_v11 = vpop.xlane.xlu2 %3598 }
 0x73b   : > { %v3605_v13 = vmul.f32 %v3599_v11, %v7317_v14  ;;  %v4445_v11 = vld [vmem:[%s5503_s19 + $0x10] sm:$0xf]  ;;  %3814 = vmatpush.bf16.msra.mxu2 %v4458_v28 }
 0x73d   : > { %v7113_v37 = vsub.f32 %v7096_v53, %v3605_v13  ;;  %v4606_v13 = vld [vmem:[%s5503_s19 + $0x14] sm:$0xf0] }
 0x73f   : > { %v3613_v41 = vmul.f32 %v7113_v37, %v7113_v37 }
 0x741   : > { %3618 = vadd.xlane.f32.xlu1 %v3613_v41 }
 0x756   : > { %v3601_v61 = vpop.xlane.xlu1 %3600 }
 0x757   : > { %v3606_v45 = vmul.f32 %v3601_v61, %v7317_v14  ;;  %v4605_v61 = vld [vmem:[%s5503_s19 + $0x14] sm:$0xf] }
 0x759   : > { %v7119_v39 = vsub.f32 %v7099_v54, %v3606_v45  ;;  %v4447_v45 = vld [vmem:[%s5503_s19 + $0x18] sm:$0xf0] }
 0x75b   : > { %v3614_v47 = vmul.f32 %v7119_v39, %v7119_v39 }
 0x75d   : > { %3620 = vadd.xlane.f32.xlu0 %v3614_v47 }
 0x75e   : > { %v3603_v52 = vpop.xlane.xlu0 %3602 }
 0x75f   : > { %v3607_v7 = vmul.f32 %v3603_v52, %v7317_v14  ;;  %v4446_v52 = vor.u32 %v4606_v13, %v4445_v11 }
 0x761   : > { %v7125_v6 = vsub.f32 %v7102_v60, %v3607_v7  ;;  %3796 = vmatpush.bf16.msrb.mxu1 %v4446_v52  ;;  %v4632_v52 = vld [vmem:[%s5505_s30 + $0x68] sm:$0xff] }
 0x763   : > { %v3615_v31 = vmul.f32 %v7125_v6, %v7125_v6 }
 0x765   : > { %3622 = vadd.xlane.f32.xlu2 %v3615_v31  ;;  %v4450_v31 = vor.u32 %v4605_v61, %v4447_v45  ;;  %3797 = vmatpush.bf16.msrb.mxu1 %v4438_v4  ;;  %v4634_v61 = vld [vmem:[%s5505_s30 + $0x78] sm:$0xff]  ;;  %v4624_v45 = vld [vmem:[%s5505_s30 + $0x28] sm:$0xff] }
 0x766   : > { %4052 = vmatpush.bf16.msra.mxu0 %v4634_v61 }
 0x767   : > { %3815 = vmatpush.bf16.msra.mxu2 %v4450_v31  ;;  %v4622_v31 = vld [vmem:[%s5505_s30 + $0x18] sm:$0xff] }
 0x76b   : > { %3816 = vmatpush.bf16.msra.mxu2 %v4442_v20  ;;  %v4620_v20 = vld [vmem:[%s5505_s30 + $0x8] sm:$0xff] }
 0x7ac   : > { %v3617_v57 = vpop.xlane.xlu2 %3616 }
 0x7ad   : > { %v3624_v18 = vmul.f32 %v3617_v57, %v7317_v14 }
 0x7af   : > { %v3628_v30 = vadd.f32 1e-06, %v3624_v18 }
 0x7b1   : > { %4922 = vrsqrt.f32 %v3628_v30  ;;  %vm3638_vm3 = vweird.f32 %v3628_v30 }
 0x7b4   : > { %v3619_v26 = vpop.xlane.xlu1 %3618 }
 0x7b5   : > { %v3625_v46 = vmul.f32 %v3619_v26, %v7317_v14 }
 0x7b7   : > { %v4923_v5 = vpop.eup %4922  ;;  %v3629_v12 = vadd.f32 1e-06, %v3625_v46 }
 0x7b8   : > { %v3633_v50 = vmul.f32 %v4923_v5, %v3628_v30  ;;  %vm3639_vm2 = vweird.f32 %v4923_v5 }
 0x7b9   : > { %4924 = vrsqrt.f32 %v3629_v12  ;;  %vm3640_vm4 = vmor %vm3638_vm3, %vm3639_vm2  ;;  %vm3648_vm6 = vweird.f32 %v3629_v12 }
 0x7ba   : > { %v3634_v24 = vmul.f32 %v4923_v5, %v3633_v50 }
 0x7bc   : > { %v3635_v41 = vmul.f32 0.5, %v3634_v24 }
 0x7be   : > { %v3636_v47 = vsub.f32 1.5, %v3635_v41  ;;  %v4625_v41 = vld [vmem:[%s5505_s30 + $0x30] sm:$0xff] }
 0x7bf   : > { %v4925_v7 = vpop.eup %4924 }
 0x7c0   : > { %v3637_v51 = vmul.f32 %v4923_v5, %v3636_v47  ;;  %v3643_v44 = vmul.f32 %v4925_v7, %v3629_v12  ;;  %vm3649_vm5 = vweird.f32 %v4925_v7  ;;  %v4623_v47 = vld [vmem:[%s5505_s30 + $0x20] sm:$0xff] }
 0x7c1   : > { %vm3650_vm7 = vmor %vm3648_vm6, %vm3649_vm5 }
 0x7c2   : > { %v3644_v25 = vmul.f32 %v4925_v7, %v3643_v44  ;;  %v3641_v57 = vsel %vm3640_vm4, %v4923_v5, %v3637_v51  ;;  %v4621_v51 = vld [vmem:[%s5505_s30 + $0x10] sm:$0xff] }
 0x7c3   : > { %v3672_v56 = vmul.f32 %v3641_v57, %v7107_v42 }
 0x7c4   : > { %v3645_v32 = vmul.f32 0.5, %v3644_v25 }
 0x7c5   : > { %v3677_v27 = vmul.f32 %v3676_v10, %v3672_v56 }
 0x7c6   : > { %v3646_v17 = vsub.f32 1.5, %v3645_v32  ;;  %v4629_v32 = vld [vmem:[%s5505_s30 + $0x50] sm:$0xff] }
 0x7c7   : > { %v3682_v38 = vadd.f32 %v3681_v33, %v3677_v27 }
 0x7c8   : > { %v3647_v18 = vmul.f32 %v4925_v7, %v3646_v17 }
 0x7ca   : > { %v3651_v15 = vsel %vm3650_vm7, %v4925_v7, %v3647_v18  ;;  %v3704_v7 = vld [vmem:[%s5489_s17] sm:$0x3]  ;;  %v4619_v18 = vld [vmem:[%s5505_s30] sm:$0xff] }
 0x7cb   : > { %v3673_v49 = vmul.f32 %v3651_v15, %v7113_v37  ;;  %v7180_v63 = vperm.slane %v3704_v7, 0  ;;  %v7186_v4 = vperm.slane %v3704_v7, 1 }
 0x7cd   : > { %v3678_v29 = vmul.f32 %v3676_v10, %v3673_v49 }
 0x7cf   : > { %v3683_v23 = vadd.f32 %v3681_v33, %v3678_v29 }
 0x7d0   : > { %v3621_v30 = vpop.xlane.xlu0 %3620 }
 0x7d1   : > { %v3626_v9 = vmul.f32 %v3621_v30, %v7317_v14  ;;  %v3686_v42 = vpack.c.bf16 %v3683_v23, %v3682_v38  ;;  %v4628_v30 = vld [vmem:[%s5505_s30 + $0x48] sm:$0xff] }
 0x7d3   : > { %v3630_v16 = vadd.f32 1e-06, %v3626_v9  ;;  %3798 = vmatmul.bf16.vlgmr.msrb.gmra.mxu1 %v3686_v42  ;;  %3817 = vmatmul.bf16.vlgmr.msra.gmra.mxu2 %v3686_v42  ;;  %v4627_v42 = vld [vmem:[%s5505_s30 + $0x40] sm:$0xff] }
 0x7d5   : > { %4926 = vrsqrt.f32 %v3630_v16  ;;  %vm3658_vm9 = vweird.f32 %v3630_v16 }
 0x7d8   : > { %v3623_v36 = vpop.xlane.xlu2 %3622 }
 0x7d9   : > { %v3627_v19 = vmul.f32 %v3623_v36, %v7317_v14 }
 0x7db   : > { %v4927_v1 = vpop.eup %4926  ;;  %v3631_v62 = vadd.f32 1e-06, %v3627_v19 }
 0x7dc   : > { %v3653_v37 = vmul.f32 %v4927_v1, %v3630_v16  ;;  %vm3659_vm8 = vweird.f32 %v4927_v1 }
 0x7dd   : > { %4928 = vrsqrt.f32 %v3631_v62  ;;  %vm3660_vm10 = vmor %vm3658_vm9, %vm3659_vm8  ;;  %vm3668_vm12 = vweird.f32 %v3631_v62 }
 0x7de   : > { %v3654_v26 = vmul.f32 %v4927_v1, %v3653_v37 }
 0x7e0   : > { %v3655_v58 = vmul.f32 0.5, %v3654_v26 }
 0x7e2   : > { %v3656_v43 = vsub.f32 1.5, %v3655_v58 }
 0x7e3   : > { %v4929_v46 = vpop.eup %4928 }
 0x7e4   : > { %v3657_v3 = vmul.f32 %v4927_v1, %v3656_v43  ;;  %v3663_v5 = vmul.f32 %v4929_v46, %v3631_v62  ;;  %vm3669_vm11 = vweird.f32 %v4929_v46 }
 0x7e5   : > { %vm3670_vm13 = vmor %vm3668_vm12, %vm3669_vm11 }
 0x7e6   : > { %v3664_v12 = vmul.f32 %v4929_v46, %v3663_v5  ;;  %v3661_v2 = vsel %vm3660_vm10, %v4927_v1, %v3657_v3 }
 0x7e7   : > { %v3674_v14 = vmul.f32 %v3661_v2, %v7119_v39  ;;  %v4626_v39 = vld [vmem:[%s5505_s30 + $0x38] sm:$0xff] }
 0x7e8   : > { %v3665_v35 = vmul.f32 0.5, %v3664_v12  ;;  %4033 = vmatpush.bf16.msrb.mxu3 %v4626_v39 }
 0x7e9   : > { %v3679_v24 = vmul.f32 %v3676_v10, %v3674_v14 }
 0x7ea   : > { %v3666_v40 = vsub.f32 1.5, %v3665_v35 }
 0x7eb   : > { %v3684_v28 = vadd.f32 %v3681_v33, %v3679_v24 }
 0x7ec   : > { %v3667_v50 = vmul.f32 %v4929_v46, %v3666_v40  ;;  %4034 = vmatpush.bf16.msrb.mxu3 %v4625_v41 }
 0x7ee   : > { %v3671_v0 = vsel %vm3670_vm13, %v4929_v46, %v3667_v50 }
 0x7ef   : > { %v3675_v55 = vmul.f32 %v3671_v0, %v7125_v6  ;;  %v4633_v6 = vld [vmem:[%s5505_s30 + $0x70] sm:$0xff] }
 0x7f0   : > { %4035 = vmatpush.bf16.msrb.mxu3 %v4624_v45  ;;  %4053 = vmatpush.bf16.msra.mxu0 %v4633_v6 }
 0x7f1   : > { %v3680_v21 = vmul.f32 %v3676_v10, %v3675_v55 }
 0x7f3   : > { %v3685_v11 = vadd.f32 %v3681_v33, %v3680_v21 }
 0x7f4   : > { %4036 = vmatpush.bf16.msrb.mxu3 %v4623_v47  ;;  %4054 = vmatpush.bf16.msra.mxu0 %v4632_v52 }
 0x7f5   : > { %v3687_v13 = vpack.c.bf16 %v3685_v11, %v3684_v28 }
 0x7f7   : > { %3803 = vmatmul.bf16.gmra.mxu1 %v3687_v13  ;;  %3822 = vmatmul.bf16.gmra.mxu2 %v3687_v13 }
 0x7f8   : > { %4037 = vmatpush.bf16.msrb.mxu3 %v4622_v31  ;;  %4055 = vmatpush.bf16.msra.mxu0 %v4631_v34 }
 0x7fc   : > { %4038 = vmatpush.bf16.msrb.mxu3 %v4621_v51  ;;  %4056 = vmatpush.bf16.msra.mxu0 %v4630_v8 }
 0x800   : > { %4039 = vmatpush.bf16.msrb.mxu3 %v4620_v20  ;;  %4057 = vmatpush.bf16.msra.mxu0 %v4629_v32 }
 0x804   : > { %4040 = vmatpush.bf16.msrb.mxu3 %v4619_v18  ;;  %4058 = vmatpush.bf16.msra.mxu0 %v4628_v30 }
 0x808   : > { %4059 = vmatpush.bf16.msra.mxu0 %v4627_v42 }
 0x850   : > { %v3799_v44 = vpop.f32.mrf.mxu1 }
 0x851   : > { %v3800_v48 = vadd.f32 %v3799_v44, %v7180_v63 }
 0x853   : > { %v3836_v25 = vmul.f32 0.044715, %v3800_v48  ;;  %v3828_v14 = vmul.f32 0.5, %v3800_v48 }
 0x855   : > { %v3844_v57 = vmul.f32 %v3836_v25, %v3800_v48 }
 0x856   : > { %v3818_v17 = vpop.f32.mrf.mxu2 }
 0x857   : > { %v3852_v56 = vmul.f32 %v3844_v57, %v3800_v48  ;;  %v3819_v10 = vadd.f32 %v3818_v17, %v7186_v4 }
 0x858   : > { %v3801_v15 = vpop.f32.mrf.mxu1 }
 0x859   : > { %v3860_v49 = vadd.f32 %v3852_v56, %v3800_v48  ;;  %v3837_v27 = vmul.f32 0.044715, %v3819_v10  ;;  %v3802_v33 = vadd.f32 %v3801_v15, %v7180_v63  ;;  %v3829_v61 = vmul.f32 0.5, %v3819_v10 }
 0x85b   : > { %v3845_v29 = vmul.f32 %v3837_v27, %v3819_v10  ;;  %v3838_v9 = vmul.f32 0.044715, %v3802_v33  ;;  %v3868_v38 = vmul.f32 0.7978846, %v3860_v49  ;;  %v3830_v50 = vmul.f32 0.5, %v3802_v33 }
 0x85d   : > { %v3853_v23 = vmul.f32 %v3845_v29, %v3819_v10  ;;  %v3846_v16 = vmul.f32 %v3838_v9, %v3802_v33  ;;  %4930 = vtanh.f32 %v3868_v38 }
 0x85e   : > { %v3820_v36 = vpop.f32.mrf.mxu2 }
 0x85f   : > { %v3861_v19 = vadd.f32 %v3853_v23, %v3819_v10  ;;  %v3854_v1 = vmul.f32 %v3846_v16, %v3802_v33  ;;  %v3821_v62 = vadd.f32 %v3820_v36, %v7186_v4 }
 0x861   : > { %v3862_v37 = vadd.f32 %v3854_v1, %v3802_v33  ;;  %v3839_v26 = vmul.f32 0.044715, %v3821_v62  ;;  %v3869_v58 = vmul.f32 0.7978846, %v3861_v19  ;;  %v3831_v45 = vmul.f32 0.5, %v3821_v62 }
 0x863   : > { %v3870_v43 = vmul.f32 0.7978846, %v3862_v37  ;;  %v3847_v46 = vmul.f32 %v3839_v26, %v3821_v62  ;;  %v4931_v5 = vpop.eup %4930 }
 0x864   : > { %v3884_v2 = vadd.f32 1.0, %v4931_v5 }
 0x865   : > { %v3855_v3 = vmul.f32 %v3847_v46, %v3821_v62  ;;  %4932 = vtanh.f32 %v3870_v43 }
 0x866   : > { %4934 = vtanh.f32 %v3869_v58  ;;  %v3892_v24 = vmul.f32 %v3884_v2, %v3828_v14 }
 0x867   : > { %v3863_v12 = vadd.f32 %v3855_v3, %v3821_v62 }
 0x869   : > { %v3871_v35 = vmul.f32 0.7978846, %v3863_v12 }
 0x86b   : > { %v4933_v40 = vpop.eup %4932  ;;  %4936 = vtanh.f32 %v3871_v35 }
 0x86c   : > { %v3886_v0 = vadd.f32 1.0, %v4933_v40  ;;  %v4935_v55 = vpop.eup %4934 }
 0x86d   : > { %v3885_v13 = vadd.f32 1.0, %v4935_v55 }
 0x86e   : > { %v3894_v21 = vmul.f32 %v3886_v0, %v3830_v50  ;;  %v3936_v0 = vperm.slane %v7090_v59, 5 }
 0x86f   : > { %v3893_v52 = vmul.f32 %v3885_v13, %v3829_v61 }
 0x870   : > { %v3900_v28 = vpack.c.bf16 %v3894_v21, %v3892_v24 }
 0x871   : > { %v4937_v39 = vpop.eup %4936 }
 0x872   : > { %4041 = vmatmul.bf16.vlgmr.msrb.gmra.mxu3 %v3900_v28  ;;  %v3887_v6 = vadd.f32 1.0, %v4937_v39 }
 0x874   : > { %v3804_v11 = vpop.f32.mrf.mxu1  ;;  %v3895_v7 = vmul.f32 %v3887_v6, %v3831_v45 }
 0x875   : > { %v3805_v41 = vadd.f32 %v3804_v11, %v7180_v63 }
 0x876   : > { %v3901_v34 = vpack.c.bf16 %v3895_v7, %v3893_v52 }
 0x877   : > { %v3840_v47 = vmul.f32 0.044715, %v3805_v41  ;;  %v3832_v62 = vmul.f32 0.5, %v3805_v41 }
 0x878   : > { %4060 = vmatmul.bf16.vlgmr.msra.gmra.mxu0 %v3901_v34 }
 0x879   : > { %v3848_v31 = vmul.f32 %v3840_v47, %v3805_v41 }
 0x87a   : > { %v3823_v51 = vpop.f32.mrf.mxu2 }
 0x87b   : > { %v3824_v44 = vadd.f32 %v3823_v51, %v7186_v4  ;;  %v3856_v48 = vmul.f32 %v3848_v31, %v3805_v41 }
 0x87c   : > { %v3806_v8 = vpop.f32.mrf.mxu1 }
 0x87d   : > { %v3841_v25 = vmul.f32 0.044715, %v3824_v44  ;;  %v3807_v20 = vadd.f32 %v3806_v8, %v7180_v63  ;;  %v3864_v57 = vadd.f32 %v3856_v48, %v3805_v41  ;;  %v3833_v12 = vmul.f32 0.5, %v3824_v44 }
 0x87f   : > { %v3842_v32 = vmul.f32 0.044715, %v3807_v20  ;;  %v3849_v17 = vmul.f32 %v3841_v25, %v3824_v44  ;;  %v3872_v10 = vmul.f32 0.7978846, %v3864_v57  ;;  %v3834_v37 = vmul.f32 0.5, %v3807_v20 }
 0x881   : > { %v3850_v56 = vmul.f32 %v3842_v32, %v3807_v20  ;;  %v3857_v18 = vmul.f32 %v3849_v17, %v3824_v44  ;;  %4938 = vtanh.f32 %v3872_v10 }
 0x882   : > { %v3825_v15 = vpop.f32.mrf.mxu2 }
 0x883   : > { %v3826_v49 = vadd.f32 %v3825_v15, %v7186_v4  ;;  %v3858_v27 = vmul.f32 %v3850_v56, %v3807_v20  ;;  %v3865_v33 = vadd.f32 %v3857_v18, %v3824_v44 }
 0x885   : > { %v3843_v30 = vmul.f32 0.044715, %v3826_v49  ;;  %v3866_v29 = vadd.f32 %v3858_v27, %v3807_v20  ;;  %v3873_v23 = vmul.f32 0.7978846, %v3865_v33  ;;  %v3835_v35 = vmul.f32 0.5, %v3826_v49 }
 0x887   : > { %v3874_v9 = vmul.f32 0.7978846, %v3866_v29  ;;  %v3851_v38 = vmul.f32 %v3843_v30, %v3826_v49  ;;  %v4939_v63 = vpop.eup %4938 }
 0x888   : > { %v3888_v19 = vadd.f32 1.0, %v4939_v63 }
 0x889   : > { %4940 = vtanh.f32 %v3874_v9  ;;  %v3859_v16 = vmul.f32 %v3851_v38, %v3826_v49 }
 0x88a   : > { %4942 = vtanh.f32 %v3873_v23  ;;  %v3896_v58 = vmul.f32 %v3888_v19, %v3832_v62 }
 0x88b   : > { %v3867_v42 = vadd.f32 %v3859_v16, %v3826_v49 }
 0x88d   : > { %v3875_v36 = vmul.f32 0.7978846, %v3867_v42 }
 0x88f   : > { %v4941_v1 = vpop.eup %4940  ;;  %4944 = vtanh.f32 %v3875_v36 }
 0x890   : > { %v3890_v4 = vadd.f32 1.0, %v4941_v1  ;;  %v4943_v26 = vpop.eup %4942 }
 0x891   : > { %v3889_v3 = vadd.f32 1.0, %v4943_v26 }
 0x892   : > { %v3898_v43 = vmul.f32 %v3890_v4, %v3834_v37 }
 0x893   : > { %v3897_v40 = vmul.f32 %v3889_v3, %v3833_v12 }
 0x894   : > { %v3902_v46 = vpack.c.bf16 %v3898_v43, %v3896_v58 }
 0x895   : > { %v4945_v5 = vpop.eup %4944 }
 0x896   : > { %4046 = vmatmul.bf16.gmra.mxu3 %v3902_v46  ;;  %v3891_v2 = vadd.f32 1.0, %v4945_v5 }
 0x898   : > { %v3899_v14 = vmul.f32 %v3891_v2, %v3835_v35 }
 0x89a   : > { %v3903_v50 = vpack.c.bf16 %v3899_v14, %v3897_v40 }
 0x89c   : > { %4065 = vmatmul.bf16.gmra.mxu0 %v3903_v50 }
 0x8f5   : > { %v4042_v55 = vpop.f32.mrf.mxu3  ;;  %v4061_v24 = vpop.f32.mrf.mxu0 }
 0x8f6   : > { %v4043_v21 = vadd.f32 %v4042_v55, %v3936_v0 }
 0x8f8   : > { %v4062_v28 = vadd.f32 %v4061_v24, %v4043_v21 }
 0x8fa   : > { %v4071_v11 = vadd.f32 %v4062_v28, %v7093_v22 }
 0x8fc   : > { %4075 = vst [vmem:[#allocation14] sm:$0xff] %v4071_v11 }
 0x8fd   : > { %v4044_v13 = vpop.f32.mrf.mxu3  ;;  %v4063_v41 = vpop.f32.mrf.mxu0 }
 0x8fe   : > { %v4045_v39 = vadd.f32 %v4044_v13, %v3936_v0 }
 0x900   : > { %v4064_v61 = vadd.f32 %v4063_v41, %v4045_v39 }
 0x902   : > { %v4072_v45 = vadd.f32 %v4064_v61, %v7096_v53 }
 0x904   : > { %4076 = vst [vmem:[#allocation14 + $0x8] sm:$0xff] %v4072_v45 }
 0x919   : > { %v4047_v6 = vpop.f32.mrf.mxu3  ;;  %v4066_v47 = vpop.f32.mrf.mxu0 }
 0x91a   : > { %v4048_v52 = vadd.f32 %v4047_v6, %v3936_v0 }
 0x91c   : > { %v4067_v59 = vadd.f32 %v4066_v47, %v4048_v52 }
 0x91e   : > { %v4073_v7 = vadd.f32 %v4067_v59, %v7099_v54 }
 0x920   : > { %4077 = vst [vmem:[#allocation14 + $0x10] sm:$0xff] %v4073_v7 }
 0x921   : > { %v4049_v31 = vpop.f32.mrf.mxu3  ;;  %v4068_v22 = vpop.f32.mrf.mxu0 }
 0x922   : > { %v4050_v34 = vadd.f32 %v4049_v31, %v3936_v0 }
 0x924   : > { %v4069_v51 = vadd.f32 %v4068_v22, %v4050_v34 }
 0x926   : > { %v4074_v53 = vadd.f32 %v4069_v51, %v7102_v60 }
 0x928   : > { %4078 = vst [vmem:[#allocation14 + $0x18] sm:$0xff] %v4074_v53 }
 0x929   : > { %4655 = dma.vmem_to_hbm [thread:$0]  (%p4679_p5), %s518_s15, 512, %s4087_s10, [#allocation5], %s5256_s8, %s5256_s8, %s5257_s11  }
 0x92a   : > { %5224 = dma.done.wait (%p4679_p5), [#allocation5], 512  }
 0x92b   : > { %5226 = vsyncadd (%p4679_p5), [#allocation5], 4294966784 }
 0x92c PF: > { %s7319_s30 = sld [smem:[#allocation26_spill]]  ;;  %s7322_s27 = smov %s5233_s28 }
 0x92d   : > { %s7320_s18 = sld [smem:[#allocation25_spill]] }
 0x92e   : > { %s7321_s29 = sld [smem:[#allocation27_spill]] }
 0x932   : > { %p28_p7 = scmp.ge.s32.totalorder %s7319_s30, 4  }
 0x933   : > { %s7323_s28 = smov %s7320_s18 }
 0x934   :  { %30 = sbr.rel (!%p28_p7) target bundleno = 15 (0xf), region = 157 }
 0x939   :  { %4103 = vsyncpa [#allocation4], 1 }
 0x93a   :  { %4105 = vsyncpa [#allocation4 + $0x1], 1 }
 0x93b   :  { %4106 = vsyncpa [#allocation7], 1 }
 0x93c   :  { %4108 = vsyncpa [#allocation7 + $0x1], 1 }
 0x93d   :  { %4109 = vsyncpa [#allocation10], 1 }
 0x93e   :  { %4111 = vsyncpa [#allocation10 + $0x1], 1 }
 0x93f   :  { %4112 = vsyncpa [#allocation13], 1 }
 0x940   :  { %4114 = vsyncpa [#allocation13 + $0x1], 1 }
 0x941   :  { %4115 = vsyncpa [#allocation5], 1 }
 0x942   :  { %4117 = vsyncpa [#allocation5 + $0x1], 1 }
 0x943   :  { %4118 = vsyncmov [#allocation2] }
 0x946   :  { %s4119_s9 = vpop.sfrf %4118 }
 0x947   :  { %p4567_p11 = scmp.ne.s32.totalorder %s4119_s9, 0 }
 0x949   :  { %4123 = shalt.err (%p4567_p11)  }

</bundles_post_ra>
